<compile_context>
chip_gen: v7x
topology: tpu7x:2x2x1
jax: 0.10.0
libtpu: 0.0.40
codegen_flags: <defaults>
</compile_context>

<pallas_src>
import jax
import jax.numpy as jnp
from jax.experimental import pallas as pl
from jax.experimental.pallas import tpu as pltpu

VMEM = pl.BlockSpec(memory_space=pltpu.MemorySpace.VMEM)


# ------------------------------ in-kernel helpers ------------------------------ #

def _bf16_dot(a, b):
    """MXU matmul with bf16 operands and f32 accumulation."""
    return jnp.dot(a.astype(jnp.bfloat16), b.astype(jnp.bfloat16),
                   preferred_element_type=jnp.float32)


def _shift_right(v):
    """out[:, m] = v[:, m-1], out[:, 0] = 0 (shift-matrix matmul, MXU only)."""
    n = v.shape[-1]
    i = jax.lax.broadcasted_iota(jnp.int32, (n, n), 0)
    j = jax.lax.broadcasted_iota(jnp.int32, (n, n), 1)
    s = jnp.where(j == i + 1, 1.0, 0.0)
    return _bf16_dot(v, s)


def _shift_left(v):
    """out[:, m] = v[:, m+1], out[:, n-1] = 0."""
    n = v.shape[-1]
    i = jax.lax.broadcasted_iota(jnp.int32, (n, n), 0)
    j = jax.lax.broadcasted_iota(jnp.int32, (n, n), 1)
    s = jnp.where(j + 1 == i, 1.0, 0.0)
    return _bf16_dot(v, s)


# --------------------------------- kernels ------------------------------------- #

def _encoder_kernel(xph_ref, w1_ref, b1_ref, w2_ref, b2_ref, w3_ref, b3_ref, h_ref):
    # xph_ref: (1, 8, Cin, 25) input phases: x[b, c, 8m+p] == xph[b, p, c, m]
    # w*_ref : (3, Cout, Cin) conv taps (bf16);  b*_ref: (Cout, 1) f32
    # h_ref  : (1, 64, 25) encoder output (channels x positions)
    x = [xph_ref[0, p] for p in range(8)]                         # (Cin, 25) each
    W1 = [w1_ref[k] for k in range(3)]
    W2 = [w2_ref[k] for k in range(3)]
    W3 = [w3_ref[k] for k in range(3)]
    b1, b2, b3 = b1_ref[...], b2_ref[...], b3_ref[...]

    # Conv1d(Cin->16, k=3, s=2, p=1) + ReLU : 200 -> 100, kept as 4 phases.
    #   out[l] = W0 x[2l-1] + W1 x[2l] + W2 x[2l+1]   (x[-1] = 0 is the left pad)
    taps = [(_shift_right(x[7]), x[0], x[1]),
            (x[1], x[2], x[3]),
            (x[3], x[4], x[5]),
            (x[5], x[6], x[7])]
    a = [jnp.maximum(_bf16_dot(W1[0], t0) + _bf16_dot(W1[1], t1)
                     + _bf16_dot(W1[2], t2) + b1, 0.0)
         for (t0, t1, t2) in taps]

    # Conv1d(16->32) + ReLU : 100 -> 50, kept as 2 phases.
    c0 = jnp.maximum(_bf16_dot(W2[0], _shift_right(a[3])) + _bf16_dot(W2[1], a[0])
                     + _bf16_dot(W2[2], a[1]) + b2, 0.0)
    c1 = jnp.maximum(_bf16_dot(W2[0], a[1]) + _bf16_dot(W2[1], a[2])
                     + _bf16_dot(W2[2], a[3]) + b2, 0.0)

    # Conv1d(32->64) + ReLU : 50 -> 25, dense.
    h = jnp.maximum(_bf16_dot(W3[0], _shift_right(c1)) + _bf16_dot(W3[1], c0)
                    + _bf16_dot(W3[2], c1) + b3, 0.0)
    h_ref[0] = h


def _bottleneck_kernel(h_ref, eps_ref, wms_ref, bms_ref, wz_ref, bz_ref,
                       mu_ref, sigma_ref, hz_ref):
    # fc_mu + fc_sigma merged into one (1600, 2*z) matmul, then reparam, then fc_z.
    z_dim = mu_ref.shape[1]
    h = h_ref[...]                                                 # (B, 1600) f32
    ms = _bf16_dot(h, wms_ref[...]) + bms_ref[...]                 # (B, 2*z_dim)
    mu = ms[:, :z_dim]
    sigma = ms[:, z_dim:2 * z_dim]
    z = mu + sigma * eps_ref[...]                                  # z = mu + sigma*eps
    hz = _bf16_dot(z, wz_ref[...]) + bz_ref[...]                   # (B, 1600) lane-dense
    mu_ref[...] = mu
    sigma_ref[...] = sigma
    hz_ref[...] = hz


def _decoder_kernel(hd_ref, v1_ref, c1_ref, v2_ref, c2_ref, v3_ref, c3_ref, yph_ref):
    # hd_ref : (1, 64, 25) decoder input (channels x positions)
    # v*_ref : (3, Cout, Cin) transposed-conv taps (bf16); c*_ref: (Cout, 1) f32
    # yph_ref: (1, 8, Cout, 25) output phases: y[b, c, 8m+q] == yph[b, q, c, m]
    h = hd_ref[0]
    V1 = [v1_ref[k] for k in range(3)]
    V2 = [v2_ref[k] for k in range(3)]
    V3 = [v3_ref[k] for k in range(3)]
    c1b, c2b, c3b = c1_ref[...], c2_ref[...], c3_ref[...]

    # ConvTranspose1d(k=3, s=2, p=1, op=1):
    #   out[2m] = V1 x[m] ;  out[2m+1] = V2 x[m] + V0 x[m+1]   (x[L] = 0 boundary)

    # layer 1 (64->32) + ReLU : 25 -> 50, as 2 phases.
    e1 = jnp.maximum(_bf16_dot(V1[1], h) + c1b, 0.0)
    o1 = jnp.maximum(_bf16_dot(V1[2], h) + _bf16_dot(V1[0], _shift_left(h)) + c1b, 0.0)

    # layer 2 (32->16) + ReLU : 50 -> 100, as 4 phases.
    p0 = jnp.maximum(_bf16_dot(V2[1], e1) + c2b, 0.0)
    p1 = jnp.maximum(_bf16_dot(V2[2], e1) + _bf16_dot(V2[0], o1) + c2b, 0.0)
    p2 = jnp.maximum(_bf16_dot(V2[1], o1) + c2b, 0.0)
    p3 = jnp.maximum(_bf16_dot(V2[2], o1) + _bf16_dot(V2[0], _shift_left(e1)) + c2b, 0.0)

    # layer 3 (16->Cout), no activation : 100 -> 200, as 8 phases.
    ps = [p0, p1, p2, p3]
    for r in range(4):
        nxt = ps[r + 1] if r < 3 else _shift_left(p0)
        yph_ref[0, 2 * r] = _bf16_dot(V3[1], ps[r]) + c3b
        yph_ref[0, 2 * r + 1] = _bf16_dot(V3[2], ps[r]) + _bf16_dot(V3[0], nxt) + c3b


# ------------------------------ pallas_call wrappers ---------------------------- #

def _full_spec(a):
    return pl.BlockSpec(a.shape, lambda b, _nd=a.ndim: (0,) * _nd)


def _encode(xph, w1, b1, w2, b2, w3, b3):
    B, _, cin, _ = xph.shape
    return pl.pallas_call(
        _encoder_kernel,
        out_shape=jax.ShapeDtypeStruct((B, 64, 25), jnp.float32),
        grid=(B,),
        in_specs=[pl.BlockSpec((1, 8, cin, 25), lambda b: (b, 0, 0, 0)),
                  _full_spec(w1), _full_spec(b1),
                  _full_spec(w2), _full_spec(b2),
                  _full_spec(w3), _full_spec(b3)],
        out_specs=pl.BlockSpec((1, 64, 25), lambda b: (b, 0, 0)),
        compiler_params=pltpu.CompilerParams(dimension_semantics=("parallel",)),
    )(xph, w1, b1, w2, b2, w3, b3)


def _bottleneck(h_flat, eps, wms, bms, wz, bz, z_dim):
    B, flat = h_flat.shape
    return pl.pallas_call(
        _bottleneck_kernel,
        out_shape=(jax.ShapeDtypeStruct((B, z_dim), jnp.float32),
                   jax.ShapeDtypeStruct((B, z_dim), jnp.float32),
                   jax.ShapeDtypeStruct((B, flat), jnp.float32)),
        in_specs=[VMEM] * 6,
        out_specs=(VMEM, VMEM, VMEM),
    )(h_flat, eps, wms, bms, wz, bz)


def _decode(hd, v1, c1, v2, c2, v3, c3):
    B = hd.shape[0]
    cout = v3.shape[1]
    return pl.pallas_call(
        _decoder_kernel,
        out_shape=jax.ShapeDtypeStruct((B, 8, cout, 25), jnp.float32),
        grid=(B,),
        in_specs=[pl.BlockSpec((1, 64, 25), lambda b: (b, 0, 0)),
                  _full_spec(v1), _full_spec(c1),
                  _full_spec(v2), _full_spec(c2),
                  _full_spec(v3), _full_spec(c3)],
        out_specs=pl.BlockSpec((1, 8, cout, 25), lambda b: (b, 0, 0, 0)),
        compiler_params=pltpu.CompilerParams(dimension_semantics=("parallel",)),
    )(hd, v1, c1, v2, c2, v3, c3)


# --------------------------------- parameters ----------------------------------- #

def _uniform(key, shape, fan_in):
    bound = 1.0 / jnp.sqrt(jnp.float32(fan_in))
    return jax.random.uniform(key, shape, jnp.float32, -bound, bound)


def init_params(key, input_channels=2, z_dim=20):
    """PyTorch-default-style init, stored in kernel-ready layouts (done once):
       conv taps (3, Cout, Cin) bf16, biases (Cout, 1) f32, fc_mu/fc_sigma merged and
       pre-transposed to (1600, 2*z) bf16, fc_z pre-transposed to (z, 1600) bf16."""
    ks = jax.random.split(key, 18)
    flat = 64 * 25
    cin = input_channels

    def conv_prep(w):        # torch (Cout, Cin, K) -> (K, Cout, Cin)
        return jnp.transpose(w, (2, 0, 1)).astype(jnp.bfloat16)

    def deconv_prep(w):      # torch (Cin, Cout, K) -> (K, Cout, Cin)
        return jnp.transpose(w, (2, 1, 0)).astype(jnp.bfloat16)

    def cbias(b):
        return b.reshape(-1, 1).astype(jnp.float32)

    p = {}
    p["enc1_w"] = conv_prep(_uniform(ks[0], (16, cin, 3), cin * 3))
    p["enc1_b"] = cbias(_uniform(ks[1], (16,), cin * 3))
    p["enc2_w"] = conv_prep(_uniform(ks[2], (32, 16, 3), 16 * 3))
    p["enc2_b"] = cbias(_uniform(ks[3], (32,), 16 * 3))
    p["enc3_w"] = conv_prep(_uniform(ks[4], (64, 32, 3), 32 * 3))
    p["enc3_b"] = cbias(_uniform(ks[5], (64,), 32 * 3))

    fc_mu_w = _uniform(ks[6], (z_dim, flat), flat)     # torch Linear weight (out, in)
    fc_mu_b = _uniform(ks[7], (z_dim,), flat)
    fc_sg_w = _uniform(ks[8], (z_dim, flat), flat)
    fc_sg_b = _uniform(ks[9], (z_dim,), flat)
    p["fc_musig_w"] = jnp.concatenate([fc_mu_w.T, fc_sg_w.T], axis=1).astype(jnp.bfloat16)
    p["fc_musig_b"] = jnp.concatenate([fc_mu_b, fc_sg_b]).reshape(1, 2 * z_dim)

    fc_z_w = _uniform(ks[10], (flat, z_dim), z_dim)
    fc_z_b = _uniform(ks[11], (flat,), z_dim)
    p["fc_z_w"] = fc_z_w.T.astype(jnp.bfloat16)        # (z_dim, flat)
    p["fc_z_b"] = fc_z_b.reshape(1, flat)

    p["dec1_w"] = deconv_prep(_uniform(ks[12], (64, 32, 3), 64 * 3))
    p["dec1_b"] = cbias(_uniform(ks[13], (32,), 64 * 3))
    p["dec2_w"] = deconv_prep(_uniform(ks[14], (32, 16, 3), 32 * 3))
    p["dec2_b"] = cbias(_uniform(ks[15], (16,), 32 * 3))
    p["dec3_w"] = deconv_prep(_uniform(ks[16], (16, cin, 3), 16 * 3))
    p["dec3_b"] = cbias(_uniform(ks[17], (cin,), 16 * 3))
    return p


# --------------------------------- VAE forward ----------------------------------- #

def vae_forward(params, x, eps):
    B, C, L = x.shape
    assert L % 8 == 0 and L // 8 == 25, "module requires input_length=200"
    # de-interleave input into 8 phases: xph[b, p, c, m] = x[b, c, 8m+p]
    xph = jnp.transpose(x.reshape(B, C, L // 8, 8), (0, 3, 1, 2))

    h = _encode(xph, params["enc1_w"], params["enc1_b"], params["enc2_w"],
                params["enc2_b"], params["enc3_w"], params["enc3_b"])      # (B, 64, 25)
    h_flat = h.reshape(B, 64 * 25)                                         # torch Flatten
    mu, sigma, hz = _bottleneck(h_flat, eps, params["fc_musig_w"],
                                params["fc_musig_b"], params["fc_z_w"],
                                params["fc_z_b"], z_dim=eps.shape[1])
    hd = hz.reshape(B, 64, 25)                                             # torch .view
    yph = _decode(hd, params["dec1_w"], params["dec1_b"], params["dec2_w"],
                  params["dec2_b"], params["dec3_w"], params["dec3_b"])    # (B, 8, C, 25)
    # re-interleave output phases: x_rec[b, c, 8m+q] = yph[b, q, c, m]
    x_rec = jnp.transpose(yph, (0, 2, 3, 1)).reshape(B, C, L)
    return x_rec, mu, sigma


if __name__ == "__main__":
    key = jax.random.PRNGKey(0)
    k_param, k_x, k_eps = jax.random.split(key, 3)

    B, C, L, Z = 2, 2, 200, 20     # input_length=200 is required by the fc layers (64*25)
    params = init_params(k_param, input_channels=C, z_dim=Z)
    x = jax.random.normal(k_x, (B, C, L), jnp.float32)
    # TODO(synk): torch samples epsilon inside forward (randn_like); here it is an
    # explicit deterministic input so the kernel itself stays RNG-free.
    eps = jax.random.normal(k_eps, (B, Z), jnp.float32)

    fwd = jax.jit(vae_forward)
    x_rec, mu, sigma = fwd(params, x, eps)
    jax.block_until_ready((x_rec, mu, sigma))

    assert x_rec.shape == (B, C, L), x_rec.shape
    assert mu.shape == (B, Z) and sigma.shape == (B, Z)
    assert bool(jnp.isfinite(x_rec).all()) and bool(jnp.isfinite(mu).all())
    print("KERNEL_OK")
</pallas_src>

<mosaic_0001>
module attributes {stable_mosaic.version = 11 : i64} {
  func.func @_encoder_kernel(%arg0: i32, %arg1: memref<1x8x2x25xf32, #tpu.memory_space<vmem>>, %arg2: memref<3x16x2xbf16, #tpu.memory_space<vmem>>, %arg3: memref<16x1xf32, #tpu.memory_space<vmem>>, %arg4: memref<3x32x16xbf16, #tpu.memory_space<vmem>>, %arg5: memref<32x1xf32, #tpu.memory_space<vmem>>, %arg6: memref<3x64x32xbf16, #tpu.memory_space<vmem>>, %arg7: memref<64x1xf32, #tpu.memory_space<vmem>>, %arg8: memref<1x64x25xf32, #tpu.memory_space<vmem>>) attributes {dimension_semantics = [#tpu.dimension_semantics<parallel>], iteration_bounds = array<i64: 2>, scalar_prefetch = 0 : i64, scratch_operands = 0 : i64, tpu.core_type = #tpu.core_type<tc>, window_params = [{transform_indices = @transform_0, window_bounds = array<i64: 1, 8, 2, 25>}, {pipeline_mode = #tpu.pipeline_mode<synchronous>, transform_indices = @transform_1, window_bounds = array<i64: 3, 16, 2>}, {pipeline_mode = #tpu.pipeline_mode<synchronous>, transform_indices = @transform_2, window_bounds = array<i64: 16, 1>}, {pipeline_mode = #tpu.pipeline_mode<synchronous>, transform_indices = @transform_3, window_bounds = array<i64: 3, 32, 16>}, {pipeline_mode = #tpu.pipeline_mode<synchronous>, transform_indices = @transform_4, window_bounds = array<i64: 32, 1>}, {pipeline_mode = #tpu.pipeline_mode<synchronous>, transform_indices = @transform_5, window_bounds = array<i64: 3, 64, 32>}, {pipeline_mode = #tpu.pipeline_mode<synchronous>, transform_indices = @transform_6, window_bounds = array<i64: 64, 1>}, {transform_indices = @transform_7, window_bounds = array<i64: 1, 64, 25>}]} {
    %c0 = arith.constant 0 : index
    %c0_0 = arith.constant 0 : index
    %c0_1 = arith.constant 0 : index
    %c0_2 = arith.constant 0 : index
    %0 = vector.load %arg1[%c0, %c0_0, %c0_1, %c0_2] : memref<1x8x2x25xf32, #tpu.memory_space<vmem>>, vector<1x1x2x25xf32>
    %1 = vector.shape_cast %0 : vector<1x1x2x25xf32> to vector<2x25xf32>
    %c0_3 = arith.constant 0 : index
    %c1 = arith.constant 1 : index
    %c0_4 = arith.constant 0 : index
    %c0_5 = arith.constant 0 : index
    %2 = vector.load %arg1[%c0_3, %c1, %c0_4, %c0_5] : memref<1x8x2x25xf32, #tpu.memory_space<vmem>>, vector<1x1x2x25xf32>
    %3 = vector.shape_cast %2 : vector<1x1x2x25xf32> to vector<2x25xf32>
    %c0_6 = arith.constant 0 : index
    %c2 = arith.constant 2 : index
    %c0_7 = arith.constant 0 : index
    %c0_8 = arith.constant 0 : index
    %4 = vector.load %arg1[%c0_6, %c2, %c0_7, %c0_8] : memref<1x8x2x25xf32, #tpu.memory_space<vmem>>, vector<1x1x2x25xf32>
    %5 = vector.shape_cast %4 : vector<1x1x2x25xf32> to vector<2x25xf32>
    %c0_9 = arith.constant 0 : index
    %c3 = arith.constant 3 : index
    %c0_10 = arith.constant 0 : index
    %c0_11 = arith.constant 0 : index
    %6 = vector.load %arg1[%c0_9, %c3, %c0_10, %c0_11] : memref<1x8x2x25xf32, #tpu.memory_space<vmem>>, vector<1x1x2x25xf32>
    %7 = vector.shape_cast %6 : vector<1x1x2x25xf32> to vector<2x25xf32>
    %c0_12 = arith.constant 0 : index
    %c4 = arith.constant 4 : index
    %c0_13 = arith.constant 0 : index
    %c0_14 = arith.constant 0 : index
    %8 = vector.load %arg1[%c0_12, %c4, %c0_13, %c0_14] : memref<1x8x2x25xf32, #tpu.memory_space<vmem>>, vector<1x1x2x25xf32>
    %9 = vector.shape_cast %8 : vector<1x1x2x25xf32> to vector<2x25xf32>
    %c0_15 = arith.constant 0 : index
    %c5 = arith.constant 5 : index
    %c0_16 = arith.constant 0 : index
    %c0_17 = arith.constant 0 : index
    %10 = vector.load %arg1[%c0_15, %c5, %c0_16, %c0_17] : memref<1x8x2x25xf32, #tpu.memory_space<vmem>>, vector<1x1x2x25xf32>
    %11 = vector.shape_cast %10 : vector<1x1x2x25xf32> to vector<2x25xf32>
    %c0_18 = arith.constant 0 : index
    %c6 = arith.constant 6 : index
    %c0_19 = arith.constant 0 : index
    %c0_20 = arith.constant 0 : index
    %12 = vector.load %arg1[%c0_18, %c6, %c0_19, %c0_20] : memref<1x8x2x25xf32, #tpu.memory_space<vmem>>, vector<1x1x2x25xf32>
    %13 = vector.shape_cast %12 : vector<1x1x2x25xf32> to vector<2x25xf32>
    %c0_21 = arith.constant 0 : index
    %c7 = arith.constant 7 : index
    %c0_22 = arith.constant 0 : index
    %c0_23 = arith.constant 0 : index
    %14 = vector.load %arg1[%c0_21, %c7, %c0_22, %c0_23] : memref<1x8x2x25xf32, #tpu.memory_space<vmem>>, vector<1x1x2x25xf32>
    %15 = vector.shape_cast %14 : vector<1x1x2x25xf32> to vector<2x25xf32>
    %c0_24 = arith.constant 0 : index
    %c0_25 = arith.constant 0 : index
    %c0_26 = arith.constant 0 : index
    %16 = vector.load %arg2[%c0_24, %c0_25, %c0_26] : memref<3x16x2xbf16, #tpu.memory_space<vmem>>, vector<1x16x2xbf16>
    %17 = vector.shape_cast %16 : vector<1x16x2xbf16> to vector<16x2xbf16>
    %c1_27 = arith.constant 1 : index
    %c0_28 = arith.constant 0 : index
    %c0_29 = arith.constant 0 : index
    %18 = vector.load %arg2[%c1_27, %c0_28, %c0_29] : memref<3x16x2xbf16, #tpu.memory_space<vmem>>, vector<1x16x2xbf16>
    %19 = vector.shape_cast %18 : vector<1x16x2xbf16> to vector<16x2xbf16>
    %c2_30 = arith.constant 2 : index
    %c0_31 = arith.constant 0 : index
    %c0_32 = arith.constant 0 : index
    %20 = vector.load %arg2[%c2_30, %c0_31, %c0_32] : memref<3x16x2xbf16, #tpu.memory_space<vmem>>, vector<1x16x2xbf16>
    %21 = vector.shape_cast %20 : vector<1x16x2xbf16> to vector<16x2xbf16>
    %c0_33 = arith.constant 0 : index
    %c0_34 = arith.constant 0 : index
    %c0_35 = arith.constant 0 : index
    %22 = vector.load %arg4[%c0_33, %c0_34, %c0_35] : memref<3x32x16xbf16, #tpu.memory_space<vmem>>, vector<1x32x16xbf16>
    %23 = vector.shape_cast %22 : vector<1x32x16xbf16> to vector<32x16xbf16>
    %c1_36 = arith.constant 1 : index
    %c0_37 = arith.constant 0 : index
    %c0_38 = arith.constant 0 : index
    %24 = vector.load %arg4[%c1_36, %c0_37, %c0_38] : memref<3x32x16xbf16, #tpu.memory_space<vmem>>, vector<1x32x16xbf16>
    %25 = vector.shape_cast %24 : vector<1x32x16xbf16> to vector<32x16xbf16>
    %c2_39 = arith.constant 2 : index
    %c0_40 = arith.constant 0 : index
    %c0_41 = arith.constant 0 : index
    %26 = vector.load %arg4[%c2_39, %c0_40, %c0_41] : memref<3x32x16xbf16, #tpu.memory_space<vmem>>, vector<1x32x16xbf16>
    %27 = vector.shape_cast %26 : vector<1x32x16xbf16> to vector<32x16xbf16>
    %c0_42 = arith.constant 0 : index
    %c0_43 = arith.constant 0 : index
    %c0_44 = arith.constant 0 : index
    %28 = vector.load %arg6[%c0_42, %c0_43, %c0_44] : memref<3x64x32xbf16, #tpu.memory_space<vmem>>, vector<1x64x32xbf16>
    %29 = vector.shape_cast %28 : vector<1x64x32xbf16> to vector<64x32xbf16>
    %c1_45 = arith.constant 1 : index
    %c0_46 = arith.constant 0 : index
    %c0_47 = arith.constant 0 : index
    %30 = vector.load %arg6[%c1_45, %c0_46, %c0_47] : memref<3x64x32xbf16, #tpu.memory_space<vmem>>, vector<1x64x32xbf16>
    %31 = vector.shape_cast %30 : vector<1x64x32xbf16> to vector<64x32xbf16>
    %c2_48 = arith.constant 2 : index
    %c0_49 = arith.constant 0 : index
    %c0_50 = arith.constant 0 : index
    %32 = vector.load %arg6[%c2_48, %c0_49, %c0_50] : memref<3x64x32xbf16, #tpu.memory_space<vmem>>, vector<1x64x32xbf16>
    %33 = vector.shape_cast %32 : vector<1x64x32xbf16> to vector<64x32xbf16>
    %c0_51 = arith.constant 0 : index
    %c0_52 = arith.constant 0 : index
    %34 = vector.load %arg3[%c0_51, %c0_52] : memref<16x1xf32, #tpu.memory_space<vmem>>, vector<16x1xf32>
    %c0_53 = arith.constant 0 : index
    %c0_54 = arith.constant 0 : index
    %35 = vector.load %arg5[%c0_53, %c0_54] : memref<32x1xf32, #tpu.memory_space<vmem>>, vector<32x1xf32>
    %c0_55 = arith.constant 0 : index
    %c0_56 = arith.constant 0 : index
    %36 = vector.load %arg7[%c0_55, %c0_56] : memref<64x1xf32, #tpu.memory_space<vmem>>, vector<64x1xf32>
    %37 = tpu.iota {dimensions = array<i32: 0>} : vector<25x25xi32>
    %38 = tpu.iota {dimensions = array<i32: 1>} : vector<25x25xi32>
    %c1_i32 = arith.constant 1 : i32
    %39 = vector.broadcast %c1_i32 : i32 to vector<25x25xi32>
    %40 = arith.addi %37, %39 : vector<25x25xi32>
    %41 = arith.cmpi eq, %38, %40 : vector<25x25xi32>
    %cst = arith.constant 1.000000e+00 : f32
    %cst_57 = arith.constant 0.000000e+00 : f32
    %42 = vector.broadcast %cst : f32 to vector<25x25xf32>
    %43 = vector.broadcast %cst_57 : f32 to vector<25x25xf32>
    %44 = arith.select %41, %42, %43 : vector<25x25xi1>, vector<25x25xf32>
    %45 = arith.truncf %15 : vector<2x25xf32> to vector<2x25xbf16>
    %46 = arith.truncf %44 : vector<25x25xf32> to vector<25x25xbf16>
    %cst_58 = arith.constant dense<0.000000e+00> : vector<2x25xf32>
    %47 = tpu.matmul %45, %46, %cst_58 {dimension_numbers = #tpu.dot_dimension_numbers<[1], [0], [0], [1], [0, 0, 1, 1], [], []>} : vector<2x25xbf16>, vector<25x25xbf16>, vector<2x25xf32> -> vector<2x25xf32>
    %48 = arith.truncf %47 : vector<2x25xf32> to vector<2x25xbf16>
    %cst_59 = arith.constant dense<0.000000e+00> : vector<16x25xf32>
    %49 = tpu.matmul %17, %48, %cst_59 {dimension_numbers = #tpu.dot_dimension_numbers<[1], [0], [0], [1], [0, 0, 1, 1], [], []>} : vector<16x2xbf16>, vector<2x25xbf16>, vector<16x25xf32> -> vector<16x25xf32>
    %50 = arith.truncf %1 : vector<2x25xf32> to vector<2x25xbf16>
    %cst_60 = arith.constant dense<0.000000e+00> : vector<16x25xf32>
    %51 = tpu.matmul %19, %50, %cst_60 {dimension_numbers = #tpu.dot_dimension_numbers<[1], [0], [0], [1], [0, 0, 1, 1], [], []>} : vector<16x2xbf16>, vector<2x25xbf16>, vector<16x25xf32> -> vector<16x25xf32>
    %52 = arith.addf %49, %51 : vector<16x25xf32>
    %53 = arith.truncf %3 : vector<2x25xf32> to vector<2x25xbf16>
    %cst_61 = arith.constant dense<0.000000e+00> : vector<16x25xf32>
    %54 = tpu.matmul %21, %53, %cst_61 {dimension_numbers = #tpu.dot_dimension_numbers<[1], [0], [0], [1], [0, 0, 1, 1], [], []>} : vector<16x2xbf16>, vector<2x25xbf16>, vector<16x25xf32> -> vector<16x25xf32>
    %55 = arith.addf %52, %54 : vector<16x25xf32>
    %56 = vector.broadcast %34 : vector<16x1xf32> to vector<16x25xf32>
    %57 = arith.addf %55, %56 : vector<16x25xf32>
    %cst_62 = arith.constant 0.000000e+00 : f32
    %58 = vector.broadcast %cst_62 : f32 to vector<16x25xf32>
    %59 = arith.maximumf %57, %58 : vector<16x25xf32>
    %60 = arith.truncf %3 : vector<2x25xf32> to vector<2x25xbf16>
    %cst_63 = arith.constant dense<0.000000e+00> : vector<16x25xf32>
    %61 = tpu.matmul %17, %60, %cst_63 {dimension_numbers = #tpu.dot_dimension_numbers<[1], [0], [0], [1], [0, 0, 1, 1], [], []>} : vector<16x2xbf16>, vector<2x25xbf16>, vector<16x25xf32> -> vector<16x25xf32>
    %62 = arith.truncf %5 : vector<2x25xf32> to vector<2x25xbf16>
    %cst_64 = arith.constant dense<0.000000e+00> : vector<16x25xf32>
    %63 = tpu.matmul %19, %62, %cst_64 {dimension_numbers = #tpu.dot_dimension_numbers<[1], [0], [0], [1], [0, 0, 1, 1], [], []>} : vector<16x2xbf16>, vector<2x25xbf16>, vector<16x25xf32> -> vector<16x25xf32>
    %64 = arith.addf %61, %63 : vector<16x25xf32>
    %65 = arith.truncf %7 : vector<2x25xf32> to vector<2x25xbf16>
    %cst_65 = arith.constant dense<0.000000e+00> : vector<16x25xf32>
    %66 = tpu.matmul %21, %65, %cst_65 {dimension_numbers = #tpu.dot_dimension_numbers<[1], [0], [0], [1], [0, 0, 1, 1], [], []>} : vector<16x2xbf16>, vector<2x25xbf16>, vector<16x25xf32> -> vector<16x25xf32>
    %67 = arith.addf %64, %66 : vector<16x25xf32>
    %68 = vector.broadcast %34 : vector<16x1xf32> to vector<16x25xf32>
    %69 = arith.addf %67, %68 : vector<16x25xf32>
    %cst_66 = arith.constant 0.000000e+00 : f32
    %70 = vector.broadcast %cst_66 : f32 to vector<16x25xf32>
    %71 = arith.maximumf %69, %70 : vector<16x25xf32>
    %72 = arith.truncf %7 : vector<2x25xf32> to vector<2x25xbf16>
    %cst_67 = arith.constant dense<0.000000e+00> : vector<16x25xf32>
    %73 = tpu.matmul %17, %72, %cst_67 {dimension_numbers = #tpu.dot_dimension_numbers<[1], [0], [0], [1], [0, 0, 1, 1], [], []>} : vector<16x2xbf16>, vector<2x25xbf16>, vector<16x25xf32> -> vector<16x25xf32>
    %74 = arith.truncf %9 : vector<2x25xf32> to vector<2x25xbf16>
    %cst_68 = arith.constant dense<0.000000e+00> : vector<16x25xf32>
    %75 = tpu.matmul %19, %74, %cst_68 {dimension_numbers = #tpu.dot_dimension_numbers<[1], [0], [0], [1], [0, 0, 1, 1], [], []>} : vector<16x2xbf16>, vector<2x25xbf16>, vector<16x25xf32> -> vector<16x25xf32>
    %76 = arith.addf %73, %75 : vector<16x25xf32>
    %77 = arith.truncf %11 : vector<2x25xf32> to vector<2x25xbf16>
    %cst_69 = arith.constant dense<0.000000e+00> : vector<16x25xf32>
    %78 = tpu.matmul %21, %77, %cst_69 {dimension_numbers = #tpu.dot_dimension_numbers<[1], [0], [0], [1], [0, 0, 1, 1], [], []>} : vector<16x2xbf16>, vector<2x25xbf16>, vector<16x25xf32> -> vector<16x25xf32>
    %79 = arith.addf %76, %78 : vector<16x25xf32>
    %80 = vector.broadcast %34 : vector<16x1xf32> to vector<16x25xf32>
    %81 = arith.addf %79, %80 : vector<16x25xf32>
    %cst_70 = arith.constant 0.000000e+00 : f32
    %82 = vector.broadcast %cst_70 : f32 to vector<16x25xf32>
    %83 = arith.maximumf %81, %82 : vector<16x25xf32>
    %84 = arith.truncf %11 : vector<2x25xf32> to vector<2x25xbf16>
    %cst_71 = arith.constant dense<0.000000e+00> : vector<16x25xf32>
    %85 = tpu.matmul %17, %84, %cst_71 {dimension_numbers = #tpu.dot_dimension_numbers<[1], [0], [0], [1], [0, 0, 1, 1], [], []>} : vector<16x2xbf16>, vector<2x25xbf16>, vector<16x25xf32> -> vector<16x25xf32>
    %86 = arith.truncf %13 : vector<2x25xf32> to vector<2x25xbf16>
    %cst_72 = arith.constant dense<0.000000e+00> : vector<16x25xf32>
    %87 = tpu.matmul %19, %86, %cst_72 {dimension_numbers = #tpu.dot_dimension_numbers<[1], [0], [0], [1], [0, 0, 1, 1], [], []>} : vector<16x2xbf16>, vector<2x25xbf16>, vector<16x25xf32> -> vector<16x25xf32>
    %88 = arith.addf %85, %87 : vector<16x25xf32>
    %89 = arith.truncf %15 : vector<2x25xf32> to vector<2x25xbf16>
    %cst_73 = arith.constant dense<0.000000e+00> : vector<16x25xf32>
    %90 = tpu.matmul %21, %89, %cst_73 {dimension_numbers = #tpu.dot_dimension_numbers<[1], [0], [0], [1], [0, 0, 1, 1], [], []>} : vector<16x2xbf16>, vector<2x25xbf16>, vector<16x25xf32> -> vector<16x25xf32>
    %91 = arith.addf %88, %90 : vector<16x25xf32>
    %92 = vector.broadcast %34 : vector<16x1xf32> to vector<16x25xf32>
    %93 = arith.addf %91, %92 : vector<16x25xf32>
    %cst_74 = arith.constant 0.000000e+00 : f32
    %94 = vector.broadcast %cst_74 : f32 to vector<16x25xf32>
    %95 = arith.maximumf %93, %94 : vector<16x25xf32>
    %96 = tpu.iota {dimensions = array<i32: 0>} : vector<25x25xi32>
    %97 = tpu.iota {dimensions = array<i32: 1>} : vector<25x25xi32>
    %c1_i32_75 = arith.constant 1 : i32
    %98 = vector.broadcast %c1_i32_75 : i32 to vector<25x25xi32>
    %99 = arith.addi %96, %98 : vector<25x25xi32>
    %100 = arith.cmpi eq, %97, %99 : vector<25x25xi32>
    %cst_76 = arith.constant 1.000000e+00 : f32
    %cst_77 = arith.constant 0.000000e+00 : f32
    %101 = vector.broadcast %cst_76 : f32 to vector<25x25xf32>
    %102 = vector.broadcast %cst_77 : f32 to vector<25x25xf32>
    %103 = arith.select %100, %101, %102 : vector<25x25xi1>, vector<25x25xf32>
    %104 = arith.truncf %95 : vector<16x25xf32> to vector<16x25xbf16>
    %105 = arith.truncf %103 : vector<25x25xf32> to vector<25x25xbf16>
    %cst_78 = arith.constant dense<0.000000e+00> : vector<16x25xf32>
    %106 = tpu.matmul %104, %105, %cst_78 {dimension_numbers = #tpu.dot_dimension_numbers<[1], [0], [0], [1], [0, 0, 1, 1], [], []>} : vector<16x25xbf16>, vector<25x25xbf16>, vector<16x25xf32> -> vector<16x25xf32>
    %107 = arith.truncf %106 : vector<16x25xf32> to vector<16x25xbf16>
    %cst_79 = arith.constant dense<0.000000e+00> : vector<32x25xf32>
    %108 = tpu.matmul %23, %107, %cst_79 {dimension_numbers = #tpu.dot_dimension_numbers<[1], [0], [0], [1], [0, 0, 1, 1], [], []>} : vector<32x16xbf16>, vector<16x25xbf16>, vector<32x25xf32> -> vector<32x25xf32>
    %109 = arith.truncf %59 : vector<16x25xf32> to vector<16x25xbf16>
    %cst_80 = arith.constant dense<0.000000e+00> : vector<32x25xf32>
    %110 = tpu.matmul %25, %109, %cst_80 {dimension_numbers = #tpu.dot_dimension_numbers<[1], [0], [0], [1], [0, 0, 1, 1], [], []>} : vector<32x16xbf16>, vector<16x25xbf16>, vector<32x25xf32> -> vector<32x25xf32>
    %111 = arith.addf %108, %110 : vector<32x25xf32>
    %112 = arith.truncf %71 : vector<16x25xf32> to vector<16x25xbf16>
    %cst_81 = arith.constant dense<0.000000e+00> : vector<32x25xf32>
    %113 = tpu.matmul %27, %112, %cst_81 {dimension_numbers = #tpu.dot_dimension_numbers<[1], [0], [0], [1], [0, 0, 1, 1], [], []>} : vector<32x16xbf16>, vector<16x25xbf16>, vector<32x25xf32> -> vector<32x25xf32>
    %114 = arith.addf %111, %113 : vector<32x25xf32>
    %115 = vector.broadcast %35 : vector<32x1xf32> to vector<32x25xf32>
    %116 = arith.addf %114, %115 : vector<32x25xf32>
    %cst_82 = arith.constant 0.000000e+00 : f32
    %117 = vector.broadcast %cst_82 : f32 to vector<32x25xf32>
    %118 = arith.maximumf %116, %117 : vector<32x25xf32>
    %119 = arith.truncf %71 : vector<16x25xf32> to vector<16x25xbf16>
    %cst_83 = arith.constant dense<0.000000e+00> : vector<32x25xf32>
    %120 = tpu.matmul %23, %119, %cst_83 {dimension_numbers = #tpu.dot_dimension_numbers<[1], [0], [0], [1], [0, 0, 1, 1], [], []>} : vector<32x16xbf16>, vector<16x25xbf16>, vector<32x25xf32> -> vector<32x25xf32>
    %121 = arith.truncf %83 : vector<16x25xf32> to vector<16x25xbf16>
    %cst_84 = arith.constant dense<0.000000e+00> : vector<32x25xf32>
    %122 = tpu.matmul %25, %121, %cst_84 {dimension_numbers = #tpu.dot_dimension_numbers<[1], [0], [0], [1], [0, 0, 1, 1], [], []>} : vector<32x16xbf16>, vector<16x25xbf16>, vector<32x25xf32> -> vector<32x25xf32>
    %123 = arith.addf %120, %122 : vector<32x25xf32>
    %124 = arith.truncf %95 : vector<16x25xf32> to vector<16x25xbf16>
    %cst_85 = arith.constant dense<0.000000e+00> : vector<32x25xf32>
    %125 = tpu.matmul %27, %124, %cst_85 {dimension_numbers = #tpu.dot_dimension_numbers<[1], [0], [0], [1], [0, 0, 1, 1], [], []>} : vector<32x16xbf16>, vector<16x25xbf16>, vector<32x25xf32> -> vector<32x25xf32>
    %126 = arith.addf %123, %125 : vector<32x25xf32>
    %127 = vector.broadcast %35 : vector<32x1xf32> to vector<32x25xf32>
    %128 = arith.addf %126, %127 : vector<32x25xf32>
    %cst_86 = arith.constant 0.000000e+00 : f32
    %129 = vector.broadcast %cst_86 : f32 to vector<32x25xf32>
    %130 = arith.maximumf %128, %129 : vector<32x25xf32>
    %131 = tpu.iota {dimensions = array<i32: 0>} : vector<25x25xi32>
    %132 = tpu.iota {dimensions = array<i32: 1>} : vector<25x25xi32>
    %c1_i32_87 = arith.constant 1 : i32
    %133 = vector.broadcast %c1_i32_87 : i32 to vector<25x25xi32>
    %134 = arith.addi %131, %133 : vector<25x25xi32>
    %135 = arith.cmpi eq, %132, %134 : vector<25x25xi32>
    %cst_88 = arith.constant 1.000000e+00 : f32
    %cst_89 = arith.constant 0.000000e+00 : f32
    %136 = vector.broadcast %cst_88 : f32 to vector<25x25xf32>
    %137 = vector.broadcast %cst_89 : f32 to vector<25x25xf32>
    %138 = arith.select %135, %136, %137 : vector<25x25xi1>, vector<25x25xf32>
    %139 = arith.truncf %130 : vector<32x25xf32> to vector<32x25xbf16>
    %140 = arith.truncf %138 : vector<25x25xf32> to vector<25x25xbf16>
    %cst_90 = arith.constant dense<0.000000e+00> : vector<32x25xf32>
    %141 = tpu.matmul %139, %140, %cst_90 {dimension_numbers = #tpu.dot_dimension_numbers<[1], [0], [0], [1], [0, 0, 1, 1], [], []>} : vector<32x25xbf16>, vector<25x25xbf16>, vector<32x25xf32> -> vector<32x25xf32>
    %142 = arith.truncf %141 : vector<32x25xf32> to vector<32x25xbf16>
    %cst_91 = arith.constant dense<0.000000e+00> : vector<64x25xf32>
    %143 = tpu.matmul %29, %142, %cst_91 {dimension_numbers = #tpu.dot_dimension_numbers<[1], [0], [0], [1], [0, 0, 1, 1], [], []>} : vector<64x32xbf16>, vector<32x25xbf16>, vector<64x25xf32> -> vector<64x25xf32>
    %144 = arith.truncf %118 : vector<32x25xf32> to vector<32x25xbf16>
    %cst_92 = arith.constant dense<0.000000e+00> : vector<64x25xf32>
    %145 = tpu.matmul %31, %144, %cst_92 {dimension_numbers = #tpu.dot_dimension_numbers<[1], [0], [0], [1], [0, 0, 1, 1], [], []>} : vector<64x32xbf16>, vector<32x25xbf16>, vector<64x25xf32> -> vector<64x25xf32>
    %146 = arith.addf %143, %145 : vector<64x25xf32>
    %147 = arith.truncf %130 : vector<32x25xf32> to vector<32x25xbf16>
    %cst_93 = arith.constant dense<0.000000e+00> : vector<64x25xf32>
    %148 = tpu.matmul %33, %147, %cst_93 {dimension_numbers = #tpu.dot_dimension_numbers<[1], [0], [0], [1], [0, 0, 1, 1], [], []>} : vector<64x32xbf16>, vector<32x25xbf16>, vector<64x25xf32> -> vector<64x25xf32>
    %149 = arith.addf %146, %148 : vector<64x25xf32>
    %150 = vector.broadcast %36 : vector<64x1xf32> to vector<64x25xf32>
    %151 = arith.addf %149, %150 : vector<64x25xf32>
    %cst_94 = arith.constant 0.000000e+00 : f32
    %152 = vector.broadcast %cst_94 : f32 to vector<64x25xf32>
    %153 = arith.maximumf %151, %152 : vector<64x25xf32>
    %c0_95 = arith.constant 0 : index
    %c0_96 = arith.constant 0 : index
    %c0_97 = arith.constant 0 : index
    %154 = vector.load %arg8[%c0_95, %c0_96, %c0_97] : memref<1x64x25xf32, #tpu.memory_space<vmem>>, vector<1x64x25xf32>
    %155 = vector.shape_cast %154 : vector<1x64x25xf32> to vector<64x25xf32>
    %156 = vector.shape_cast %153 : vector<64x25xf32> to vector<1x64x25xf32>
    tpu.vector_store %arg8[%c0_95, %c0_96, %c0_97], %156 {strides = array<i32>} : memref<1x64x25xf32, #tpu.memory_space<vmem>>, vector<1x64x25xf32>,
    return
  }
  func.func @transform_0(%arg0: i32) -> (i32, i32, i32, i32) {
    %c0_i32 = arith.constant 0 : i32
    %c0_i32_0 = arith.constant 0 : i32
    %c0_i32_1 = arith.constant 0 : i32
    %c0_i32_2 = arith.constant 0 : i32
    return %arg0, %c0_i32, %c0_i32_0, %c0_i32_1 : i32, i32, i32, i32
  }
  func.func @transform_1(%arg0: i32) -> (i32, i32, i32) {
    %c0_i32 = arith.constant 0 : i32
    %c0_i32_0 = arith.constant 0 : i32
    %c0_i32_1 = arith.constant 0 : i32
    %c0_i32_2 = arith.constant 0 : i32
    return %c0_i32, %c0_i32_0, %c0_i32_1 : i32, i32, i32
  }
  func.func @transform_2(%arg0: i32) -> (i32, i32) {
    %c0_i32 = arith.constant 0 : i32
    %c0_i32_0 = arith.constant 0 : i32
    %c0_i32_1 = arith.constant 0 : i32
    return %c0_i32, %c0_i32_0 : i32, i32
  }
  func.func @transform_3(%arg0: i32) -> (i32, i32, i32) {
    %c0_i32 = arith.constant 0 : i32
    %c0_i32_0 = arith.constant 0 : i32
    %c0_i32_1 = arith.constant 0 : i32
    %c0_i32_2 = arith.constant 0 : i32
    return %c0_i32, %c0_i32_0, %c0_i32_1 : i32, i32, i32
  }
  func.func @transform_4(%arg0: i32) -> (i32, i32) {
    %c0_i32 = arith.constant 0 : i32
    %c0_i32_0 = arith.constant 0 : i32
    %c0_i32_1 = arith.constant 0 : i32
    return %c0_i32, %c0_i32_0 : i32, i32
  }
  func.func @transform_5(%arg0: i32) -> (i32, i32, i32) {
    %c0_i32 = arith.constant 0 : i32
    %c0_i32_0 = arith.constant 0 : i32
    %c0_i32_1 = arith.constant 0 : i32
    %c0_i32_2 = arith.constant 0 : i32
    return %c0_i32, %c0_i32_0, %c0_i32_1 : i32, i32, i32
  }
  func.func @transform_6(%arg0: i32) -> (i32, i32) {
    %c0_i32 = arith.constant 0 : i32
    %c0_i32_0 = arith.constant 0 : i32
    %c0_i32_1 = arith.constant 0 : i32
    return %c0_i32, %c0_i32_0 : i32, i32
  }
  func.func @transform_7(%arg0: i32) -> (i32, i32, i32) {
    %c0_i32 = arith.constant 0 : i32
    %c0_i32_0 = arith.constant 0 : i32
    %c0_i32_1 = arith.constant 0 : i32
    return %arg0, %c0_i32, %c0_i32_0 : i32, i32, i32
  }
}

module attributes {stable_mosaic.version = 11 : i64} {
  func.func @_bottleneck_kernel(%arg0: memref<2x1600xf32, #tpu.memory_space<vmem>>, %arg1: memref<2x20xf32, #tpu.memory_space<vmem>>, %arg2: memref<1600x40xbf16, #tpu.memory_space<vmem>>, %arg3: memref<1x40xf32, #tpu.memory_space<vmem>>, %arg4: memref<20x1600xbf16, #tpu.memory_space<vmem>>, %arg5: memref<1x1600xf32, #tpu.memory_space<vmem>>, %arg6: memref<2x20xf32, #tpu.memory_space<vmem>>, %arg7: memref<2x20xf32, #tpu.memory_space<vmem>>, %arg8: memref<2x1600xf32, #tpu.memory_space<vmem>>) attributes {dimension_semantics = [], scalar_prefetch = 0 : i64, scratch_operands = 0 : i64, tpu.core_type = #tpu.core_type<tc>} {
    %c0 = arith.constant 0 : index
    %c0_0 = arith.constant 0 : index
    %0 = vector.load %arg0[%c0, %c0_0] : memref<2x1600xf32, #tpu.memory_space<vmem>>, vector<2x1600xf32>
    %c0_1 = arith.constant 0 : index
    %c0_2 = arith.constant 0 : index
    %1 = vector.load %arg2[%c0_1, %c0_2] : memref<1600x40xbf16, #tpu.memory_space<vmem>>, vector<1600x40xbf16>
    %2 = arith.truncf %0 : vector<2x1600xf32> to vector<2x1600xbf16>
    %cst = arith.constant dense<0.000000e+00> : vector<2x40xf32>
    %3 = tpu.matmul %2, %1, %cst {dimension_numbers = #tpu.dot_dimension_numbers<[1], [0], [0], [1], [0, 0, 1, 1], [], []>} : vector<2x1600xbf16>, vector<1600x40xbf16>, vector<2x40xf32> -> vector<2x40xf32>
    %c0_3 = arith.constant 0 : index
    %c0_4 = arith.constant 0 : index
    %4 = vector.load %arg3[%c0_3, %c0_4] : memref<1x40xf32, #tpu.memory_space<vmem>>, vector<1x40xf32>
    %5 = vector.broadcast %4 : vector<1x40xf32> to vector<2x40xf32>
    %6 = arith.addf %3, %5 : vector<2x40xf32>
    %7 = vector.extract_strided_slice %6 {offsets = [0, 0], sizes = [2, 20], strides = [1, 1]} : vector<2x40xf32> to vector<2x20xf32>
    %8 = vector.extract_strided_slice %6 {offsets = [0, 20], sizes = [2, 20], strides = [1, 1]} : vector<2x40xf32> to vector<2x20xf32>
    %c0_5 = arith.constant 0 : index
    %c0_6 = arith.constant 0 : index
    %9 = vector.load %arg1[%c0_5, %c0_6] : memref<2x20xf32, #tpu.memory_space<vmem>>, vector<2x20xf32>
    %10 = arith.mulf %8, %9 : vector<2x20xf32>
    %11 = arith.addf %7, %10 : vector<2x20xf32>
    %c0_7 = arith.constant 0 : index
    %c0_8 = arith.constant 0 : index
    %12 = vector.load %arg4[%c0_7, %c0_8] : memref<20x1600xbf16, #tpu.memory_space<vmem>>, vector<20x1600xbf16>
    %13 = arith.truncf %11 : vector<2x20xf32> to vector<2x20xbf16>
    %cst_9 = arith.constant dense<0.000000e+00> : vector<2x1600xf32>
    %14 = tpu.matmul %13, %12, %cst_9 {dimension_numbers = #tpu.dot_dimension_numbers<[1], [0], [0], [1], [0, 0, 1, 1], [], []>} : vector<2x20xbf16>, vector<20x1600xbf16>, vector<2x1600xf32> -> vector<2x1600xf32>
    %c0_10 = arith.constant 0 : index
    %c0_11 = arith.constant 0 : index
    %15 = vector.load %arg5[%c0_10, %c0_11] : memref<1x1600xf32, #tpu.memory_space<vmem>>, vector<1x1600xf32>
    %16 = vector.broadcast %15 : vector<1x1600xf32> to vector<2x1600xf32>
    %17 = arith.addf %14, %16 : vector<2x1600xf32>
    %c0_12 = arith.constant 0 : index
    %c0_13 = arith.constant 0 : index
    %18 = vector.load %arg6[%c0_12, %c0_13] : memref<2x20xf32, #tpu.memory_space<vmem>>, vector<2x20xf32>
    tpu.vector_store %arg6[%c0_12, %c0_13], %7 {strides = array<i32>} : memref<2x20xf32, #tpu.memory_space<vmem>>, vector<2x20xf32>,
    %c0_14 = arith.constant 0 : index
    %c0_15 = arith.constant 0 : index
    %19 = vector.load %arg7[%c0_14, %c0_15] : memref<2x20xf32, #tpu.memory_space<vmem>>, vector<2x20xf32>
    tpu.vector_store %arg7[%c0_14, %c0_15], %8 {strides = array<i32>} : memref<2x20xf32, #tpu.memory_space<vmem>>, vector<2x20xf32>,
    %c0_16 = arith.constant 0 : index
    %c0_17 = arith.constant 0 : index
    %20 = vector.load %arg8[%c0_16, %c0_17] : memref<2x1600xf32, #tpu.memory_space<vmem>>, vector<2x1600xf32>
    tpu.vector_store %arg8[%c0_16, %c0_17], %17 {strides = array<i32>} : memref<2x1600xf32, #tpu.memory_space<vmem>>, vector<2x1600xf32>,
    return
  }
}

module attributes {stable_mosaic.version = 11 : i64} {
  func.func @_decoder_kernel(%arg0: i32, %arg1: memref<1x64x25xf32, #tpu.memory_space<vmem>>, %arg2: memref<3x32x64xbf16, #tpu.memory_space<vmem>>, %arg3: memref<32x1xf32, #tpu.memory_space<vmem>>, %arg4: memref<3x16x32xbf16, #tpu.memory_space<vmem>>, %arg5: memref<16x1xf32, #tpu.memory_space<vmem>>, %arg6: memref<3x2x16xbf16, #tpu.memory_space<vmem>>, %arg7: memref<2x1xf32, #tpu.memory_space<vmem>>, %arg8: memref<1x8x2x25xf32, #tpu.memory_space<vmem>>) attributes {dimension_semantics = [#tpu.dimension_semantics<parallel>], iteration_bounds = array<i64: 2>, scalar_prefetch = 0 : i64, scratch_operands = 0 : i64, tpu.core_type = #tpu.core_type<tc>, window_params = [{transform_indices = @transform_0, window_bounds = array<i64: 1, 64, 25>}, {pipeline_mode = #tpu.pipeline_mode<synchronous>, transform_indices = @transform_1, window_bounds = array<i64: 3, 32, 64>}, {pipeline_mode = #tpu.pipeline_mode<synchronous>, transform_indices = @transform_2, window_bounds = array<i64: 32, 1>}, {pipeline_mode = #tpu.pipeline_mode<synchronous>, transform_indices = @transform_3, window_bounds = array<i64: 3, 16, 32>}, {pipeline_mode = #tpu.pipeline_mode<synchronous>, transform_indices = @transform_4, window_bounds = array<i64: 16, 1>}, {pipeline_mode = #tpu.pipeline_mode<synchronous>, transform_indices = @transform_5, window_bounds = array<i64: 3, 2, 16>}, {pipeline_mode = #tpu.pipeline_mode<synchronous>, transform_indices = @transform_6, window_bounds = array<i64: 2, 1>}, {transform_indices = @transform_7, window_bounds = array<i64: 1, 8, 2, 25>}]} {
    %c0 = arith.constant 0 : index
    %c0_0 = arith.constant 0 : index
    %c0_1 = arith.constant 0 : index
    %0 = vector.load %arg1[%c0, %c0_0, %c0_1] : memref<1x64x25xf32, #tpu.memory_space<vmem>>, vector<1x64x25xf32>
    %1 = vector.shape_cast %0 : vector<1x64x25xf32> to vector<64x25xf32>
    %c0_2 = arith.constant 0 : index
    %c0_3 = arith.constant 0 : index
    %c0_4 = arith.constant 0 : index
    %2 = vector.load %arg2[%c0_2, %c0_3, %c0_4] : memref<3x32x64xbf16, #tpu.memory_space<vmem>>, vector<1x32x64xbf16>
    %3 = vector.shape_cast %2 : vector<1x32x64xbf16> to vector<32x64xbf16>
    %c1 = arith.constant 1 : index
    %c0_5 = arith.constant 0 : index
    %c0_6 = arith.constant 0 : index
    %4 = vector.load %arg2[%c1, %c0_5, %c0_6] : memref<3x32x64xbf16, #tpu.memory_space<vmem>>, vector<1x32x64xbf16>
    %5 = vector.shape_cast %4 : vector<1x32x64xbf16> to vector<32x64xbf16>
    %c2 = arith.constant 2 : index
    %c0_7 = arith.constant 0 : index
    %c0_8 = arith.constant 0 : index
    %6 = vector.load %arg2[%c2, %c0_7, %c0_8] : memref<3x32x64xbf16, #tpu.memory_space<vmem>>, vector<1x32x64xbf16>
    %7 = vector.shape_cast %6 : vector<1x32x64xbf16> to vector<32x64xbf16>
    %c0_9 = arith.constant 0 : index
    %c0_10 = arith.constant 0 : index
    %c0_11 = arith.constant 0 : index
    %8 = vector.load %arg4[%c0_9, %c0_10, %c0_11] : memref<3x16x32xbf16, #tpu.memory_space<vmem>>, vector<1x16x32xbf16>
    %9 = vector.shape_cast %8 : vector<1x16x32xbf16> to vector<16x32xbf16>
    %c1_12 = arith.constant 1 : index
    %c0_13 = arith.constant 0 : index
    %c0_14 = arith.constant 0 : index
    %10 = vector.load %arg4[%c1_12, %c0_13, %c0_14] : memref<3x16x32xbf16, #tpu.memory_space<vmem>>, vector<1x16x32xbf16>
    %11 = vector.shape_cast %10 : vector<1x16x32xbf16> to vector<16x32xbf16>
    %c2_15 = arith.constant 2 : index
    %c0_16 = arith.constant 0 : index
    %c0_17 = arith.constant 0 : index
    %12 = vector.load %arg4[%c2_15, %c0_16, %c0_17] : memref<3x16x32xbf16, #tpu.memory_space<vmem>>, vector<1x16x32xbf16>
    %13 = vector.shape_cast %12 : vector<1x16x32xbf16> to vector<16x32xbf16>
    %c0_18 = arith.constant 0 : index
    %c0_19 = arith.constant 0 : index
    %c0_20 = arith.constant 0 : index
    %14 = vector.load %arg6[%c0_18, %c0_19, %c0_20] : memref<3x2x16xbf16, #tpu.memory_space<vmem>>, vector<1x2x16xbf16>
    %15 = vector.shape_cast %14 : vector<1x2x16xbf16> to vector<2x16xbf16>
    %c1_21 = arith.constant 1 : index
    %c0_22 = arith.constant 0 : index
    %c0_23 = arith.constant 0 : index
    %16 = vector.load %arg6[%c1_21, %c0_22, %c0_23] : memref<3x2x16xbf16, #tpu.memory_space<vmem>>, vector<1x2x16xbf16>
    %17 = vector.shape_cast %16 : vector<1x2x16xbf16> to vector<2x16xbf16>
    %c2_24 = arith.constant 2 : index
    %c0_25 = arith.constant 0 : index
    %c0_26 = arith.constant 0 : index
    %18 = vector.load %arg6[%c2_24, %c0_25, %c0_26] : memref<3x2x16xbf16, #tpu.memory_space<vmem>>, vector<1x2x16xbf16>
    %19 = vector.shape_cast %18 : vector<1x2x16xbf16> to vector<2x16xbf16>
    %c0_27 = arith.constant 0 : index
    %c0_28 = arith.constant 0 : index
    %20 = vector.load %arg3[%c0_27, %c0_28] : memref<32x1xf32, #tpu.memory_space<vmem>>, vector<32x1xf32>
    %c0_29 = arith.constant 0 : index
    %c0_30 = arith.constant 0 : index
    %21 = vector.load %arg5[%c0_29, %c0_30] : memref<16x1xf32, #tpu.memory_space<vmem>>, vector<16x1xf32>
    %c0_31 = arith.constant 0 : index
    %c0_32 = arith.constant 0 : index
    %22 = vector.load %arg7[%c0_31, %c0_32] : memref<2x1xf32, #tpu.memory_space<vmem>>, vector<2x1xf32>
    %23 = arith.truncf %1 : vector<64x25xf32> to vector<64x25xbf16>
    %cst = arith.constant dense<0.000000e+00> : vector<32x25xf32>
    %24 = tpu.matmul %5, %23, %cst {dimension_numbers = #tpu.dot_dimension_numbers<[1], [0], [0], [1], [0, 0, 1, 1], [], []>} : vector<32x64xbf16>, vector<64x25xbf16>, vector<32x25xf32> -> vector<32x25xf32>
    %25 = vector.broadcast %20 : vector<32x1xf32> to vector<32x25xf32>
    %26 = arith.addf %24, %25 : vector<32x25xf32>
    %cst_33 = arith.constant 0.000000e+00 : f32
    %27 = vector.broadcast %cst_33 : f32 to vector<32x25xf32>
    %28 = arith.maximumf %26, %27 : vector<32x25xf32>
    %29 = arith.truncf %1 : vector<64x25xf32> to vector<64x25xbf16>
    %cst_34 = arith.constant dense<0.000000e+00> : vector<32x25xf32>
    %30 = tpu.matmul %7, %29, %cst_34 {dimension_numbers = #tpu.dot_dimension_numbers<[1], [0], [0], [1], [0, 0, 1, 1], [], []>} : vector<32x64xbf16>, vector<64x25xbf16>, vector<32x25xf32> -> vector<32x25xf32>
    %31 = tpu.iota {dimensions = array<i32: 0>} : vector<25x25xi32>
    %32 = tpu.iota {dimensions = array<i32: 1>} : vector<25x25xi32>
    %c1_i32 = arith.constant 1 : i32
    %33 = vector.broadcast %c1_i32 : i32 to vector<25x25xi32>
    %34 = arith.addi %32, %33 : vector<25x25xi32>
    %35 = arith.cmpi eq, %34, %31 : vector<25x25xi32>
    %cst_35 = arith.constant 1.000000e+00 : f32
    %cst_36 = arith.constant 0.000000e+00 : f32
    %36 = vector.broadcast %cst_35 : f32 to vector<25x25xf32>
    %37 = vector.broadcast %cst_36 : f32 to vector<25x25xf32>
    %38 = arith.select %35, %36, %37 : vector<25x25xi1>, vector<25x25xf32>
    %39 = arith.truncf %1 : vector<64x25xf32> to vector<64x25xbf16>
    %40 = arith.truncf %38 : vector<25x25xf32> to vector<25x25xbf16>
    %cst_37 = arith.constant dense<0.000000e+00> : vector<64x25xf32>
    %41 = tpu.matmul %39, %40, %cst_37 {dimension_numbers = #tpu.dot_dimension_numbers<[1], [0], [0], [1], [0, 0, 1, 1], [], []>} : vector<64x25xbf16>, vector<25x25xbf16>, vector<64x25xf32> -> vector<64x25xf32>
    %42 = arith.truncf %41 : vector<64x25xf32> to vector<64x25xbf16>
    %cst_38 = arith.constant dense<0.000000e+00> : vector<32x25xf32>
    %43 = tpu.matmul %3, %42, %cst_38 {dimension_numbers = #tpu.dot_dimension_numbers<[1], [0], [0], [1], [0, 0, 1, 1], [], []>} : vector<32x64xbf16>, vector<64x25xbf16>, vector<32x25xf32> -> vector<32x25xf32>
    %44 = arith.addf %30, %43 : vector<32x25xf32>
    %45 = vector.broadcast %20 : vector<32x1xf32> to vector<32x25xf32>
    %46 = arith.addf %44, %45 : vector<32x25xf32>
    %cst_39 = arith.constant 0.000000e+00 : f32
    %47 = vector.broadcast %cst_39 : f32 to vector<32x25xf32>
    %48 = arith.maximumf %46, %47 : vector<32x25xf32>
    %49 = arith.truncf %28 : vector<32x25xf32> to vector<32x25xbf16>
    %cst_40 = arith.constant dense<0.000000e+00> : vector<16x25xf32>
    %50 = tpu.matmul %11, %49, %cst_40 {dimension_numbers = #tpu.dot_dimension_numbers<[1], [0], [0], [1], [0, 0, 1, 1], [], []>} : vector<16x32xbf16>, vector<32x25xbf16>, vector<16x25xf32> -> vector<16x25xf32>
    %51 = vector.broadcast %21 : vector<16x1xf32> to vector<16x25xf32>
    %52 = arith.addf %50, %51 : vector<16x25xf32>
    %cst_41 = arith.constant 0.000000e+00 : f32
    %53 = vector.broadcast %cst_41 : f32 to vector<16x25xf32>
    %54 = arith.maximumf %52, %53 : vector<16x25xf32>
    %55 = arith.truncf %28 : vector<32x25xf32> to vector<32x25xbf16>
    %cst_42 = arith.constant dense<0.000000e+00> : vector<16x25xf32>
    %56 = tpu.matmul %13, %55, %cst_42 {dimension_numbers = #tpu.dot_dimension_numbers<[1], [0], [0], [1], [0, 0, 1, 1], [], []>} : vector<16x32xbf16>, vector<32x25xbf16>, vector<16x25xf32> -> vector<16x25xf32>
    %57 = arith.truncf %48 : vector<32x25xf32> to vector<32x25xbf16>
    %cst_43 = arith.constant dense<0.000000e+00> : vector<16x25xf32>
    %58 = tpu.matmul %9, %57, %cst_43 {dimension_numbers = #tpu.dot_dimension_numbers<[1], [0], [0], [1], [0, 0, 1, 1], [], []>} : vector<16x32xbf16>, vector<32x25xbf16>, vector<16x25xf32> -> vector<16x25xf32>
    %59 = arith.addf %56, %58 : vector<16x25xf32>
    %60 = vector.broadcast %21 : vector<16x1xf32> to vector<16x25xf32>
    %61 = arith.addf %59, %60 : vector<16x25xf32>
    %cst_44 = arith.constant 0.000000e+00 : f32
    %62 = vector.broadcast %cst_44 : f32 to vector<16x25xf32>
    %63 = arith.maximumf %61, %62 : vector<16x25xf32>
    %64 = arith.truncf %48 : vector<32x25xf32> to vector<32x25xbf16>
    %cst_45 = arith.constant dense<0.000000e+00> : vector<16x25xf32>
    %65 = tpu.matmul %11, %64, %cst_45 {dimension_numbers = #tpu.dot_dimension_numbers<[1], [0], [0], [1], [0, 0, 1, 1], [], []>} : vector<16x32xbf16>, vector<32x25xbf16>, vector<16x25xf32> -> vector<16x25xf32>
    %66 = vector.broadcast %21 : vector<16x1xf32> to vector<16x25xf32>
    %67 = arith.addf %65, %66 : vector<16x25xf32>
    %cst_46 = arith.constant 0.000000e+00 : f32
    %68 = vector.broadcast %cst_46 : f32 to vector<16x25xf32>
    %69 = arith.maximumf %67, %68 : vector<16x25xf32>
    %70 = arith.truncf %48 : vector<32x25xf32> to vector<32x25xbf16>
    %cst_47 = arith.constant dense<0.000000e+00> : vector<16x25xf32>
    %71 = tpu.matmul %13, %70, %cst_47 {dimension_numbers = #tpu.dot_dimension_numbers<[1], [0], [0], [1], [0, 0, 1, 1], [], []>} : vector<16x32xbf16>, vector<32x25xbf16>, vector<16x25xf32> -> vector<16x25xf32>
    %72 = tpu.iota {dimensions = array<i32: 0>} : vector<25x25xi32>
    %73 = tpu.iota {dimensions = array<i32: 1>} : vector<25x25xi32>
    %c1_i32_48 = arith.constant 1 : i32
    %74 = vector.broadcast %c1_i32_48 : i32 to vector<25x25xi32>
    %75 = arith.addi %73, %74 : vector<25x25xi32>
    %76 = arith.cmpi eq, %75, %72 : vector<25x25xi32>
    %cst_49 = arith.constant 1.000000e+00 : f32
    %cst_50 = arith.constant 0.000000e+00 : f32
    %77 = vector.broadcast %cst_49 : f32 to vector<25x25xf32>
    %78 = vector.broadcast %cst_50 : f32 to vector<25x25xf32>
    %79 = arith.select %76, %77, %78 : vector<25x25xi1>, vector<25x25xf32>
    %80 = arith.truncf %28 : vector<32x25xf32> to vector<32x25xbf16>
    %81 = arith.truncf %79 : vector<25x25xf32> to vector<25x25xbf16>
    %cst_51 = arith.constant dense<0.000000e+00> : vector<32x25xf32>
    %82 = tpu.matmul %80, %81, %cst_51 {dimension_numbers = #tpu.dot_dimension_numbers<[1], [0], [0], [1], [0, 0, 1, 1], [], []>} : vector<32x25xbf16>, vector<25x25xbf16>, vector<32x25xf32> -> vector<32x25xf32>
    %83 = arith.truncf %82 : vector<32x25xf32> to vector<32x25xbf16>
    %cst_52 = arith.constant dense<0.000000e+00> : vector<16x25xf32>
    %84 = tpu.matmul %9, %83, %cst_52 {dimension_numbers = #tpu.dot_dimension_numbers<[1], [0], [0], [1], [0, 0, 1, 1], [], []>} : vector<16x32xbf16>, vector<32x25xbf16>, vector<16x25xf32> -> vector<16x25xf32>
    %85 = arith.addf %71, %84 : vector<16x25xf32>
    %86 = vector.broadcast %21 : vector<16x1xf32> to vector<16x25xf32>
    %87 = arith.addf %85, %86 : vector<16x25xf32>
    %cst_53 = arith.constant 0.000000e+00 : f32
    %88 = vector.broadcast %cst_53 : f32 to vector<16x25xf32>
    %89 = arith.maximumf %87, %88 : vector<16x25xf32>
    %90 = arith.truncf %54 : vector<16x25xf32> to vector<16x25xbf16>
    %cst_54 = arith.constant dense<0.000000e+00> : vector<2x25xf32>
    %91 = tpu.matmul %17, %90, %cst_54 {dimension_numbers = #tpu.dot_dimension_numbers<[1], [0], [0], [1], [0, 0, 1, 1], [], []>} : vector<2x16xbf16>, vector<16x25xbf16>, vector<2x25xf32> -> vector<2x25xf32>
    %92 = vector.broadcast %22 : vector<2x1xf32> to vector<2x25xf32>
    %93 = arith.addf %91, %92 : vector<2x25xf32>
    %c0_55 = arith.constant 0 : index
    %c0_56 = arith.constant 0 : index
    %c0_57 = arith.constant 0 : index
    %c0_58 = arith.constant 0 : index
    %94 = vector.load %arg8[%c0_55, %c0_56, %c0_57, %c0_58] : memref<1x8x2x25xf32, #tpu.memory_space<vmem>>, vector<1x1x2x25xf32>
    %95 = vector.shape_cast %94 : vector<1x1x2x25xf32> to vector<2x25xf32>
    %96 = vector.shape_cast %93 : vector<2x25xf32> to vector<1x1x2x25xf32>
    tpu.vector_store %arg8[%c0_55, %c0_56, %c0_57, %c0_58], %96 {strides = array<i32>} : memref<1x8x2x25xf32, #tpu.memory_space<vmem>>, vector<1x1x2x25xf32>,
    %97 = arith.truncf %54 : vector<16x25xf32> to vector<16x25xbf16>
    %cst_59 = arith.constant dense<0.000000e+00> : vector<2x25xf32>
    %98 = tpu.matmul %19, %97, %cst_59 {dimension_numbers = #tpu.dot_dimension_numbers<[1], [0], [0], [1], [0, 0, 1, 1], [], []>} : vector<2x16xbf16>, vector<16x25xbf16>, vector<2x25xf32> -> vector<2x25xf32>
    %99 = arith.truncf %63 : vector<16x25xf32> to vector<16x25xbf16>
    %cst_60 = arith.constant dense<0.000000e+00> : vector<2x25xf32>
    %100 = tpu.matmul %15, %99, %cst_60 {dimension_numbers = #tpu.dot_dimension_numbers<[1], [0], [0], [1], [0, 0, 1, 1], [], []>} : vector<2x16xbf16>, vector<16x25xbf16>, vector<2x25xf32> -> vector<2x25xf32>
    %101 = arith.addf %98, %100 : vector<2x25xf32>
    %102 = vector.broadcast %22 : vector<2x1xf32> to vector<2x25xf32>
    %103 = arith.addf %101, %102 : vector<2x25xf32>
    %c0_61 = arith.constant 0 : index
    %c1_62 = arith.constant 1 : index
    %c0_63 = arith.constant 0 : index
    %c0_64 = arith.constant 0 : index
    %104 = vector.load %arg8[%c0_61, %c1_62, %c0_63, %c0_64] : memref<1x8x2x25xf32, #tpu.memory_space<vmem>>, vector<1x1x2x25xf32>
    %105 = vector.shape_cast %104 : vector<1x1x2x25xf32> to vector<2x25xf32>
    %106 = vector.shape_cast %103 : vector<2x25xf32> to vector<1x1x2x25xf32>
    tpu.vector_store %arg8[%c0_61, %c1_62, %c0_63, %c0_64], %106 {strides = array<i32>} : memref<1x8x2x25xf32, #tpu.memory_space<vmem>>, vector<1x1x2x25xf32>,
    %107 = arith.truncf %63 : vector<16x25xf32> to vector<16x25xbf16>
    %cst_65 = arith.constant dense<0.000000e+00> : vector<2x25xf32>
    %108 = tpu.matmul %17, %107, %cst_65 {dimension_numbers = #tpu.dot_dimension_numbers<[1], [0], [0], [1], [0, 0, 1, 1], [], []>} : vector<2x16xbf16>, vector<16x25xbf16>, vector<2x25xf32> -> vector<2x25xf32>
    %109 = vector.broadcast %22 : vector<2x1xf32> to vector<2x25xf32>
    %110 = arith.addf %108, %109 : vector<2x25xf32>
    %c0_66 = arith.constant 0 : index
    %c2_67 = arith.constant 2 : index
    %c0_68 = arith.constant 0 : index
    %c0_69 = arith.constant 0 : index
    %111 = vector.load %arg8[%c0_66, %c2_67, %c0_68, %c0_69] : memref<1x8x2x25xf32, #tpu.memory_space<vmem>>, vector<1x1x2x25xf32>
    %112 = vector.shape_cast %111 : vector<1x1x2x25xf32> to vector<2x25xf32>
    %113 = vector.shape_cast %110 : vector<2x25xf32> to vector<1x1x2x25xf32>
    tpu.vector_store %arg8[%c0_66, %c2_67, %c0_68, %c0_69], %113 {strides = array<i32>} : memref<1x8x2x25xf32, #tpu.memory_space<vmem>>, vector<1x1x2x25xf32>,
    %114 = arith.truncf %63 : vector<16x25xf32> to vector<16x25xbf16>
    %cst_70 = arith.constant dense<0.000000e+00> : vector<2x25xf32>
    %115 = tpu.matmul %19, %114, %cst_70 {dimension_numbers = #tpu.dot_dimension_numbers<[1], [0], [0], [1], [0, 0, 1, 1], [], []>} : vector<2x16xbf16>, vector<16x25xbf16>, vector<2x25xf32> -> vector<2x25xf32>
    %116 = arith.truncf %69 : vector<16x25xf32> to vector<16x25xbf16>
    %cst_71 = arith.constant dense<0.000000e+00> : vector<2x25xf32>
    %117 = tpu.matmul %15, %116, %cst_71 {dimension_numbers = #tpu.dot_dimension_numbers<[1], [0], [0], [1], [0, 0, 1, 1], [], []>} : vector<2x16xbf16>, vector<16x25xbf16>, vector<2x25xf32> -> vector<2x25xf32>
    %118 = arith.addf %115, %117 : vector<2x25xf32>
    %119 = vector.broadcast %22 : vector<2x1xf32> to vector<2x25xf32>
    %120 = arith.addf %118, %119 : vector<2x25xf32>
    %c0_72 = arith.constant 0 : index
    %c3 = arith.constant 3 : index
    %c0_73 = arith.constant 0 : index
    %c0_74 = arith.constant 0 : index
    %121 = vector.load %arg8[%c0_72, %c3, %c0_73, %c0_74] : memref<1x8x2x25xf32, #tpu.memory_space<vmem>>, vector<1x1x2x25xf32>
    %122 = vector.shape_cast %121 : vector<1x1x2x25xf32> to vector<2x25xf32>
    %123 = vector.shape_cast %120 : vector<2x25xf32> to vector<1x1x2x25xf32>
    tpu.vector_store %arg8[%c0_72, %c3, %c0_73, %c0_74], %123 {strides = array<i32>} : memref<1x8x2x25xf32, #tpu.memory_space<vmem>>, vector<1x1x2x25xf32>,
    %124 = arith.truncf %69 : vector<16x25xf32> to vector<16x25xbf16>
    %cst_75 = arith.constant dense<0.000000e+00> : vector<2x25xf32>
    %125 = tpu.matmul %17, %124, %cst_75 {dimension_numbers = #tpu.dot_dimension_numbers<[1], [0], [0], [1], [0, 0, 1, 1], [], []>} : vector<2x16xbf16>, vector<16x25xbf16>, vector<2x25xf32> -> vector<2x25xf32>
    %126 = vector.broadcast %22 : vector<2x1xf32> to vector<2x25xf32>
    %127 = arith.addf %125, %126 : vector<2x25xf32>
    %c0_76 = arith.constant 0 : index
    %c4 = arith.constant 4 : index
    %c0_77 = arith.constant 0 : index
    %c0_78 = arith.constant 0 : index
    %128 = vector.load %arg8[%c0_76, %c4, %c0_77, %c0_78] : memref<1x8x2x25xf32, #tpu.memory_space<vmem>>, vector<1x1x2x25xf32>
    %129 = vector.shape_cast %128 : vector<1x1x2x25xf32> to vector<2x25xf32>
    %130 = vector.shape_cast %127 : vector<2x25xf32> to vector<1x1x2x25xf32>
    tpu.vector_store %arg8[%c0_76, %c4, %c0_77, %c0_78], %130 {strides = array<i32>} : memref<1x8x2x25xf32, #tpu.memory_space<vmem>>, vector<1x1x2x25xf32>,
    %131 = arith.truncf %69 : vector<16x25xf32> to vector<16x25xbf16>
    %cst_79 = arith.constant dense<0.000000e+00> : vector<2x25xf32>
    %132 = tpu.matmul %19, %131, %cst_79 {dimension_numbers = #tpu.dot_dimension_numbers<[1], [0], [0], [1], [0, 0, 1, 1], [], []>} : vector<2x16xbf16>, vector<16x25xbf16>, vector<2x25xf32> -> vector<2x25xf32>
    %133 = arith.truncf %89 : vector<16x25xf32> to vector<16x25xbf16>
    %cst_80 = arith.constant dense<0.000000e+00> : vector<2x25xf32>
    %134 = tpu.matmul %15, %133, %cst_80 {dimension_numbers = #tpu.dot_dimension_numbers<[1], [0], [0], [1], [0, 0, 1, 1], [], []>} : vector<2x16xbf16>, vector<16x25xbf16>, vector<2x25xf32> -> vector<2x25xf32>
    %135 = arith.addf %132, %134 : vector<2x25xf32>
    %136 = vector.broadcast %22 : vector<2x1xf32> to vector<2x25xf32>
    %137 = arith.addf %135, %136 : vector<2x25xf32>
    %c0_81 = arith.constant 0 : index
    %c5 = arith.constant 5 : index
    %c0_82 = arith.constant 0 : index
    %c0_83 = arith.constant 0 : index
    %138 = vector.load %arg8[%c0_81, %c5, %c0_82, %c0_83] : memref<1x8x2x25xf32, #tpu.memory_space<vmem>>, vector<1x1x2x25xf32>
    %139 = vector.shape_cast %138 : vector<1x1x2x25xf32> to vector<2x25xf32>
    %140 = vector.shape_cast %137 : vector<2x25xf32> to vector<1x1x2x25xf32>
    tpu.vector_store %arg8[%c0_81, %c5, %c0_82, %c0_83], %140 {strides = array<i32>} : memref<1x8x2x25xf32, #tpu.memory_space<vmem>>, vector<1x1x2x25xf32>,
    %141 = tpu.iota {dimensions = array<i32: 0>} : vector<25x25xi32>
    %142 = tpu.iota {dimensions = array<i32: 1>} : vector<25x25xi32>
    %c1_i32_84 = arith.constant 1 : i32
    %143 = vector.broadcast %c1_i32_84 : i32 to vector<25x25xi32>
    %144 = arith.addi %142, %143 : vector<25x25xi32>
    %145 = arith.cmpi eq, %144, %141 : vector<25x25xi32>
    %cst_85 = arith.constant 1.000000e+00 : f32
    %cst_86 = arith.constant 0.000000e+00 : f32
    %146 = vector.broadcast %cst_85 : f32 to vector<25x25xf32>
    %147 = vector.broadcast %cst_86 : f32 to vector<25x25xf32>
    %148 = arith.select %145, %146, %147 : vector<25x25xi1>, vector<25x25xf32>
    %149 = arith.truncf %54 : vector<16x25xf32> to vector<16x25xbf16>
    %150 = arith.truncf %148 : vector<25x25xf32> to vector<25x25xbf16>
    %cst_87 = arith.constant dense<0.000000e+00> : vector<16x25xf32>
    %151 = tpu.matmul %149, %150, %cst_87 {dimension_numbers = #tpu.dot_dimension_numbers<[1], [0], [0], [1], [0, 0, 1, 1], [], []>} : vector<16x25xbf16>, vector<25x25xbf16>, vector<16x25xf32> -> vector<16x25xf32>
    %152 = arith.truncf %89 : vector<16x25xf32> to vector<16x25xbf16>
    %cst_88 = arith.constant dense<0.000000e+00> : vector<2x25xf32>
    %153 = tpu.matmul %17, %152, %cst_88 {dimension_numbers = #tpu.dot_dimension_numbers<[1], [0], [0], [1], [0, 0, 1, 1], [], []>} : vector<2x16xbf16>, vector<16x25xbf16>, vector<2x25xf32> -> vector<2x25xf32>
    %154 = vector.broadcast %22 : vector<2x1xf32> to vector<2x25xf32>
    %155 = arith.addf %153, %154 : vector<2x25xf32>
    %c0_89 = arith.constant 0 : index
    %c6 = arith.constant 6 : index
    %c0_90 = arith.constant 0 : index
    %c0_91 = arith.constant 0 : index
    %156 = vector.load %arg8[%c0_89, %c6, %c0_90, %c0_91] : memref<1x8x2x25xf32, #tpu.memory_space<vmem>>, vector<1x1x2x25xf32>
    %157 = vector.shape_cast %156 : vector<1x1x2x25xf32> to vector<2x25xf32>
    %158 = vector.shape_cast %155 : vector<2x25xf32> to vector<1x1x2x25xf32>
    tpu.vector_store %arg8[%c0_89, %c6, %c0_90, %c0_91], %158 {strides = array<i32>} : memref<1x8x2x25xf32, #tpu.memory_space<vmem>>, vector<1x1x2x25xf32>,
    %159 = arith.truncf %89 : vector<16x25xf32> to vector<16x25xbf16>
    %cst_92 = arith.constant dense<0.000000e+00> : vector<2x25xf32>
    %160 = tpu.matmul %19, %159, %cst_92 {dimension_numbers = #tpu.dot_dimension_numbers<[1], [0], [0], [1], [0, 0, 1, 1], [], []>} : vector<2x16xbf16>, vector<16x25xbf16>, vector<2x25xf32> -> vector<2x25xf32>
    %161 = arith.truncf %151 : vector<16x25xf32> to vector<16x25xbf16>
    %cst_93 = arith.constant dense<0.000000e+00> : vector<2x25xf32>
    %162 = tpu.matmul %15, %161, %cst_93 {dimension_numbers = #tpu.dot_dimension_numbers<[1], [0], [0], [1], [0, 0, 1, 1], [], []>} : vector<2x16xbf16>, vector<16x25xbf16>, vector<2x25xf32> -> vector<2x25xf32>
    %163 = arith.addf %160, %162 : vector<2x25xf32>
    %164 = vector.broadcast %22 : vector<2x1xf32> to vector<2x25xf32>
    %165 = arith.addf %163, %164 : vector<2x25xf32>
    %c0_94 = arith.constant 0 : index
    %c7 = arith.constant 7 : index
    %c0_95 = arith.constant 0 : index
    %c0_96 = arith.constant 0 : index
    %166 = vector.load %arg8[%c0_94, %c7, %c0_95, %c0_96] : memref<1x8x2x25xf32, #tpu.memory_space<vmem>>, vector<1x1x2x25xf32>
    %167 = vector.shape_cast %166 : vector<1x1x2x25xf32> to vector<2x25xf32>
    %168 = vector.shape_cast %165 : vector<2x25xf32> to vector<1x1x2x25xf32>
    tpu.vector_store %arg8[%c0_94, %c7, %c0_95, %c0_96], %168 {strides = array<i32>} : memref<1x8x2x25xf32, #tpu.memory_space<vmem>>, vector<1x1x2x25xf32>,
    return
  }
  func.func @transform_0(%arg0: i32) -> (i32, i32, i32) {
    %c0_i32 = arith.constant 0 : i32
    %c0_i32_0 = arith.constant 0 : i32
    %c0_i32_1 = arith.constant 0 : i32
    return %arg0, %c0_i32, %c0_i32_0 : i32, i32, i32
  }
  func.func @transform_1(%arg0: i32) -> (i32, i32, i32) {
    %c0_i32 = arith.constant 0 : i32
    %c0_i32_0 = arith.constant 0 : i32
    %c0_i32_1 = arith.constant 0 : i32
    %c0_i32_2 = arith.constant 0 : i32
    return %c0_i32, %c0_i32_0, %c0_i32_1 : i32, i32, i32
  }
  func.func @transform_2(%arg0: i32) -> (i32, i32) {
    %c0_i32 = arith.constant 0 : i32
    %c0_i32_0 = arith.constant 0 : i32
    %c0_i32_1 = arith.constant 0 : i32
    return %c0_i32, %c0_i32_0 : i32, i32
  }
  func.func @transform_3(%arg0: i32) -> (i32, i32, i32) {
    %c0_i32 = arith.constant 0 : i32
    %c0_i32_0 = arith.constant 0 : i32
    %c0_i32_1 = arith.constant 0 : i32
    %c0_i32_2 = arith.constant 0 : i32
    return %c0_i32, %c0_i32_0, %c0_i32_1 : i32, i32, i32
  }
  func.func @transform_4(%arg0: i32) -> (i32, i32) {
    %c0_i32 = arith.constant 0 : i32
    %c0_i32_0 = arith.constant 0 : i32
    %c0_i32_1 = arith.constant 0 : i32
    return %c0_i32, %c0_i32_0 : i32, i32
  }
  func.func @transform_5(%arg0: i32) -> (i32, i32, i32) {
    %c0_i32 = arith.constant 0 : i32
    %c0_i32_0 = arith.constant 0 : i32
    %c0_i32_1 = arith.constant 0 : i32
    %c0_i32_2 = arith.constant 0 : i32
    return %c0_i32, %c0_i32_0, %c0_i32_1 : i32, i32, i32
  }
  func.func @transform_6(%arg0: i32) -> (i32, i32) {
    %c0_i32 = arith.constant 0 : i32
    %c0_i32_0 = arith.constant 0 : i32
    %c0_i32_1 = arith.constant 0 : i32
    return %c0_i32, %c0_i32_0 : i32, i32
  }
  func.func @transform_7(%arg0: i32) -> (i32, i32, i32, i32) {
    %c0_i32 = arith.constant 0 : i32
    %c0_i32_0 = arith.constant 0 : i32
    %c0_i32_1 = arith.constant 0 : i32
    %c0_i32_2 = arith.constant 0 : i32
    return %arg0, %c0_i32, %c0_i32_0, %c0_i32_1 : i32, i32, i32, i32
  }
}

</mosaic_0001>

<bundles_post_ra>
// kernel: vae_forward.3
= control target key start
LH: loop header
LB: loop body
LE: loop exit
PB: predicated region body
PF: predicated region fallthrough
CT: control target
= control target key end

     0   :  { %s2406_s24 = smov 0   ;;  %s2727_s0 = inlined_call_operand.vmem [shape: f32[2,8,2,25], index: 0, kind: input, shape index: {}]   ;;  %s2728_s1 = inlined_call_operand.vmem [shape: bf16[3,16,2], index: 1, kind: input, shape index: {}]   ;;  %s2729_s2 = inlined_call_operand.vmem [shape: f32[16,1], index: 2, kind: input, shape index: {}]   ;;  %s2730_s3 = inlined_call_operand.vmem [shape: bf16[3,32,16], index: 3, kind: input, shape index: {}]   ;;  %s2731_s4 = inlined_call_operand.vmem [shape: f32[32,1], index: 4, kind: input, shape index: {}]   ;;  %s2732_s5 = inlined_call_operand.vmem [shape: bf16[3,64,32], index: 5, kind: input, shape index: {}]   ;;  %s2733_s6 = inlined_call_operand.vmem [shape: f32[64,1], index: 6, kind: input, shape index: {}]   ;;  %s2734_s7 = inlined_call_operand.vmem [shape: f32[2,64,25], index: 7, kind: output, shape index: {}]  }
   0x1 LB: > { %s1932_s25 = sadd.s32 4294967295, %s2359_s24   ;;  %p1936_p0 = scmp.ge.s32.totalorder %s2359_s24, 1  ;;  %s2359_s24 = sphi %s2406_s24, %s17_s24  }
   0x2   : > { %p237_p1 = scmp.lt.s32.totalorder %s2359_s24, 3 }
   0x4   : > { %p238_p2 = pnand %p1936_p0, %p237_p1 }
   0x5   : > { %v357_v0 = vlaneseq (!%p238_p2)  ;;  %vm383_vm0 = vcmask (!%p238_p2), 1043456   ;;  %p269_p3 = scmp.lt.s32.totalorder (!%p238_p2), %s1932_s25, 1  ;;  %v2361_v1 = vmov (!%p238_p2), 0.0   ;;  %vm384_vm1 = vcmask (!%p238_p2), 1044480   ;;  %v2433_v17 = vld [vmem:[%s2728_s1 + $0x8] sm:$0xff] (!%p238_p2)   ;;  %v2466_v29 = vld [vmem:[%s2728_s1] sm:$0xff] (!%p238_p2)  }
   0x6   : > { %241 = sbr.rel (%p238_p2) target bundleno = 1235 (0x4d3), region = 48  ;;  %2117 = vmatprep.subr.bf16.mxu0 (!%p238_p2), %v2361_v1  ;;  %2125 = vmatprep.subr.bf16.mxu1 (!%p238_p2), %v2361_v1  ;;  %v2362_v4 = vmov (!%p238_p2), 65535   ;;  %vm2363_vm2 = vmmov (!%p238_p2), 0   ;;  %vm441_vm3 = vcmask (!%p238_p2), 1040384   ;;  %vm379_vm5 = vcmask (!%p238_p2), 203776   ;;  %v2485_v36 = vld [vmem:[%s2728_s1 + $0x10] sm:$0xff] (!%p238_p2)  }
   0x7   : > { %v358_v2 = vshrl.u32 (!%p238_p2), %v357_v0, 7  ;;  %v363_v3 = vand.u32 (!%p238_p2), 127, %v357_v0  ;;  %v385_v5 = vsel (!%p238_p2), %vm383_vm0, 4294967295, %v2362_v4  ;;  %2121 = vmatprep.mubr.msk.bf16.mxu0 (!%p238_p2), %vm2363_vm2, %v2361_v1  ;;  %2127 = vmatprep.mubr.msk.bf16.mxu1 (!%p238_p2), %vm2363_vm2, %v2361_v1  ;;  %v2364_v21 = vmov (!%p238_p2), 1.0|1.0   ;;  %v343_v37 = vld [vmem:[%s2729_s2] sm:$0xff] (!%p238_p2) }
   0x8   : > { %v386_v6 = vsel (!%p238_p2), %vm384_vm1, %v385_v5, 0  ;;  %vm437_vm10 = vcmask (!%p238_p2), 15360   ;;  %v2365_v38 = vmov (!%p238_p2), 0   ;;  %v344_v39 = vld [vmem:[%s2729_s2 + $0x8] sm:$0xff] (!%p238_p2)  ;;  %v347_v40 = vld [vmem:[%s2731_s4 + $0x10] sm:$0xff] (!%p238_p2)  ;;  %v349_v41 = vld [vmem:[%s2733_s6] sm:$0xff] (!%p238_p2) }
   0x9   : > { %v359_v7 = vadd.s32 (!%p238_p2), 8, %v358_v2  ;;  %v364_v8 = vadd.s32 (!%p238_p2), 1, %v358_v2  ;;  %v360_v9 = vadd.s32 (!%p238_p2), 16, %v358_v2  ;;  %v361_v10 = vadd.s32 (!%p238_p2), 24, %v358_v2  ;;  %2330 = vset.pattern.permute.xlu0 (!%p238_p2), %v2365_v38  ;;  %2331 = vset.pattern.permute.xlu1 (!%p238_p2), %v2365_v38  ;;  %v351_v42 = vld [vmem:[%s2733_s6 + $0x10] sm:$0xff] (!%p238_p2)  ;;  %v353_v43 = vld [vmem:[%s2733_s6 + $0x20] sm:$0xff] (!%p238_p2) }
   0xa   : > { %595 = vperm.xlu0 (!%p238_p2), %2330, %v343_v37   ;;  %v355_v44 = vld [vmem:[%s2733_s6 + $0x30] sm:$0xff] (!%p238_p2)  ;;  %vm1073_vm11 = vcmask (!%p238_p2), 130048   ;;  %vm1533_vm12 = vcmask (!%p238_p2), 261120  }
   0xb   : > { %v365_v11 = vadd.s32 (!%p238_p2), 1, %v359_v7  ;;  %vm368_vm4 = vcmp.eq.s32.totalorder (!%p238_p2), %v363_v3, %v364_v8  ;;  %v366_v12 = vadd.s32 (!%p238_p2), 1, %v360_v9  ;;  %v367_v13 = vadd.s32 (!%p238_p2), 1, %v361_v10 }
   0xd   : > { %s2738_s25 = smov (!%p269_p3, %s1932_s25), 1  ;;  %vm369_vm6 = vcmp.eq.s32.totalorder %v363_v3, %v365_v11  ;;  %vm370_vm7 = vcmp.eq.s32.totalorder %v363_v3, %v366_v12  ;;  %vm371_vm8 = vcmp.eq.s32.totalorder %v363_v3, %v367_v13 }
   0xe   : > { %s2045_s26 = sshll.u32 %s2738_s25, 4  ;;  %vm2435_vm9 = vmpackc.low %vm369_vm6, %vm368_vm4  ;;  %v374_v19 = vsel %vm370_vm7, 1.0, %v2361_v1  ;;  %v375_v20 = vsel %vm371_vm8, 1.0, %v2361_v1  ;;  %600 = vperm.xlu0 %2330, %v344_v39   ;;  %s2046_s14 = sshll.u32 %s2738_s25, 6 }
   0xf   : > { %s2426_s29 = scalar_lea.vmem %s2727_s0, %s2045_s26  ;;  %2118 = vmatpush3.bf16.msk.msra.mxu0 %vm2435_vm9, %v2364_v21  ;;  %v378_v22 = vpack.c.bf16 %v375_v20, %v374_v19  ;;  %v345_v19 = vld [vmem:[%s2731_s4] sm:$0xff]  ;;  %v346_v20 = vld [vmem:[%s2731_s4 + $0x8] sm:$0xff]  ;;  %s2706_s17 = scalar_lea.vmem %s2734_s7, %s2046_s14 }
  0x10   : > { %v280_v14 = vld [vmem:[%s2426_s29] sm:$0x3]  ;;  %v1947_v15 = vld [vmem:[%s2426_s29 + $0xe] sm:$0x3]  ;;  %2119 = vmatprep.subr.bf16.mxu0 %v2361_v1  ;;  %v1941_v26 = vld [vmem:[%s2426_s29 + $0x2] sm:$0x3]  ;;  %1266 = vperm.xlu1 %2331, %v345_v19  }
  0x11   : > { %v431_v16 = vpack.c.bf16 %v280_v14, %v280_v14  ;;  %v2446_v24 = vand.u32 %v386_v6, %v378_v22  ;;  %v2449_v25 = vpack.c.bf16 %v1947_v15, %v1947_v15  ;;  %v538_v27 = vpack.c.bf16 %v1941_v26, %v1941_v26  ;;  %v1944_v30 = vld [vmem:[%s2426_s29 + $0x8] sm:$0x3]  ;;  %v1945_v33 = vld [vmem:[%s2426_s29 + $0xa] sm:$0x3]  ;;  %v1942_v55 = vld [vmem:[%s2426_s29 + $0x4] sm:$0x3] }
  0x12   : > { %v744_v31 = vpack.c.bf16 %v1944_v30, %v1944_v30  ;;  %v830_v34 = vpack.c.bf16 %v1945_v33, %v1945_v33  ;;  %1276 = vperm.xlu0 %2330, %v347_v40   ;;  %v607_v56 = vpack.c.bf16 %v1942_v55, %v1942_v55  ;;  %v1943_v58 = vld [vmem:[%s2426_s29 + $0x6] sm:$0x3]  ;;  %v1946_v61 = vld [vmem:[%s2426_s29 + $0xc] sm:$0x3]  ;;  %v348_v22 = vld [vmem:[%s2731_s4 + $0x18] sm:$0xff] }
  0x13   : > { %v443_v23 = vsel %vm441_vm3, %v431_v16, 0  ;;  %2120 = vmatpush3.bf16.msra.mxu0 %v2446_v24  ;;  %v548_v28 = vsel %vm441_vm3, %v538_v27, 0  ;;  %v693_v59 = vpack.c.bf16 %v1943_v58, %v1943_v58  ;;  %v881_v62 = vpack.c.bf16 %v1946_v61, %v1946_v61  ;;  %v354_v26 = vld [vmem:[%s2733_s6 + $0x28] sm:$0xff]  ;;  %v356_v27 = vld [vmem:[%s2733_s6 + $0x38] sm:$0xff] }
  0x14   : > { %2126 = vmatpush3.bf16.msra.mxu1 %v443_v23  ;;  %2149 = vmatprep.subr.bf16.mxu0 %v2361_v1  ;;  %v746_v32 = vsel %vm441_vm3, %v744_v31, 0  ;;  %v832_v35 = vsel %vm441_vm3, %v830_v34, 0  ;;  %v609_v57 = vsel %vm441_vm3, %v607_v56, 0  ;;  %v967_v0 = vsel %vm441_vm3, %v2449_v25, 0  ;;  %v350_v23 = vld [vmem:[%s2733_s6 + $0x8] sm:$0xff] }
  0x15   : > { %2131 = vmatprep.subr.bf16.mxu1 %v2361_v1  ;;  %v695_v60 = vsel %vm441_vm3, %v693_v59, 0  ;;  %v883_v63 = vsel %vm441_vm3, %v881_v62, 0  ;;  %1271 = vperm.xlu1 %2331, %v346_v20  }
  0x16   : > { %2122 = vmatmul.mubr.msk.bf16.vlgmr.msra.gmra.mrb[0].mxu0 %vm379_vm5, %v2449_v25  ;;  %1815 = vperm.xlu0 %2330, %v349_v41   ;;  %v352_v25 = vld [vmem:[%s2733_s6 + $0x18] sm:$0xff] }
  0x17   : > { %2128 = vmatmul.mubr.msk.bf16.vlgmr.msra.gmra.mrb[0].mxu1 %vm437_vm10, %v2433_v17  ;;  %2151 = vmatprep.mubr.msk.bf16.mxu0 %vm2363_vm2, %v2361_v1 }
  0x18   : > { %2133 = vmatprep.mubr.msk.bf16.mxu1 %vm2363_vm2, %v2361_v1  ;;  %2150 = vmatpush3.bf16.msra.mxu0 %v548_v28 }
  0x19   : > { %2161 = vmatprep.subr.bf16.mxu0 %v2361_v1  ;;  %1281 = vperm.xlu1 %2331, %v348_v22  }
  0x1a   : > { %1825 = vperm.xlu0 %2330, %v351_v42  }
  0x1d   : > { %1820 = vperm.xlu1 %2331, %v350_v23  }
  0x1e   : > { %2152 = vmatmul.mubr.msk.bf16.vlgmr.msra.gmra.mrb[4].mxu0 %vm437_vm10, %v2466_v29  ;;  %1835 = vperm.xlu0 %2330, %v353_v43  }
  0x1f   : > { %2163 = vmatprep.mubr.msk.bf16.mxu0 %vm2363_vm2, %v2361_v1  ;;  %2162 = vmatpush3.bf16.msra.mxu0 %v746_v32 }
  0x20   : > { %2173 = vmatprep.subr.bf16.mxu0 %v2361_v1 }
  0x21   : > { %1830 = vperm.xlu1 %2331, %v352_v25  }
  0x22   : > { %1845 = vperm.xlu0 %2330, %v355_v44  }
  0x25   : > { %1840 = vperm.xlu1 %2331, %v354_v26  }
  0x26   : > { %2164 = vmatmul.mubr.msk.bf16.vlgmr.msra.gmra.mrb[8].mxu0 %vm437_vm10, %v2433_v17 }
  0x27   : > { %2175 = vmatprep.mubr.msk.bf16.mxu0 %vm2363_vm2, %v2361_v1  ;;  %2174 = vmatpush3.bf16.msra.mxu0 %v832_v35 }
  0x28   : > { %2185 = vmatprep.subr.bf16.mxu0 %v2361_v1 }
  0x29   : > { %1850 = vperm.xlu1 %2331, %v356_v27  }
  0x2e   : > { %2176 = vmatmul.mubr.msk.bf16.vlgmr.msra.gmra.mrb[12].mxu0 %vm437_vm10, %v2485_v36 }
  0x2f   : > { %2186 = vmatpush3.bf16.msra.mxu0 %v832_v35  ;;  %2187 = vmatprep.mubr.msk.bf16.mxu0 %vm2363_vm2, %v2361_v1 }
  0x30   : > { %2197 = vmatprep.subr.bf16.mxu0 %v2361_v1 }
  0x36   : > { %2188 = vmatmul.mubr.msk.bf16.vlgmr.msra.gmra.mrb[16].mxu0 %vm437_vm10, %v2466_v29 }
  0x37   : > { %2198 = vmatpush3.bf16.msk.msra.mxu0 %vm2435_vm9, %v2364_v21  ;;  %2201 = vmatprep.mubr.msk.bf16.mxu0 %vm2363_vm2, %v2361_v1 }
  0x38   : > { %2199 = vmatprep.subr.bf16.mxu0 %v2361_v1 }
  0x3b   : > { %2200 = vmatpush3.bf16.msra.mxu0 %v2446_v24 }
  0x89   : > { %v596_v34 = vpop.permute.xlu0 %595 }
  0x8d   : > { %v601_v39 = vpop.permute.xlu0 %600 }
  0xe9   : > { %v424_v48 = vpop.f32.mrb[0].mxu0 }
  0xea   : > { %v2523_v45 = vpop.f32.mrb[0].mxu1  ;;  %v430_v50 = vpack.c.bf16 %v424_v48, %v424_v48  ;;  %v2123_v51 = vpop.f32.mrb[1].mxu0 }
  0xeb   : > { %v2129_v46 = vpop.f32.mrb[1].mxu1  ;;  %v427_v52 = vpop.f32.mrb[2].mxu0 }
  0xec   : > { %v2525_v47 = vpop.f32.mrb[2].mxu1  ;;  %v495_v53 = vsel %vm441_vm3, %v430_v50, 0  ;;  %v2124_v54 = vpop.f32.mrb[3].mxu0 }
  0xed   : > { %v2130_v49 = vpop.f32.mrb[3].mxu1  ;;  %2132 = vmatpush3.bf16.msra.mxu1 %v495_v53  ;;  %v2336_v53 = vld [vmem:[%s2730_s3 + $0x18] sm:$0xff]   ;;  %v2337_v54 = vld [vmem:[%s2730_s3] sm:$0xff]  }
  0xee   : > { %2137 = vmatprep.subr.bf16.mxu1 %v2361_v1 }
  0xf0   : > { %2134 = vmatmul.mubr.msk.bf16.vlgmr.msra.gmra.mrb[4].mxu1 %vm437_vm10, %v2466_v29 }
  0xf1   : > { %2138 = vmatpush3.bf16.msra.mxu1 %v548_v28  ;;  %2139 = vmatprep.mubr.msk.bf16.mxu1 %vm2363_vm2, %v2361_v1  ;;  %v686_v2 = vpop.f32.mrb[4].mxu0 }
  0xf2   : > { %2143 = vmatprep.subr.bf16.mxu1 %v2361_v1  ;;  %v2153_v3 = vpop.f32.mrb[5].mxu0 }
  0xf3   : > { %v689_v4 = vpop.f32.mrb[6].mxu0 }
  0xf4   : > { %v2154_v5 = vpop.f32.mrb[7].mxu0 }
  0xf8   : > { %2140 = vmatmul.mubr.msk.bf16.vlgmr.msra.gmra.mrb[8].mxu1 %vm437_vm10, %v2485_v36 }
  0xf9   : > { %2144 = vmatpush3.bf16.msra.mxu1 %v609_v57  ;;  %2145 = vmatprep.mubr.msk.bf16.mxu1 %vm2363_vm2, %v2361_v1  ;;  %v2568_v6 = vpop.f32.mrb[8].mxu0 }
  0xfa   : > { %2155 = vmatprep.subr.bf16.mxu1 %v2361_v1  ;;  %v2165_v7 = vpop.f32.mrb[9].mxu0 }
  0xfb   : > { %v2570_v8 = vpop.f32.mrb[10].mxu0 }
  0xfc   : > { %v2166_v9 = vpop.f32.mrb[11].mxu0 }
 0x100   : > { %2146 = vmatmul.mubr.msk.bf16.vlgmr.msra.gmra.mrb[12].mxu1 %vm437_vm10, %v2433_v17 }
 0x101   : > { %2156 = vmatpush3.bf16.msra.mxu1 %v695_v60  ;;  %2157 = vmatprep.mubr.msk.bf16.mxu1 %vm2363_vm2, %v2361_v1  ;;  %v2572_v10 = vpop.f32.mrb[12].mxu0 }
 0x102   : > { %2167 = vmatprep.subr.bf16.mxu1 %v2361_v1  ;;  %v2177_v11 = vpop.f32.mrb[13].mxu0 }
 0x103   : > { %v2574_v12 = vpop.f32.mrb[14].mxu0 }
 0x104   : > { %v2178_v13 = vpop.f32.mrb[15].mxu0 }
 0x108   : > { %2158 = vmatmul.mubr.msk.bf16.vlgmr.msra.gmra.mrb[16].mxu1 %vm437_vm10, %v2485_v36 }
 0x109   : > { %2168 = vmatpush3.bf16.msra.mxu1 %v695_v60  ;;  %2169 = vmatprep.mubr.msk.bf16.mxu1 %vm2363_vm2, %v2361_v1 }
 0x10a   : > { %2179 = vmatprep.subr.bf16.mxu1 %v2361_v1 }
 0x110   : > { %2170 = vmatmul.mubr.msk.bf16.vlgmr.msra.gmra.mrb[20].mxu1 %vm437_vm10, %v2466_v29 }
 0x111   : > { %2180 = vmatpush3.bf16.msra.mxu1 %v883_v63  ;;  %2181 = vmatprep.mubr.msk.bf16.mxu1 %vm2363_vm2, %v2361_v1 }
 0x112   : > { %2191 = vmatprep.subr.bf16.mxu1 %v2361_v1 }
 0x118   : > { %2182 = vmatmul.mubr.msk.bf16.vlgmr.msra.gmra.mrb[24].mxu1 %vm437_vm10, %v2433_v17  ;;  %v2583_v17 = vld [vmem:[%s2730_s3 + $0x10] sm:$0xff]  }
 0x119   : > { %2192 = vmatpush3.bf16.msra.mxu1 %v967_v0  ;;  %2193 = vmatprep.mubr.msk.bf16.mxu1 %vm2363_vm2, %v2361_v1  ;;  %v2576_v1 = vpop.f32.mrb[16].mxu0 }
 0x11a   : > { %v2189_v14 = vpop.f32.mrb[17].mxu0 }
 0x11b   : > { %v2578_v15 = vpop.f32.mrb[18].mxu0 }
 0x11c   : > { %v2190_v16 = vpop.f32.mrb[19].mxu0 }
 0x120   : > { %2194 = vmatmul.mubr.msk.bf16.vlgmr.msra.gmra.mrb[28].mxu1 %vm437_vm10, %v2485_v36 }
 0x121   : > { %2207 = vmatprep.mubr.msk.bf16.mxu1 %vm1073_vm11, %v2583_v17 }
 0x1c3   : > { %v531_v28 = vpop.f32.mrb[4].mxu1 }
 0x1c4   : > { %v532_v29 = vadd.f32 %v531_v28, %v2523_v45  ;;  %v2135_v30 = vpop.f32.mrb[5].mxu1 }
 0x1c5   : > { %v534_v31 = vpop.f32.mrb[6].mxu1 }
 0x1c6   : > { %v535_v32 = vadd.f32 %v534_v31, %v2525_v47  ;;  %v2136_v33 = vpop.f32.mrb[7].mxu1 }
 0x1cb   : > { %v584_v35 = vpop.f32.mrb[8].mxu1 }
 0x1cc   : > { %v591_v36 = vadd.f32 %v584_v35, %v532_v29  ;;  %v2141_v37 = vpop.f32.mrb[9].mxu1 }
 0x1cd   : > { %v587_v38 = vpop.f32.mrb[10].mxu1 }
 0x1ce   : > { %v603_v40 = vadd.f32 %v596_v34, %v591_v36  ;;  %v592_v41 = vadd.f32 %v587_v38, %v535_v32  ;;  %v2142_v42 = vpop.f32.mrb[11].mxu1 }
 0x1d0   : > { %v604_v43 = vadd.f32 %v601_v39, %v592_v41  ;;  %v605_v44 = vmax.f32 %v603_v40, 0.0 }
 0x1d2   : > { %v606_v46 = vmax.f32 %v604_v43, 0.0  ;;  %v1267_v43 = vpop.permute.xlu1 %1266 }
 0x1d3   : > { %v645_v48 = vpop.f32.mrb[12].mxu1 }
 0x1d4   : > { %v2147_v49 = vpop.f32.mrb[13].mxu1  ;;  %v687_v45 = vadd.f32 %v686_v2, %v645_v48  ;;  %v1062_v50 = vpack.c.bf16 %v606_v46, %v605_v44  ;;  %v1277_v46 = vpop.permute.xlu0 %1276 }
 0x1d5   : > { %v648_v51 = vpop.f32.mrb[14].mxu1 }
 0x1d6   : > { %2205 = vmatprep.subr.bf16.mxu1 %v1062_v50  ;;  %v2148_v47 = vpop.f32.mrb[15].mxu1  ;;  %v690_v52 = vadd.f32 %v689_v4, %v648_v51  ;;  %v1272_v44 = vpop.permute.xlu1 %1271 }
 0x1d7   : > { %2206 = vmatpush3.bf16.msra.mxu1 %v1062_v50 }
 0x1da   : > { %2208 = vmatmul.mubr.msk.bf16.vlgmr.msra.gmra.mrb[32].mxu1 %vm1073_vm11, %v2336_v53  ;;  %v1282_v50 = vpop.permute.xlu1 %1281 }
 0x1db   : > { %v731_v55 = vpop.f32.mrb[16].mxu1  ;;  %2213 = vmatprep.mubr.msk.bf16.mxu1 %vm1073_vm11, %v2337_v54 }
 0x1dc   : > { %v738_v56 = vadd.f32 %v731_v55, %v687_v45  ;;  %v2159_v57 = vpop.f32.mrb[17].mxu1 }
 0x1dd   : > { %v734_v58 = vpop.f32.mrb[18].mxu1 }
 0x1de   : > { %v740_v59 = vadd.f32 %v738_v56, %v596_v34  ;;  %v739_v60 = vadd.f32 %v734_v58, %v690_v52  ;;  %v2160_v61 = vpop.f32.mrb[19].mxu1 }
 0x1e0   : > { %v741_v62 = vadd.f32 %v739_v60, %v601_v39  ;;  %v742_v63 = vmax.f32 %v740_v59, 0.0  ;;  %v2345_v59 = vld [vmem:[%s2732_s5 + $0x20] sm:$0xff]  }
 0x1e2   : > { %v743_v0 = vmax.f32 %v741_v62, 0.0 }
 0x1e3   : > { %v823_v2 = vpop.f32.mrb[20].mxu1 }
 0x1e4   : > { %v1194_v3 = vpack.c.bf16 %v743_v0, %v742_v63  ;;  %v824_v4 = vadd.f32 %v823_v2, %v2568_v6  ;;  %v2171_v5 = vpop.f32.mrb[21].mxu1 }
 0x1e5   : > { %v826_v7 = vpop.f32.mrb[22].mxu1 }
 0x1e6   : > { %v827_v9 = vadd.f32 %v826_v7, %v2570_v8  ;;  %v875_v11 = vadd.f32 %v2572_v10, %v824_v4  ;;  %v2172_v13 = vpop.f32.mrb[23].mxu1 }
 0x1e8   : > { %v877_v14 = vadd.f32 %v875_v11, %v596_v34  ;;  %v876_v16 = vadd.f32 %v2574_v12, %v827_v9 }
 0x1ea   : > { %v878_v19 = vadd.f32 %v876_v16, %v601_v39  ;;  %v879_v22 = vmax.f32 %v877_v14, 0.0  ;;  %v2347_v16 = vld [vmem:[%s2732_s5 + $0x28] sm:$0xff]  }
 0x1eb   : > { %v919_v20 = vpop.f32.mrb[24].mxu1 }
 0x1ec   : > { %v880_v23 = vmax.f32 %v878_v19, 0.0  ;;  %v2183_v25 = vpop.f32.mrb[25].mxu1  ;;  %v961_v26 = vadd.f32 %v2576_v1, %v919_v20  ;;  %v2338_v1 = vld [vmem:[%s2730_s3 + $0x8] sm:$0xff]   ;;  %v2349_v19 = vld [vmem:[%s2732_s5 + $0x30] sm:$0xff]  }
 0x1ed   : > { %v922_v27 = vpop.f32.mrb[26].mxu1 }
 0x1ee   : > { %v2184_v28 = vpop.f32.mrb[27].mxu1  ;;  %v964_v6 = vadd.f32 %v2578_v15, %v922_v27  ;;  %v1292_v29 = vpack.c.bf16 %v880_v23, %v879_v22  ;;  %v2339_v15 = vld [vmem:[%s2730_s3 + $0x20] sm:$0xff]   ;;  %v2351_v22 = vld [vmem:[%s2732_s5 + $0x38] sm:$0xff]  }
 0x1f0   : > { %2223 = vmatprep.subr.bf16.mxu0 %v1292_v29 }
 0x1f3   : > { %v1003_v8 = vpop.f32.mrb[28].mxu1 }
 0x1f4   : > { %v1010_v30 = vadd.f32 %v1003_v8, %v961_v26  ;;  %v2195_v10 = vpop.f32.mrb[29].mxu1  ;;  %v2344_v8 = vld [vmem:[%s2732_s5 + $0x18] sm:$0xff]  }
 0x1f5   : > { %v1006_v31 = vpop.f32.mrb[30].mxu1  ;;  %v2348_v10 = vld [vmem:[%s2732_s5 + $0x48] sm:$0xff]  }
 0x1f6   : > { %v1012_v32 = vadd.f32 %v1010_v30, %v596_v34  ;;  %v1011_v33 = vadd.f32 %v1006_v31, %v964_v6  ;;  %v2196_v12 = vpop.f32.mrb[31].mxu1  ;;  %v2342_v6 = vld [vmem:[%s2732_s5 + $0x8] sm:$0xff]   ;;  %v2346_v30 = vld [vmem:[%s2732_s5 + $0x40] sm:$0xff]   ;;  %v2350_v31 = vld [vmem:[%s2732_s5 + $0x50] sm:$0xff]  }
 0x1f8   : > { %v1013_v35 = vadd.f32 %v1011_v33, %v601_v39  ;;  %v1014_v36 = vmax.f32 %v1012_v32, 0.0  ;;  %v2352_v32 = vld [vmem:[%s2732_s5 + $0x58] sm:$0xff]  }
 0x1fa   : > { %v1015_v37 = vmax.f32 %v1013_v35, 0.0 }
 0x1fc   : > { %v1016_v38 = vpack.c.bf16 %v1015_v37, %v1014_v36 }
 0x1fe   : > { %2202 = vmatmul.mubr.msk.bf16.vlgmr.msra.gmra.mrb[20].mxu0 %vm379_vm5, %v1016_v38 }
 0x1ff   : > { %2224 = vmatpush3.bf16.msra.mxu0 %v1292_v29  ;;  %2225 = vmatprep.mubr.msk.bf16.mxu0 %vm1073_vm11, %v2583_v17  ;;  %v2340_v17 = vld [vmem:[%s2730_s3 + $0x28] sm:$0xff]   ;;  %v2343_v29 = vld [vmem:[%s2732_s5 + $0x10] sm:$0xff]  }
 0x200   : > { %2229 = vmatprep.subr.bf16.mxu0 %v1194_v3 }
 0x206   : > { %2226 = vmatmul.mubr.msk.bf16.vlgmr.msra.gmra.mrb[24].mxu0 %vm1073_vm11, %v2336_v53 }
 0x207   : > { %2230 = vmatpush3.bf16.msra.mxu0 %v1194_v3  ;;  %2231 = vmatprep.mubr.msk.bf16.mxu0 %vm1073_vm11, %v2337_v54 }
 0x208   : > { %2235 = vmatprep.subr.bf16.mxu0 %v1016_v38 }
 0x212   : > { %2232 = vmatmul.mubr.msk.bf16.vlgmr.msra.gmra.mrb[24].mxu0 %vm1073_vm11, %v2338_v1 }
 0x213   : > { %2236 = vmatpush3.bf16.msra.mxu0 %v1016_v38  ;;  %2237 = vmatprep.mubr.msk.bf16.mxu0 %vm1073_vm11, %v2339_v15 }
 0x21e   : > { %2238 = vmatmul.mubr.msk.bf16.vlgmr.msra.gmra.mrb[24].mxu0 %vm1073_vm11, %v2340_v17 }
 0x2d1   : > { %v1054_v34 = vpop.f32.mrb[20].mxu0 }
 0x2d2   : > { %v2203_v39 = vpop.f32.mrb[21].mxu0 }
 0x2d3   : > { %v1057_v40 = vpop.f32.mrb[22].mxu0 }
 0x2d4   : > { %v1061_v41 = vpack.c.bf16 %v1057_v40, %v1054_v34  ;;  %v2204_v42 = vpop.f32.mrb[23].mxu0  ;;  %v1821_v34 = vpop.permute.xlu1 %1820 }
 0x2d6   : > { %2211 = vmatprep.subr.bf16.mxu1 %v1061_v41 }
 0x2d7   : > { %2212 = vmatpush3.bf16.msra.mxu1 %v1061_v41 }
 0x2d8   : > { %2217 = vmatprep.subr.bf16.mxu1 %v1194_v3  ;;  %v1831_v40 = vpop.permute.xlu1 %1830 }
 0x2da   : > { %2214 = vmatmul.mubr.msk.bf16.vlgmr.msra.gmra.mrb[32].mxu1 %vm1073_vm11, %v2338_v1 }
 0x2db   : > { %2218 = vmatpush3.bf16.msra.mxu1 %v1194_v3  ;;  %2219 = vmatprep.mubr.msk.bf16.mxu1 %vm1073_vm11, %v2339_v15 }
 0x2dc   : > { %2241 = vmatprep.subr.msk.bf16.mxu1 %vm2435_vm9, %v2364_v21 }
 0x2e6   : > { %2220 = vmatmul.mubr.msk.bf16.vlgmr.msra.gmra.mrb[32].mxu1 %vm1073_vm11, %v2340_v17  ;;  %v1816_v17 = vpop.permute.xlu0 %1815 }
 0x2e7   : > { %2242 = vmatpush3.bf16.msk.msra.mxu1 %vm2435_vm9, %v2364_v21 }
 0x2e8   : > { %2243 = vmatprep.subr.bf16.mxu1 %v2446_v24 }
 0x2ea   : > { %v1826_v39 = vpop.permute.xlu0 %1825 }
 0x2eb   : > { %2244 = vmatpush3.bf16.msra.mxu1 %v2446_v24  ;;  %v2341_v24 = vld [vmem:[%s2732_s5] sm:$0xff]  }
 0x2ec   : > { %2265 = vmatprep.mubr.msk.bf16.mxu0 %vm1533_vm12, %v2341_v24 }
 0x2f1   : > { %v2239_v48 = vpop.f32.mrb[24].mxu0 }
 0x2f2   : > { %v1446_v49 = vadd.f32 %v2239_v48, %v1277_v46  ;;  %v1425_v45 = vpop.f32.mrb[25].mxu0 }
 0x2f3   : > { %v1444_v51 = vadd.f32 %v1425_v45, %v1267_v43  ;;  %v2240_v47 = vpop.f32.mrb[26].mxu0 }
 0x2f4   : > { %v1447_v52 = vadd.f32 %v2240_v47, %v1282_v50  ;;  %v1428_v53 = vpop.f32.mrb[27].mxu0  ;;  %v1450_v55 = vmax.f32 %v1446_v49, 0.0 }
 0x2f5   : > { %v1445_v54 = vadd.f32 %v1428_v53, %v1272_v44  ;;  %v1448_v57 = vmax.f32 %v1444_v51, 0.0 }
 0x2f6   : > { %v1451_v56 = vmax.f32 %v1447_v52, 0.0 }
 0x2f7   : > { %v1449_v18 = vmax.f32 %v1445_v54, 0.0  ;;  %v1841_v54 = vpop.permute.xlu1 %1840 }
 0x2f8   : > { %v1453_v21 = vpack.c.bf16 %v1451_v56, %v1450_v55 }
 0x2f9   : > { %v1452_v58 = vpack.c.bf16 %v1449_v18, %v1448_v57 }
 0x2fb   : > { %2245 = vmatprep.mubr.msk.bf16.mxu1 %vm379_vm5, %v1452_v58 }
 0x2fc   : > { %2246 = vmatmul.mubr.msk.bf16.vlgmr.msra.gmra.mrb[36].mxu1 %vm379_vm5, %v1453_v21 }
 0x2fd   : > { %2253 = vmatprep.mubr.msk.bf16.mxu1 %vm1533_vm12, %v2345_v59 }
 0x3b9   : > { %v2221_v60 = vpop.f32.mrb[32].mxu1 }
 0x3ba   : > { %v1286_v61 = vadd.f32 %v2221_v60, %v1277_v46  ;;  %v1245_v62 = vpop.f32.mrb[33].mxu1 }
 0x3bb   : > { %v1284_v63 = vadd.f32 %v1267_v43, %v1245_v62  ;;  %v2222_v0 = vpop.f32.mrb[34].mxu1 }
 0x3bc   : > { %v1287_v2 = vadd.f32 %v2222_v0, %v1282_v50  ;;  %v1248_v3 = vpop.f32.mrb[35].mxu1  ;;  %v1290_v5 = vmax.f32 %v1286_v61, 0.0  ;;  %v1836_v50 = vpop.permute.xlu0 %1835 }
 0x3bd   : > { %v1285_v4 = vadd.f32 %v1272_v44, %v1248_v3  ;;  %v1288_v9 = vmax.f32 %v1284_v63, 0.0 }
 0x3be   : > { %v1291_v7 = vmax.f32 %v1287_v2, 0.0  ;;  %v1851_v2 = vpop.permute.xlu1 %1850 }
 0x3bf   : > { %v1289_v11 = vmax.f32 %v1285_v4, 0.0 }
 0x3c0   : > { %v1512_v13 = vpack.c.bf16 %v1291_v7, %v1290_v5  ;;  %v1846_v59 = vpop.permute.xlu0 %1845 }
 0x3c1   : > { %v1511_v14 = vpack.c.bf16 %v1289_v11, %v1288_v9 }
 0x3c3   : > { %2249 = vmatprep.subr.bf16.mxu1 %v1511_v14 }
 0x3c4   : > { %2250 = vmatpush3.bf16.msra.mxu1 %v1511_v14 }
 0x3c5   : > { %2251 = vmatprep.subr.bf16.mxu1 %v1512_v13 }
 0x3c8   : > { %2252 = vmatpush3.bf16.msra.mxu1 %v1512_v13 }
 0x3cb   : > { %2254 = vmatmul.mubr.msk.bf16.vlgmr.msra.gmra.mrb[40].mxu1 %vm1533_vm12, %v2347_v16 }
 0x3cc   : > { %2257 = vmatprep.mubr.msk.bf16.mxu1 %vm1533_vm12, %v2349_v19 }
 0x3cf   : > { %v2247_v20 = vpop.f32.mrb[36].mxu1 }
 0x3d0   : > { %v1494_v23 = vpop.f32.mrb[37].mxu1 }
 0x3d1   : > { %v2248_v25 = vpop.f32.mrb[38].mxu1 }
 0x3d2   : > { %v1510_v26 = vpack.c.bf16 %v2248_v25, %v2247_v20  ;;  %v1497_v27 = vpop.f32.mrb[39].mxu1 }
 0x3d3   : > { %v1509_v28 = vpack.c.bf16 %v1497_v27, %v1494_v23  ;;  %2258 = vmatmul.mubr.msk.bf16.gmra.mrb[44].mxu1 %vm1533_vm12, %v2351_v22 }
 0x3d5   : > { %2261 = vmatprep.subr.bf16.mxu0 %v1509_v28 }
 0x3d6   : > { %2262 = vmatpush3.bf16.msra.mxu0 %v1509_v28 }
 0x3d7   : > { %2263 = vmatprep.subr.bf16.mxu0 %v1510_v26 }
 0x3da   : > { %2264 = vmatpush3.bf16.msra.mxu0 %v1510_v26 }
 0x3db   : > { %2273 = vmatprep.subr.bf16.mxu0 %v1452_v58 }
 0x3dd   : > { %2266 = vmatmul.mubr.msk.bf16.vlgmr.msra.gmra.mrb[28].mxu0 %vm1533_vm12, %v2342_v6 }
 0x3de   : > { %2274 = vmatpush3.bf16.msra.mxu0 %v1452_v58  ;;  %2269 = vmatprep.mubr.msk.bf16.mxu0 %vm1533_vm12, %v2343_v29 }
 0x3df   : > { %2275 = vmatprep.subr.bf16.mxu0 %v1453_v21 }
 0x3e2   : > { %2276 = vmatpush3.bf16.msra.mxu0 %v1453_v21 }
 0x3e5   : > { %2270 = vmatmul.mubr.msk.bf16.gmra.mrb[32].mxu0 %vm1533_vm12, %v2344_v8 }
 0x3e6   : > { %2277 = vmatprep.mubr.msk.bf16.mxu0 %vm1533_vm12, %v2346_v30 }
 0x3ed   : > { %2278 = vmatmul.mubr.msk.bf16.vlgmr.msra.gmra.mrb[28].mxu0 %vm1533_vm12, %v2348_v10 }
 0x3ee   : > { %2281 = vmatprep.mubr.msk.bf16.mxu0 %vm1533_vm12, %v2350_v31 }
 0x3f5   : > { %2282 = vmatmul.mubr.msk.bf16.gmra.mrb[32].mxu0 %vm1533_vm12, %v2352_v32 }
 0x49e   : > { %v2255_v33 = vpop.f32.mrb[40].mxu1 }
 0x49f   : > { %v1580_v12 = vpop.f32.mrb[41].mxu1 }
 0x4a0   : > { %v2256_v35 = vpop.f32.mrb[42].mxu1 }
 0x4a1   : > { %v1583_v36 = vpop.f32.mrb[43].mxu1 }
 0x4a6   : > { %v2259_v37 = vpop.f32.mrb[44].mxu1 }
 0x4a7   : > { %v1596_v38 = vpop.f32.mrb[45].mxu1 }
 0x4a8   : > { %v2260_v1 = vpop.f32.mrb[46].mxu1 }
 0x4a9   : > { %v1599_v15 = vpop.f32.mrb[47].mxu1 }
 0x4c0   : > { %v2279_v41 = vpop.f32.mrb[28].mxu0 }
 0x4c1   : > { %v2285_v42 = vadd.f32 %v2279_v41, %v2255_v33  ;;  %v1774_v43 = vpop.f32.mrb[29].mxu0 }
 0x4c2   : > { %v2286_v44 = vadd.f32 %v1774_v43, %v1580_v12  ;;  %v2280_v46 = vpop.f32.mrb[30].mxu0 }
 0x4c3   : > { %v1855_v48 = vadd.f32 %v2285_v42, %v1826_v39  ;;  %v2287_v49 = vadd.f32 %v2280_v46, %v2256_v35  ;;  %v1777_v45 = vpop.f32.mrb[31].mxu0 }
 0x4c4   : > { %v1853_v51 = vadd.f32 %v2286_v44, %v1816_v17  ;;  %v2288_v47 = vadd.f32 %v1777_v45, %v1583_v36 }
 0x4c5   : > { %v1863_v52 = vmax.f32 %v1855_v48, 0.0  ;;  %v1856_v53 = vadd.f32 %v2287_v49, %v1831_v40 }
 0x4c6   : > { %v1861_v55 = vmax.f32 %v1853_v51, 0.0  ;;  %v1854_v56 = vadd.f32 %v2288_v47, %v1821_v34 }
 0x4c7   : > { %1871 = vst.msk [vmem:[%s2706_s17 + $0x10] sm:$0xff] %vm379_vm5, %v1863_v52  ;;  %v1864_v57 = vmax.f32 %v1856_v53, 0.0 }
 0x4c8   : > { %1869 = vst.msk [vmem:[%s2706_s17] sm:$0xff] %vm379_vm5, %v1861_v55  ;;  %v1862_v18 = vmax.f32 %v1854_v56, 0.0  ;;  %v2283_v21 = vpop.f32.mrb[32].mxu0 }
 0x4c9   : > { %1872 = vst.msk [vmem:[%s2706_s17 + $0x18] sm:$0xff] %vm379_vm5, %v1864_v57  ;;  %v2289_v58 = vadd.f32 %v2283_v21, %v2259_v37  ;;  %v1790_v24 = vpop.f32.mrb[33].mxu0 }
 0x4ca   : > { %1870 = vst.msk [vmem:[%s2706_s17 + $0x8] sm:$0xff] %vm379_vm5, %v1862_v18  ;;  %v2290_v60 = vadd.f32 %v1790_v24, %v1596_v38  ;;  %v2284_v61 = vpop.f32.mrb[34].mxu0 }
 0x4cb   : > { %v1859_v62 = vadd.f32 %v2289_v58, %v1846_v59  ;;  %v2291_v63 = vadd.f32 %v2284_v61, %v2260_v1  ;;  %v1793_v0 = vpop.f32.mrb[35].mxu0 }
 0x4cc   : > { %v1857_v3 = vadd.f32 %v2290_v60, %v1836_v50  ;;  %v2292_v4 = vadd.f32 %v1793_v0, %v1599_v15 }
 0x4cd   : > { %v1867_v5 = vmax.f32 %v1859_v62, 0.0  ;;  %v1860_v7 = vadd.f32 %v2291_v63, %v1851_v2 }
 0x4ce   : > { %v1865_v9 = vmax.f32 %v1857_v3, 0.0  ;;  %v1858_v11 = vadd.f32 %v2292_v4, %v1841_v54 }
 0x4cf   : > { %1875 = vst.msk [vmem:[%s2706_s17 + $0x30] sm:$0xff] %vm379_vm5, %v1867_v5  ;;  %v1868_v13 = vmax.f32 %v1860_v7, 0.0 }
 0x4d0   : > { %1873 = vst.msk [vmem:[%s2706_s17 + $0x20] sm:$0xff] %vm379_vm5, %v1865_v9  ;;  %v1866_v14 = vmax.f32 %v1858_v11, 0.0 }
 0x4d1   : > { %1876 = vst.msk [vmem:[%s2706_s17 + $0x38] sm:$0xff] %vm379_vm5, %v1868_v13 }
 0x4d2   : > { %1874 = vst.msk [vmem:[%s2706_s17 + $0x28] sm:$0xff] %vm379_vm5, %v1866_v14 }
 0x4d3 PF: > { %s17_s24 = sadd.s32 1, %s2359_s24  }
 0x4d4   : > { %p14_p4 = scmp.ge.s32.totalorder %s17_s24, 4  }
 0x4d6   :  { %16 = sbr.rel (!%p14_p4) target bundleno = 1 (0x1), region = 91 }

// kernel: vae_forward.4
= control target key start
LH: loop header
LB: loop body
LE: loop exit
PB: predicated region body
PF: predicated region fallthrough
CT: control target
= control target key end

     0   :  { %14 = vsyncpa [#allocation3], 0  ;;  %v241_v27 = vlaneseq  ;;  %v2355_v35 = vmov 1983009808   ;;  %s2356_s9 = smov 20   ;;  %s2890_s0 = inlined_call_operand.vmem [shape: f32[2,1600], index: 0, kind: input, shape index: {}]   ;;  %s2891_s1 = inlined_call_operand.vmem [shape: f32[2,20], index: 1, kind: input, shape index: {}]   ;;  %s2892_s2 = inlined_call_operand.vmem [shape: bf16[1600,40], index: 2, kind: input, shape index: {}]   ;;  %s2893_s3 = inlined_call_operand.vmem [shape: f32[1,40], index: 3, kind: input, shape index: {}]   ;;  %s2894_s4 = inlined_call_operand.vmem [shape: bf16[20,1600], index: 4, kind: input, shape index: {}]   ;;  %s2895_s5 = inlined_call_operand.vmem [shape: f32[1,1600], index: 5, kind: input, shape index: {}]   ;;  %s2896_s6 = inlined_call_operand.hbm [shape: f32[2,20], index: 6, kind: output, shape index: {0}]   ;;  %s2897_s7 = inlined_call_operand.hbm [shape: f32[2,20], index: 7, kind: output, shape index: {1}]   ;;  %s2898_s8 = inlined_call_operand.vmem [shape: f32[2,1600], index: 8, kind: output, shape index: {2}]  }
   0x1   :  { %v2172_v0 = vld [vmem:[%s2892_s2 + $0x40] sm:$0xff]   ;;  %v2176_v4 = vld [vmem:[%s2892_s2 + $0x48] sm:$0xff]   ;;  %v2180_v8 = vld [vmem:[%s2892_s2 + $0x50] sm:$0xff]   ;;  %v239_v36 = vunpack.c.l.s4 %v2355_v35 }
   0x2   :  { %v2173_v1 = vld [vmem:[%s2892_s2] sm:$0xff]   ;;  %2004 = vmatprep.subr.bf16.mxu0 %v2172_v0  ;;  %v2177_v5 = vld [vmem:[%s2892_s2 + $0x8] sm:$0xff]   ;;  %v2181_v9 = vld [vmem:[%s2892_s2 + $0x10] sm:$0xff]   ;;  %v2501_v32 = vshrl.u32 %v241_v27, 7 }
   0x3   :  { %v2174_v2 = vld [vmem:[%s2892_s2 + $0xc0] sm:$0xff]   ;;  %2005 = vmatpush3.bf16.msra.mxu0 %v2173_v1  ;;  %v2178_v6 = vld [vmem:[%s2892_s2 + $0xc8] sm:$0xff]   ;;  %v2182_v10 = vld [vmem:[%s2892_s2 + $0xd0] sm:$0xff]   ;;  %v240_v38 = vunpack.c.0.s8 %v239_v36 }
   0x4   :  { %v2175_v3 = vld [vmem:[%s2892_s2 + $0x80] sm:$0xff]   ;;  %2026 = vmatprep.subr.bf16.mxu1 %v2174_v2  ;;  %2006 = vmatprep.subr.bf16.mxu0 %v2176_v4  ;;  %v2179_v7 = vld [vmem:[%s2892_s2 + $0x88] sm:$0xff]   ;;  %v2183_v11 = vld [vmem:[%s2892_s2 + $0x90] sm:$0xff]  }
   0x5   :  { %2027 = vmatpush3.bf16.msra.mxu1 %v2175_v3  ;;  %v2184_v12 = vld [vmem:[%s2892_s2 + $0x58] sm:$0xff]   ;;  %v2188_v16 = vld [vmem:[%s2892_s2 + $0x60] sm:$0xff]   ;;  %v2192_v20 = vld [vmem:[%s2892_s2 + $0x68] sm:$0xff]   ;;  %v2516_v41 = vsub.s32 %v240_v38, %v2501_v32 }
   0x6   :  { %2028 = vmatprep.subr.bf16.mxu1 %v2178_v6  ;;  %v2185_v13 = vld [vmem:[%s2892_s2 + $0x18] sm:$0xff]   ;;  %v2189_v17 = vld [vmem:[%s2892_s2 + $0x20] sm:$0xff]   ;;  %v2193_v21 = vld [vmem:[%s2892_s2 + $0x28] sm:$0xff]  }
   0x7   :  { %2007 = vmatpush3.bf16.msra.mxu0 %v2177_v5  ;;  %v2186_v14 = vld [vmem:[%s2892_s2 + $0xd8] sm:$0xff]   ;;  %v2190_v18 = vld [vmem:[%s2892_s2 + $0xe0] sm:$0xff]   ;;  %v2194_v22 = vld [vmem:[%s2892_s2 + $0xe8] sm:$0xff]  }
   0x8   :  { %2008 = vmatprep.subr.bf16.mxu0 %v2180_v8  ;;  %v2187_v15 = vld [vmem:[%s2892_s2 + $0x98] sm:$0xff]   ;;  %v2191_v19 = vld [vmem:[%s2892_s2 + $0xa0] sm:$0xff]   ;;  %v2195_v23 = vld [vmem:[%s2892_s2 + $0xa8] sm:$0xff]  }
   0x9   :  { %2029 = vmatpush3.bf16.msra.mxu1 %v2179_v7  ;;  %v2196_v24 = vld [vmem:[%s2892_s2 + $0x70] sm:$0xff]   ;;  %v2200_v29 = vld [vmem:[%s2892_s2 + $0x78] sm:$0xff]   ;;  %v29_v33 = vld [vmem:[%s2890_s0] sm:$0xff] }
   0xa   :  { %2030 = vmatprep.subr.bf16.mxu1 %v2182_v10  ;;  %v2197_v25 = vld [vmem:[%s2892_s2 + $0x30] sm:$0xff]   ;;  %v2201_v30 = vld [vmem:[%s2892_s2 + $0x38] sm:$0xff]   ;;  %v2204_v37 = vld [vmem:[%s2892_s2 + $0x140] sm:$0xff]   ;;  %v237_v39 = vcombine.high %v29_v33, %v29_v33  ;;  %v244_v42 = vrot.slane %v29_v33, %v2516_v41 }
   0xb   :  { %2009 = vmatpush3.bf16.msra.mxu0 %v2181_v9  ;;  %v2198_v26 = vld [vmem:[%s2892_s2 + $0xf0] sm:$0xff]   ;;  %v2202_v31 = vld [vmem:[%s2892_s2 + $0xf8] sm:$0xff]   ;;  %v2207_v40 = vld [vmem:[%s2892_s2 + $0x1c0] sm:$0xff]  }
   0xc   :  { %2010 = vmatprep.subr.bf16.mxu0 %v2184_v12  ;;  %v2199_v28 = vld [vmem:[%s2892_s2 + $0xb0] sm:$0xff]   ;;  %v2203_v34 = vld [vmem:[%s2892_s2 + $0xb8] sm:$0xff]   ;;  %v251_v43 = vrot.slane %v237_v39, %v2516_v41  ;;  %v252_v44 = vcombine.high %v244_v42, %v244_v42  ;;  %v2206_v46 = vld [vmem:[%s2892_s2 + $0x100] sm:$0xff]   ;;  %v308_v47 = vpack.c.bf16 %v244_v42, %v244_v42 }
   0xd   :  { %2031 = vmatpush3.bf16.msra.mxu1 %v2183_v11  ;;  %v2208_v49 = vld [vmem:[%s2892_s2 + $0x180] sm:$0xff]   ;;  %v2209_v52 = vld [vmem:[%s2892_s2 + $0x148] sm:$0xff]   ;;  %v2213_v56 = vld [vmem:[%s2892_s2 + $0x150] sm:$0xff]  }
   0xe   :  { %2032 = vmatprep.subr.bf16.mxu1 %v2186_v14  ;;  %v253_v45 = vcombine.high %v251_v43, %v251_v43  ;;  %v310_v48 = vpack.c.bf16 %v251_v43, %v251_v43  ;;  %v309_v50 = vpack.c.bf16 %v252_v44, %v252_v44  ;;  %v2211_v53 = vld [vmem:[%s2892_s2 + $0x1c8] sm:$0xff]   ;;  %v2215_v57 = vld [vmem:[%s2892_s2 + $0x1d0] sm:$0xff]   ;;  %v2217_v60 = vld [vmem:[%s2892_s2 + $0x158] sm:$0xff]  }
   0xf   :  { %2011 = vmatpush3.bf16.msra.mxu0 %v2185_v13  ;;  %v2210_v54 = vld [vmem:[%s2892_s2 + $0x108] sm:$0xff]   ;;  %v2214_v58 = vld [vmem:[%s2892_s2 + $0x110] sm:$0xff]   ;;  %v2219_v61 = vld [vmem:[%s2892_s2 + $0x1d8] sm:$0xff]  }
  0x10   :  { %2012 = vmatprep.subr.bf16.mxu0 %v2188_v16  ;;  %v311_v51 = vpack.c.bf16 %v253_v45, %v253_v45  ;;  %964 = vmatprep.mubr.bf16.mxu0 %v309_v50  ;;  %v2212_v55 = vld [vmem:[%s2892_s2 + $0x188] sm:$0xff]   ;;  %v2216_v59 = vld [vmem:[%s2892_s2 + $0x190] sm:$0xff]   ;;  %v2218_v62 = vld [vmem:[%s2892_s2 + $0x118] sm:$0xff]  }
  0x11   :  { %2033 = vmatpush3.bf16.msra.mxu1 %v2187_v15  ;;  %v2220_v63 = vld [vmem:[%s2892_s2 + $0x198] sm:$0xff]   ;;  %v2221_v0 = vld [vmem:[%s2892_s2 + $0x160] sm:$0xff]   ;;  %v2225_v4 = vld [vmem:[%s2892_s2 + $0x168] sm:$0xff]  }
  0x12   :  { %2034 = vmatprep.subr.bf16.mxu1 %v2190_v18  ;;  %1004 = vmatprep.mubr.bf16.mxu1 %v311_v51  ;;  %v2223_v1 = vld [vmem:[%s2892_s2 + $0x1e0] sm:$0xff]   ;;  %v2227_v5 = vld [vmem:[%s2892_s2 + $0x1e8] sm:$0xff]   ;;  %v2229_v8 = vld [vmem:[%s2892_s2 + $0x170] sm:$0xff]  }
  0x13   :  { %2013 = vmatpush3.bf16.msra.mxu0 %v2189_v17  ;;  %v2222_v2 = vld [vmem:[%s2892_s2 + $0x120] sm:$0xff]   ;;  %v2226_v6 = vld [vmem:[%s2892_s2 + $0x128] sm:$0xff]   ;;  %v2231_v9 = vld [vmem:[%s2892_s2 + $0x1f0] sm:$0xff]  }
  0x14   :  { %2014 = vmatprep.subr.bf16.mxu0 %v2192_v20  ;;  %v2224_v3 = vld [vmem:[%s2892_s2 + $0x1a0] sm:$0xff]   ;;  %v2228_v7 = vld [vmem:[%s2892_s2 + $0x1a8] sm:$0xff]   ;;  %v2230_v11 = vld [vmem:[%s2892_s2 + $0x130] sm:$0xff]  }
  0x15   :  { %2035 = vmatpush3.bf16.msra.mxu1 %v2191_v19  ;;  %v30_v10 = vld [vmem:[%s2890_s0 + $0x8] sm:$0xff]  ;;  %v2232_v14 = vld [vmem:[%s2892_s2 + $0x1b0] sm:$0xff]   ;;  %v2233_v15 = vld [vmem:[%s2892_s2 + $0x178] sm:$0xff]  }
  0x16   :  { %2036 = vmatprep.subr.bf16.mxu1 %v2194_v22  ;;  %v261_v12 = vrot.slane %v30_v10, %v2516_v41  ;;  %v254_v13 = vcombine.high %v30_v10, %v30_v10  ;;  %v2235_v18 = vld [vmem:[%s2892_s2 + $0x1f8] sm:$0xff]   ;;  %v2243_v33 = vld [vmem:[%s2892_s2 + $0x208] sm:$0xff]   ;;  %v2246_v35 = vld [vmem:[%s2892_s2 + $0x250] sm:$0xff]  }
  0x17   :  { %2015 = vmatpush3.bf16.msra.mxu0 %v2193_v21  ;;  %v2234_v19 = vld [vmem:[%s2892_s2 + $0x138] sm:$0xff]   ;;  %v2248_v36 = vld [vmem:[%s2892_s2 + $0x2d0] sm:$0xff]   ;;  %v2254_v44 = vld [vmem:[%s2892_s2 + $0x260] sm:$0xff]  }
  0x18   :  { %2016 = vmatprep.subr.bf16.mxu0 %v2196_v24  ;;  %v269_v16 = vcombine.high %v261_v12, %v261_v12  ;;  %v268_v17 = vrot.slane %v254_v13, %v2516_v41  ;;  %v2236_v22 = vld [vmem:[%s2892_s2 + $0x1b8] sm:$0xff]   ;;  %v312_v27 = vpack.c.bf16 %v261_v12, %v261_v12  ;;  %v2249_v38 = vld [vmem:[%s2892_s2 + $0x290] sm:$0xff]   ;;  %v2256_v45 = vld [vmem:[%s2892_s2 + $0x2e0] sm:$0xff]  }
  0x19   :  { %2037 = vmatpush3.bf16.msra.mxu1 %v2195_v23  ;;  %v2237_v23 = vld [vmem:[%s2892_s2 + $0x240] sm:$0xff]   ;;  %v2250_v39 = vld [vmem:[%s2892_s2 + $0x258] sm:$0xff]   ;;  %v2259_v50 = vld [vmem:[%s2892_s2 + $0x228] sm:$0xff]  }
  0x1a   :  { %2038 = vmatprep.subr.bf16.mxu1 %v2198_v26  ;;  %v313_v20 = vpack.c.bf16 %v269_v16, %v269_v16  ;;  %v270_v21 = vcombine.high %v268_v17, %v268_v17  ;;  %v2239_v26 = vld [vmem:[%s2892_s2 + $0x200] sm:$0xff]   ;;  %v2251_v42 = vld [vmem:[%s2892_s2 + $0x218] sm:$0xff]   ;;  %v2261_v51 = vld [vmem:[%s2892_s2 + $0x2a8] sm:$0xff]  }
  0x1b   :  { %2017 = vmatpush3.bf16.msra.mxu0 %v2197_v25  ;;  %v2240_v25 = vld [vmem:[%s2892_s2 + $0x2c0] sm:$0xff]   ;;  %v2253_v43 = vld [vmem:[%s2892_s2 + $0x298] sm:$0xff]  }
  0x1c   :  { %2018 = vmatprep.subr.bf16.mxu0 %v2200_v29  ;;  %v315_v24 = vpack.c.bf16 %v270_v21, %v270_v21  ;;  %v2241_v29 = vld [vmem:[%s2892_s2 + $0x280] sm:$0xff]  }
  0x1d   :  { %2039 = vmatpush3.bf16.msra.mxu1 %v2199_v28  ;;  %v314_v28 = vpack.c.bf16 %v268_v17, %v268_v17 }
  0x1e   :  { %2040 = vmatprep.subr.bf16.mxu1 %v2202_v31  ;;  %v2244_v31 = vld [vmem:[%s2892_s2 + $0x2c8] sm:$0xff]  }
  0x1f   :  { %2019 = vmatpush3.bf16.msra.mxu0 %v2201_v30  ;;  %v2242_v30 = vld [vmem:[%s2892_s2 + $0x248] sm:$0xff]  }
  0x20   :  { %2048 = vmatprep.subr.bf16.mxu0 %v2204_v37  ;;  %v2247_v37 = vld [vmem:[%s2892_s2 + $0x210] sm:$0xff]  }
  0x21   :  { %2041 = vmatpush3.bf16.msra.mxu1 %v2203_v34  ;;  %v2245_v34 = vld [vmem:[%s2892_s2 + $0x288] sm:$0xff]  }
  0x22   :  { %2070 = vmatprep.subr.bf16.mxu1 %v2207_v40  ;;  %965 = vmatmul.mubr.bf16.vlgmr.msra.gmra.mrb[0].mxu0 %v308_v47  ;;  %v2252_v40 = vld [vmem:[%s2892_s2 + $0x2d8] sm:$0xff]   ;;  %v2257_v47 = vld [vmem:[%s2892_s2 + $0x2a0] sm:$0xff]  }
  0x23   :  { %2049 = vmatpush3.bf16.msra.mxu0 %v2206_v46  ;;  %1044 = vmatprep.mubr.bf16.mxu0 %v313_v20  ;;  %v2255_v46 = vld [vmem:[%s2892_s2 + $0x220] sm:$0xff]  }
  0x24   :  { %1005 = vmatmul.mubr.bf16.vlgmr.msra.gmra.mrb[0].mxu1 %v310_v48  ;;  %2050 = vmatprep.subr.bf16.mxu0 %v2209_v52  ;;  %v2258_v48 = vld [vmem:[%s2892_s2 + $0x268] sm:$0xff]   ;;  %v2262_v52 = vld [vmem:[%s2892_s2 + $0x270] sm:$0xff]  }
  0x25   :  { %2071 = vmatpush3.bf16.msra.mxu1 %v2208_v49  ;;  %1084 = vmatprep.mubr.bf16.mxu1 %v315_v24  ;;  %v2260_v49 = vld [vmem:[%s2892_s2 + $0x2e8] sm:$0xff]  }
  0x26   :  { %2072 = vmatprep.subr.bf16.mxu1 %v2211_v53  ;;  %v2264_v53 = vld [vmem:[%s2892_s2 + $0x2f0] sm:$0xff]  }
  0x27   :  { %2051 = vmatpush3.bf16.msra.mxu0 %v2210_v54  ;;  %v31_v54 = vld [vmem:[%s2890_s0 + $0x10] sm:$0xff] }
  0x28   :  { %2052 = vmatprep.subr.bf16.mxu0 %v2213_v56  ;;  %v278_v56 = vrot.slane %v31_v54, %v2516_v41 }
  0x29   :  { %2073 = vmatpush3.bf16.msra.mxu1 %v2212_v55  ;;  %v2263_v55 = vld [vmem:[%s2892_s2 + $0x230] sm:$0xff]  }
  0x2a   :  { %2074 = vmatprep.subr.bf16.mxu1 %v2215_v57  ;;  %v271_v57 = vcombine.high %v31_v54, %v31_v54 }
  0x2b   :  { %2053 = vmatpush3.bf16.msra.mxu0 %v2214_v58  ;;  %v2265_v58 = vld [vmem:[%s2892_s2 + $0x2b0] sm:$0xff]  }
  0x2c   :  { %2054 = vmatprep.subr.bf16.mxu0 %v2217_v60  ;;  %v286_v60 = vcombine.high %v278_v56, %v278_v56 }
  0x2d   :  { %2075 = vmatpush3.bf16.msra.mxu1 %v2216_v59  ;;  %v2266_v59 = vld [vmem:[%s2892_s2 + $0x278] sm:$0xff]  }
  0x2e   :  { %2076 = vmatprep.subr.bf16.mxu1 %v2219_v61  ;;  %v285_v61 = vrot.slane %v271_v57, %v2516_v41 }
  0x2f   :  { %2055 = vmatpush3.bf16.msra.mxu0 %v2218_v62  ;;  %v2268_v62 = vld [vmem:[%s2892_s2 + $0x2f8] sm:$0xff]  }
  0x30   :  { %2056 = vmatprep.subr.bf16.mxu0 %v2221_v0  ;;  %v287_v0 = vcombine.high %v285_v61, %v285_v61 }
  0x31   :  { %2077 = vmatpush3.bf16.msra.mxu1 %v2220_v63  ;;  %v317_v63 = vpack.c.bf16 %v286_v60, %v286_v60 }
  0x32   :  { %2078 = vmatprep.subr.bf16.mxu1 %v2223_v1  ;;  %v2267_v1 = vld [vmem:[%s2892_s2 + $0x238] sm:$0xff]  }
  0x33   :  { %2057 = vmatpush3.bf16.msra.mxu0 %v2222_v2  ;;  %v2269_v2 = vld [vmem:[%s2892_s2 + $0x2b8] sm:$0xff]  }
  0x34   :  { %2058 = vmatprep.subr.bf16.mxu0 %v2225_v4  ;;  %v319_v4 = vpack.c.bf16 %v287_v0, %v287_v0 }
  0x35   :  { %2079 = vmatpush3.bf16.msra.mxu1 %v2224_v3  ;;  %v1212_v3 = vld [vmem:[%s2891_s1] sm:$0x3] }
  0x36   :  { %2080 = vmatprep.subr.bf16.mxu1 %v2227_v5  ;;  %v2271_v5 = vld [vmem:[%s2892_s2 + $0x300] sm:$0xff]   ;;  %1214 = vrot.lane.b32.xlu0 %v1212_v3, %s2356_s9 }
  0x37   :  { %2059 = vmatpush3.bf16.msra.mxu0 %v2226_v6  ;;  %v316_v6 = vpack.c.bf16 %v278_v56, %v278_v56 }
  0x38   :  { %2060 = vmatprep.subr.bf16.mxu0 %v2229_v8  ;;  %v2357_v8 = vmov 0.0  }
  0x39   :  { %2081 = vmatpush3.bf16.msra.mxu1 %v2228_v7  ;;  %v318_v7 = vpack.c.bf16 %v285_v61, %v285_v61 }
  0x3a   :  { %2082 = vmatprep.subr.bf16.mxu1 %v2231_v9 }
  0x3b   :  { %2061 = vmatpush3.bf16.msra.mxu0 %v2230_v11 }
  0x3c   :  { %2062 = vmatprep.subr.bf16.mxu0 %v2233_v15 }
  0x3d   :  { %2083 = vmatpush3.bf16.msra.mxu1 %v2232_v14 }
  0x3e   :  { %2084 = vmatprep.subr.bf16.mxu1 %v2235_v18 }
  0x3f   :  { %2063 = vmatpush3.bf16.msra.mxu0 %v2234_v19 }
  0x40   :  { %2092 = vmatprep.subr.bf16.mxu0 %v2237_v23 }
  0x41   :  { %2085 = vmatpush3.bf16.msra.mxu1 %v2236_v22 }
  0x42   :  { %2114 = vmatprep.subr.bf16.mxu1 %v2240_v25  ;;  %1045 = vmatmul.mubr.bf16.vlgmr.msra.gmra.mrb[4].mxu0 %v312_v27 }
  0x43   :  { %2093 = vmatpush3.bf16.msra.mxu0 %v2239_v26  ;;  %1124 = vmatprep.mubr.bf16.mxu0 %v317_v63 }
  0x44   :  { %1085 = vmatmul.mubr.bf16.vlgmr.msra.gmra.mrb[4].mxu1 %v314_v28  ;;  %2094 = vmatprep.subr.bf16.mxu0 %v2242_v30 }
  0x45   :  { %2115 = vmatpush3.bf16.msra.mxu1 %v2241_v29  ;;  %1164 = vmatprep.mubr.bf16.mxu1 %v319_v4 }
  0x46   :  { %2116 = vmatprep.subr.bf16.mxu1 %v2244_v31 }
  0x47   :  { %2095 = vmatpush3.bf16.msra.mxu0 %v2243_v33 }
  0x48   :  { %2096 = vmatprep.subr.bf16.mxu0 %v2246_v35 }
  0x49   :  { %2117 = vmatpush3.bf16.msra.mxu1 %v2245_v34 }
  0x4a   :  { %2118 = vmatprep.subr.bf16.mxu1 %v2248_v36 }
  0x4b   :  { %2097 = vmatpush3.bf16.msra.mxu0 %v2247_v37 }
  0x4c   :  { %2098 = vmatprep.subr.bf16.mxu0 %v2250_v39 }
  0x4d   :  { %2119 = vmatpush3.bf16.msra.mxu1 %v2249_v38 }
  0x4e   :  { %2120 = vmatprep.subr.bf16.mxu1 %v2252_v40 }
  0x4f   :  { %2099 = vmatpush3.bf16.msra.mxu0 %v2251_v42 }
  0x50   :  { %2100 = vmatprep.subr.bf16.mxu0 %v2254_v44 }
  0x51   :  { %2121 = vmatpush3.bf16.msra.mxu1 %v2253_v43 }
  0x52   :  { %2122 = vmatprep.subr.bf16.mxu1 %v2256_v45 }
  0x53   :  { %2101 = vmatpush3.bf16.msra.mxu0 %v2255_v46 }
  0x54   :  { %2102 = vmatprep.subr.bf16.mxu0 %v2258_v48 }
  0x55   :  { %2123 = vmatpush3.bf16.msra.mxu1 %v2257_v47 }
  0x56   :  { %2124 = vmatprep.subr.bf16.mxu1 %v2260_v49 }
  0x57   :  { %2103 = vmatpush3.bf16.msra.mxu0 %v2259_v50 }
  0x58   :  { %2104 = vmatprep.subr.bf16.mxu0 %v2262_v52 }
  0x59   :  { %2125 = vmatpush3.bf16.msra.mxu1 %v2261_v51 }
  0x5a   :  { %2126 = vmatprep.subr.bf16.mxu1 %v2264_v53 }
  0x5b   :  { %2105 = vmatpush3.bf16.msra.mxu0 %v2263_v55 }
  0x5c   :  { %2106 = vmatprep.subr.bf16.mxu0 %v2266_v59 }
  0x5d   :  { %2127 = vmatpush3.bf16.msra.mxu1 %v2265_v58 }
  0x5e   :  { %2128 = vmatprep.subr.bf16.mxu1 %v2268_v62 }
  0x5f   :  { %2107 = vmatpush3.bf16.msra.mxu0 %v2267_v1 }
  0x60   :  { %2144 = vmatprep.subr.bf16.mxu0 %v2357_v8 }
  0x61   :  { %2129 = vmatpush3.bf16.msra.mxu1 %v2269_v2 }
  0x62   :  { %15 = vsyncpa [#allocation5], 0  ;;  %1125 = vmatmul.mubr.bf16.vlgmr.msra.gmra.mrb[8].mxu0 %v316_v6  ;;  %v2272_v9 = vld [vmem:[%s2892_s2 + $0x308] sm:$0xff]   ;;  %vm2358_vm0 = vmmov 0   ;;  %v2273_v10 = vld [vmem:[%s2892_s2 + $0x310] sm:$0xff]   ;;  %vm928_vm1 = vcmask 523264  }
  0x63   :  { %2145 = vmatpush3.bf16.msra.mxu0 %v2271_v5  ;;  %2152 = vmatprep.mubr.msk.bf16.mxu0 %vm2358_vm0, %v2357_v8  ;;  %v2274_v11 = vld [vmem:[%s2892_s2 + $0x318] sm:$0xff]   ;;  %v2275_v14 = vld [vmem:[%s2894_s4] ss:$52 sps:$4 sm:$0xff]   ;;  %v2278_v16 = vld [vmem:[%s2894_s4 + $0x10] ss:$52 sps:$4 sm:$0xff]   ;;  %vm1417_vm2 = vcmask 1041408  }
  0x64   :  { %1165 = vmatmul.mubr.bf16.vlgmr.msra.gmra.mrb[8].mxu1 %v318_v7  ;;  %2146 = vmatprep.subr.bf16.mxu0 %v2357_v8  ;;  %v1862_v12 = vld.sshfl [vmem:[%s2890_s0 + $0x18] sm:$0x3 pattern:$0x76325410]  ;;  %v2280_v17 = vld [vmem:[%s2894_s4 + $0x14] ss:$52 sps:$4 sm:$0xff]  }
  0x65   :  { %v320_v13 = vpack.c.bf16 %v1862_v12, %v1862_v12  ;;  %v2277_v15 = vld [vmem:[%s2894_s4 + $0x4] ss:$52 sps:$4 sm:$0xff]   ;;  %v1863_v20 = vld [vmem:[%s2893_s3] ss:$0 sm:$0xff]  ;;  %v1237_v56 = vld [vmem:[%s2894_s4 + $0x68] sm:$0x33] }
  0x66   :  { %1457 = vmatprep.subr.bf16.mxu1 %v2277_v15  ;;  %v1239_v57 = vld [vmem:[%s2894_s4 + $0x78] sm:$0x33]  ;;  %v1979_v59 = vcombine.high %v1237_v56, %v1237_v56  ;;  %v1978_v60 = vcombine.low %v1237_v56, %v1237_v56  ;;  %v2287_v1 = vld [vmem:[%s2894_s4 + $0xc] ss:$52 sps:$4 sm:$0xff]   ;;  %v2359_v2 = vmov 0   ;;  %vm1743_vm3 = vcmask 156672  }
  0x67   :  { %2147 = vmatpush3.bf16.msra.mxu0 %v2272_v9  ;;  %1458 = vmatpush1.bf16.msra.mxu1 %v2275_v14  ;;  %v1983_v61 = vcombine.high %v1239_v57, %v1239_v57  ;;  %v1982_v62 = vcombine.low %v1239_v57, %v1239_v57  ;;  %v2290_v3 = vld [vmem:[%s2894_s4 + $0x24] ss:$52 sps:$4 sm:$0xff]   ;;  %s2360_s1 = smov 108   ;;  %v1241_v15 = vld [vmem:[%s2894_s4 + $0x88] sm:$0x33]  ;;  %vm1413_vm4 = vcmask 162816  }
  0x68   :  { %2148 = vmatprep.subr.bf16.mxu0 %v2357_v8  ;;  %1991 = vmatprep.subr.msk.bf16.mxu1 %vm1417_vm2, %v1979_v59  ;;  %v1419_v63 = vsel %vm1417_vm2, %v1978_v60, 0  ;;  %s2361_s9 = smov [#allocation2]  }
  0x69   :  { %v1431_v0 = vsel %vm1417_vm2, %v1982_v62, 0  ;;  %1489 = vmatprep.mubr.bf16.mxu1 %v2359_v2 }
  0x6b   :  { %2149 = vmatpush3.bf16.msra.mxu0 %v2273_v10  ;;  %1460 = vmatpush1.bf16.msra.mxu1 %v1419_v63 }
  0x6c   :  { %2150 = vmatprep.subr.bf16.mxu0 %v2357_v8  ;;  %1498 = vmatprep.subr.bf16.mxu1 %v2287_v1 }
  0x6f   :  { %2151 = vmatpush3.bf16.msra.mxu0 %v2274_v11 }
  0x70   :  { %1539 = vmatprep.subr.bf16.mxu0 %v2280_v17  ;;  %v2285_v17 = vld [vmem:[%s2894_s4 + $0x8] ss:$52 sps:$4 sm:$0xff]  }
  0x72   :  { %2153 = vmatmul.mubr.msk.bf16.vlgmr.msra.gmra.mrb[12].mxu0 %vm928_vm1, %v320_v13  ;;  %v1238_v13 = vld [vmem:[%s2894_s4 + $0x70] sm:$0x33] }
  0x73   :  { %1540 = vmatpush1.bf16.msra.mxu0 %v2278_v16  ;;  %1571 = vmatprep.mubr.bf16.mxu0 %v2359_v2 }
  0x74   :  { %1995 = vmatprep.subr.msk.bf16.mxu0 %vm1417_vm2, %v1983_v61 }
  0x77   :  { %1542 = vmatpush1.bf16.msra.mxu0 %v1431_v0 }
  0x78   :  { %1621 = vmatprep.subr.bf16.mxu0 %v2290_v3 }
  0xa8   :  { %v1215_v5 = vpop.permute.xlu0 %1214 }
  0xf5   :  { %v2020_v18 = vpop.f32.mrb[0].mxu0 }
  0xf6   :  { %v2021_v21 = vpop.f32.mrb[1].mxu0 }
  0xf7   :  { %v2042_v19 = vpop.f32.mrb[0].mxu1  ;;  %v2022_v23 = vadd.f32 %v2021_v21, %v2020_v18  ;;  %v2023_v24 = vpop.f32.mrb[2].mxu0  ;;  %v2288_v18 = vld [vmem:[%s2894_s4 + $0x20] ss:$52 sps:$4 sm:$0xff]   ;;  %v1980_v21 = vcombine.low %v1238_v13, %v1238_v13 }
  0xf8   :  { %v2043_v22 = vpop.f32.mrb[1].mxu1  ;;  %v2024_v27 = vpop.f32.mrb[3].mxu0 }
  0xf9   :  { %v2044_v25 = vadd.f32 %v2043_v22, %v2042_v19  ;;  %v2045_v26 = vpop.f32.mrb[2].mxu1  ;;  %v967_v29 = vadd.f32 %v2022_v23, %v1863_v20  ;;  %v1981_v19 = vcombine.high %v1238_v13, %v1238_v13  ;;  %v1987_v22 = vcombine.high %v1241_v15, %v1241_v15  ;;  %v1240_v27 = vld [vmem:[%s2894_s4 + $0x80] sm:$0x33] }
  0xfa   :  { %v2046_v28 = vpop.f32.mrb[3].mxu1  ;;  %v1986_v23 = vcombine.low %v1241_v15, %v1241_v15  ;;  %v1425_v24 = vsel %vm1417_vm2, %v1980_v21, 0  ;;  %v2297_v26 = vld [vmem:[%s2894_s4 + $0x1c] ss:$52 sps:$4 sm:$0xff]  }
  0xfb   :  { %v1007_v30 = vadd.f32 %v2044_v25, %v967_v29  ;;  %v2295_v28 = vld [vmem:[%s2894_s4 + $0x18] ss:$52 sps:$4 sm:$0xff]   ;;  %v2298_v29 = vld [vmem:[%s2894_s4 + $0x30] ss:$52 sps:$4 sm:$0xff]  }
  0xfc   :  { %v1443_v25 = vsel %vm1417_vm2, %v1986_v23, 0 }
 0x115   :  { %v2064_v31 = vpop.f32.mrb[4].mxu0 }
 0x116   :  { %v2065_v34 = vpop.f32.mrb[5].mxu0 }
 0x117   :  { %v2086_v33 = vpop.f32.mrb[4].mxu1  ;;  %v2066_v36 = vadd.f32 %v2065_v34, %v2064_v31  ;;  %v2067_v37 = vpop.f32.mrb[6].mxu0  ;;  %v1984_v31 = vcombine.low %v1240_v27, %v1240_v27 }
 0x118   :  { %v2087_v35 = vpop.f32.mrb[5].mxu1  ;;  %v2068_v40 = vpop.f32.mrb[7].mxu0  ;;  %v1242_v37 = vld [vmem:[%s2894_s4 + $0x90] sm:$0x33] }
 0x119   :  { %v2088_v38 = vadd.f32 %v2087_v35, %v2086_v33  ;;  %v2089_v39 = vpop.f32.mrb[6].mxu1  ;;  %v1047_v43 = vadd.f32 %v2066_v36, %v1007_v30  ;;  %v1985_v30 = vcombine.high %v1240_v27, %v1240_v27  ;;  %v2301_v33 = vld [vmem:[%s2894_s4 + $0x98] ss:$0 sps:$4 sm:$0x33]   ;;  %v1437_v34 = vsel %vm1417_vm2, %v1984_v31, 0 }
 0x11a   :  { %v2090_v42 = vpop.f32.mrb[7].mxu1  ;;  %v1455_v35 = vsel %vm1417_vm2, %v2301_v33, 0  ;;  %v2304_v36 = vld [vmem:[%s2894_s4 + $0x2c] ss:$52 sps:$4 sm:$0xff]   ;;  %v1989_v39 = vcombine.high %v1242_v37, %v1242_v37  ;;  %v1988_v40 = vcombine.low %v1242_v37, %v1242_v37 }
 0x11b   :  { %v1087_v44 = vadd.f32 %v2088_v38, %v1047_v43  ;;  %v2302_v38 = vld [vmem:[%s2894_s4 + $0x28] ss:$52 sps:$4 sm:$0xff]   ;;  %s2362_s4 = smov [#allocation4]  }
 0x11c   :  { %s1846_s10 = sshll.u32 %s2362_s4, 4  ;;  %s1847_s10 = int_to_ptr.vmem [resolvable:$true] %s1846_s10 }
 0x135   :  { %v2108_v45 = vpop.f32.mrb[8].mxu0 }
 0x136   :  { %v2109_v47 = vpop.f32.mrb[9].mxu0 }
 0x137   :  { %v2130_v46 = vpop.f32.mrb[8].mxu1  ;;  %v2110_v49 = vadd.f32 %v2109_v47, %v2108_v45  ;;  %v2111_v50 = vpop.f32.mrb[10].mxu0 }
 0x138   :  { %v2131_v48 = vpop.f32.mrb[9].mxu1  ;;  %v2112_v53 = vpop.f32.mrb[11].mxu0 }
 0x139   :  { %v2132_v51 = vadd.f32 %v2131_v48, %v2130_v46  ;;  %v2133_v52 = vpop.f32.mrb[10].mxu1  ;;  %v1127_v55 = vadd.f32 %v2110_v49, %v1087_v44 }
 0x13a   :  { %v2134_v54 = vpop.f32.mrb[11].mxu1 }
 0x13b   :  { %v1167_v58 = vadd.f32 %v2132_v51, %v1127_v55 }
 0x145   :  { %v1206_v4 = vpop.f32.mrb[12].mxu0 }
 0x146   :  { %v1207_v6 = vadd.f32 %v1206_v4, %v1167_v58  ;;  %v2154_v7 = vpop.f32.mrb[13].mxu0 }
 0x147   :  { %v1209_v9 = vpop.f32.mrb[14].mxu0 }
 0x148   :  { %v1217_v10 = vmul.f32 %v1215_v5, %v1207_v6  ;;  %v2155_v11 = vpop.f32.mrb[15].mxu0  ;;  %1746 = vrot.lane.b32.xlu1 %v1207_v6, %s2360_s1  ;;  %1744 = vst.msk [vmem:[#allocation2] sm:$0x3] %vm1743_vm3, %v1207_v6 }
 0x14a   :  { %1219 = vrot.lane.b32.xlu0 %v1217_v10, %s2360_s1  ;;  %s1836_s1 = sshll.u32 %s2361_s9, 4  ;;  %s1837_s1 = int_to_ptr.vmem [resolvable:$true] %s1836_s1 }
 0x14b   :  { %s2307_s11 = scalar_lea.vmem %s1837_s1, 32  ;;  %p2312_p1 = scmp.lt.s32.totalorder %s1837_s1, %s1837_s1 }
 0x14c   :  { %p2308_p0 = scmp.ne.s32.totalorder %s1837_s1, %s2307_s11  ;;  %p2313_p2 = scmp.lt.s32.totalorder %s2307_s11, %s2307_s11 }
 0x14e   :  { %p2314_p3 = por %p2313_p2, %p2312_p1 }
 0x150   :  { %p2315_p4 = pnand %p2314_p3, %p2308_p0 }
 0x1ba   :  { %v1747_v12 = vpop.permute.xlu1 %1746 }
 0x1bb   :  { %1749 = vst.msk [vmem:[#allocation4] sm:$0x3] %vm1743_vm3, %v1747_v12 }
 0x1bc   :  { %v1220_v14 = vpop.permute.xlu0 %1219 }
 0x1bd   :  { %v1222_v16 = vadd.f32 %v1220_v14, %v1207_v6 }
 0x1bf   :  { %v1244_v20 = vpack.c.bf16 %v1222_v16, %v1222_v16 }
 0x1c1   :  { %1992 = vmatmul.mubr.msk.bf16.vlgmr.msra.gmra.mrb[12].mxu1 %vm1413_vm4, %v1244_v20  ;;  %1996 = vmatmul.mubr.msk.bf16.vlgmr.msra.gmra.mrb[16].mxu0 %vm1413_vm4, %v1244_v20 }
 0x1c2   :  { %1499 = vmatpush1.bf16.msra.mxu1 %v2285_v17  ;;  %1622 = vmatpush1.bf16.msra.mxu0 %v2288_v18 }
 0x1c3   :  { %1993 = vmatprep.subr.msk.bf16.mxu1 %vm1417_vm2, %v1981_v19  ;;  %1999 = vmatprep.subr.msk.bf16.mxu0 %vm1417_vm2, %v1987_v22 }
 0x1c4   :  { %1530 = vmatprep.mubr.bf16.mxu1 %v2359_v2  ;;  %1653 = vmatprep.mubr.bf16.mxu0 %v2359_v2 }
 0x1c6   :  { %1501 = vmatpush1.bf16.msra.mxu1 %v1425_v24  ;;  %1624 = vmatpush1.bf16.msra.mxu0 %v1443_v25 }
 0x1c7   :  { %1580 = vmatprep.subr.bf16.mxu1 %v2297_v26  ;;  %2156 = vmatprep.subr.bf16.mxu0 %v2357_v8 }
 0x1c9   :  { %1994 = vmatmul.mubr.msk.bf16.vlgmr.msra.gmra.mrb[16].mxu1 %vm1413_vm4, %v1244_v20  ;;  %2000 = vmatmul.mubr.msk.bf16.vlgmr.msra.gmra.mrb[20].mxu0 %vm1413_vm4, %v1244_v20 }
 0x1ca   :  { %1581 = vmatpush1.bf16.msra.mxu1 %v2295_v28  ;;  %2157 = vmatpush3.bf16.msra.mxu0 %v2298_v29 }
 0x1cb   :  { %1997 = vmatprep.subr.msk.bf16.mxu1 %vm1417_vm2, %v1985_v30  ;;  %2158 = vmatprep.subr.bf16.mxu0 %v2357_v8 }
 0x1cc   :  { %1612 = vmatprep.mubr.bf16.mxu1 %v2359_v2  ;;  %2160 = vmatprep.mubr.msk.bf16.mxu0 %vm2358_vm0, %v2357_v8  ;;  %v1449_v8 = vsel %vm1417_vm2, %v1988_v40, 0 }
 0x1ce   :  { %1583 = vmatpush1.bf16.msra.mxu1 %v1437_v34  ;;  %2159 = vmatpush3.bf16.msra.mxu0 %v1455_v35 }
 0x1cf   :  { %1662 = vmatprep.subr.bf16.mxu1 %v2304_v36 }
 0x1d1   :  { %1998 = vmatmul.mubr.msk.bf16.vlgmr.msra.gmra.mrb[20].mxu1 %vm1413_vm4, %v1244_v20  ;;  %2161 = vmatmul.mubr.msk.bf16.vlgmr.msra.gmra.mrb[24].mxu0 %vm1413_vm4, %v1244_v20 }
 0x1d2   :  { %1663 = vmatpush1.bf16.msra.mxu1 %v2302_v38  ;;  %1694 = vmatprep.mubr.bf16.mxu1 %v2359_v2 }
 0x1d3   :  { %2001 = vmatprep.subr.msk.bf16.mxu1 %vm1417_vm2, %v1989_v39 }
 0x1d6   :  { %1665 = vmatpush1.bf16.msra.mxu1 %v1449_v8 }
 0x1d9   :  { %2002 = vmatmul.mubr.msk.bf16.vlgmr.msra.gmra.mrb[24].mxu1 %vm1413_vm4, %v1244_v20 }
 0x1da   :  { %2318 = shalt.err (!%p2315_p4)
}
 0x1db   :  { %s2319_s14 = scalar_lea.hbm %s2896_s6, 32 }
 0x1dc   :  { %p2320_p5 = scmp.ne.s32.totalorder %s2896_s6, %s2319_s14  ;;  %p2323_p6 = scmp.lt.u32.totalorder %s2319_s14, %s2896_s6 }
 0x1de   :  { %p2325_p7 = pnand %p2323_p6, %p2320_p5 }
 0x1e0   :  { %2328 = shalt.err (!%p2325_p7)
}
 0x1e1   :  { %1839 = dma.vmem_to_hbm [thread:$0]  %s1837_s1, 32, %s2896_s6, [#allocation3]  }
 0x1e2   :  { %s2329_s21 = scalar_lea.vmem %s1847_s10, 32  ;;  %p2334_p9 = scmp.lt.s32.totalorder %s1847_s10, %s1847_s10 }
 0x1e3   :  { %p2330_p8 = scmp.ne.s32.totalorder %s1847_s10, %s2329_s21  ;;  %p2335_p10 = scmp.lt.s32.totalorder %s2329_s21, %s2329_s21 }
 0x1e5   :  { %p2336_p11 = por %p2335_p10, %p2334_p9 }
 0x1e7   :  { %p2337_p12 = pnand %p2336_p11, %p2330_p8 }
 0x1e9   :  { %2340 = shalt.err (!%p2337_p12)
}
 0x1ea   :  { %s2341_s0 = scalar_lea.hbm %s2897_s7, 32 }
 0x1eb   :  { %p2342_p13 = scmp.ne.s32.totalorder %s2897_s7, %s2341_s0  ;;  %p2345_p0 = scmp.lt.u32.totalorder %s2341_s0, %s2897_s7 }
 0x1ed   :  { %p2347_p1 = pnand %p2345_p0, %p2342_p13 }
 0x1ef   :  { %2350 = shalt.err (!%p2347_p1)
}
 0x1f0   :  { %1849 = dma.vmem_to_hbm [thread:$0]  %s1847_s10, 32, %s2897_s7, [#allocation5]   ;;  %v1251_v42 = vsub.s32 0, %v2501_v32  ;;  %v1267_v43 = vsub.s32 4, %v2501_v32  ;;  %v1245_v44 = vld [vmem:[%s2895_s5] sm:$0xff]  ;;  %v1255_v45 = vsub.s32 1, %v2501_v32 }
 0x1f1   :  { %v1271_v46 = vsub.s32 5, %v2501_v32  ;;  %v1259_v57 = vsub.s32 2, %v2501_v32  ;;  %v1246_v62 = vld [vmem:[%s2895_s5 + $0x8] sm:$0x1f]  ;;  %v1263_v63 = vsub.s32 3, %v2501_v32  ;;  %v1275_v15 = vsub.s32 6, %v2501_v32 }
 0x1f2   :  { %v1252_v47 = vrot.slane %v1245_v44, %v1251_v42  ;;  %v1268_v48 = vrot.slane %v1245_v44, %v1267_v43  ;;  %v1256_v49 = vrot.slane %v1245_v44, %v1255_v45  ;;  %v1284_v5 = vrot.slane %v1246_v62, %v1251_v42 }
 0x1f3   :  { %v1272_v50 = vrot.slane %v1245_v44, %v1271_v46  ;;  %v1260_v4 = vrot.slane %v1245_v44, %v1259_v57  ;;  %v1264_v6 = vrot.slane %v1245_v44, %v1263_v63  ;;  %v1288_v7 = vrot.slane %v1246_v62, %v1255_v45 }
 0x1f4   :  { %v1279_v20 = vsub.s32 7, %v2501_v32  ;;  %v1276_v25 = vrot.slane %v1245_v44, %v1275_v15  ;;  %v1300_v26 = vrot.slane %v1246_v62, %v1267_v43  ;;  %vm1828_vm5 = vcmask 517120  }
 0x1f6   :  { %v1280_v29 = vrot.slane %v1245_v44, %v1279_v20  ;;  %v1292_v44 = vrot.slane %v1246_v62, %v1259_v57 }
 0x294   :  { %v1491_v51 = vpop.f32.mrb[12].mxu1  ;;  %v1573_v52 = vpop.f32.mrb[16].mxu0 }
 0x295   :  { %v1492_v53 = vadd.f32 %v1491_v51, %v1252_v47  ;;  %v1574_v54 = vadd.f32 %v1573_v52, %v1268_v48  ;;  %v1493_v55 = vpop.f32.mrb[13].mxu1  ;;  %v1575_v56 = vpop.f32.mrb[17].mxu0  ;;  %v1296_v47 = vrot.slane %v1246_v62, %v1263_v63 }
 0x296   :  { %v1494_v58 = vadd.f32 %v1493_v55, %v1256_v49  ;;  %v1576_v59 = vadd.f32 %v1575_v56, %v1272_v50  ;;  %v1495_v60 = vpop.f32.mrb[14].mxu1  ;;  %v1577_v61 = vpop.f32.mrb[18].mxu0 }
 0x297   :  { %v1496_v0 = vpop.f32.mrb[15].mxu1  ;;  %v1578_v1 = vpop.f32.mrb[19].mxu0 }
 0x298   :  { %v1763_v2 = vcombine.low %v1492_v53, %v1494_v58  ;;  %v1780_v3 = vcombine.low %v1574_v54, %v1576_v59 }
 0x29a   :  { %v1771_v27 = vrot.slane %v1763_v2, %v2516_v41  ;;  %v1788_v45 = vrot.slane %v1780_v3, %v2516_v41 }
 0x29c   :  { %v1532_v9 = vpop.f32.mrb[16].mxu1  ;;  %v1655_v10 = vpop.f32.mrb[20].mxu0 }
 0x29d   :  { %v1533_v11 = vadd.f32 %v1532_v9, %v1260_v4  ;;  %v1656_v12 = vadd.f32 %v1655_v10, %v1284_v5  ;;  %v1534_v13 = vpop.f32.mrb[17].mxu1  ;;  %v1657_v14 = vpop.f32.mrb[21].mxu0 }
 0x29e   :  { %v1535_v16 = vadd.f32 %v1534_v13, %v1264_v6  ;;  %v1658_v17 = vadd.f32 %v1657_v14, %v1288_v7  ;;  %v1536_v18 = vpop.f32.mrb[18].mxu1  ;;  %v1659_v19 = vpop.f32.mrb[22].mxu0 }
 0x29f   :  { %v1537_v21 = vpop.f32.mrb[19].mxu1  ;;  %v1660_v22 = vpop.f32.mrb[23].mxu0 }
 0x2a0   :  { %v1764_v23 = vcombine.low %v1533_v11, %v1535_v16  ;;  %v1797_v24 = vcombine.low %v1656_v12, %v1658_v17 }
 0x2a2   :  { %v1778_v28 = vrot.slane %v1764_v23, %v2516_v41  ;;  %v1805_v56 = vrot.slane %v1797_v24, %v2516_v41 }
 0x2a4   :  { %v1779_v30 = vcombine.low %v1771_v27, %v1778_v28  ;;  %v1614_v31 = vpop.f32.mrb[20].mxu1  ;;  %v1737_v33 = vpop.f32.mrb[24].mxu0 }
 0x2a5   :  { %v1615_v34 = vadd.f32 %v1614_v31, %v1276_v25  ;;  %v1738_v35 = vadd.f32 %v1737_v33, %v1300_v26  ;;  %v1616_v36 = vpop.f32.mrb[21].mxu1  ;;  %v2162_v37 = vpop.f32.mrb[25].mxu0 }
 0x2a6   :  { %1825 = vst [vmem:[%s2898_s8] sm:$0xff] %v1779_v30  ;;  %v1617_v32 = vadd.f32 %v1616_v36, %v1280_v29  ;;  %v1618_v38 = vpop.f32.mrb[22].mxu1  ;;  %v1740_v39 = vpop.f32.mrb[26].mxu0 }
 0x2a7   :  { %v1820_v40 = vrot.slane %v1738_v35, %v2516_v41  ;;  %v1619_v8 = vpop.f32.mrb[23].mxu1  ;;  %v2163_v42 = vpop.f32.mrb[27].mxu0 }
 0x2a8   :  { %v1781_v43 = vcombine.low %v1615_v34, %v1617_v32 }
 0x2a9   :  { %1829 = vst.msk [vmem:[%s2898_s8 + $0x18] sm:$0x3] %vm1828_vm5, %v1820_v40 }
 0x2aa   :  { %v1795_v46 = vrot.slane %v1781_v43, %v2516_v41 }
 0x2ac   :  { %v1796_v48 = vcombine.low %v1788_v45, %v1795_v46  ;;  %v1696_v49 = vpop.f32.mrb[24].mxu1 }
 0x2ad   :  { %v1697_v50 = vadd.f32 %v1696_v49, %v1292_v44  ;;  %v1698_v51 = vpop.f32.mrb[25].mxu1 }
 0x2ae   :  { %1826 = vst [vmem:[%s2898_s8 + $0x8] sm:$0xff] %v1796_v48  ;;  %v1699_v52 = vadd.f32 %v1698_v51, %v1296_v47  ;;  %v1700_v53 = vpop.f32.mrb[26].mxu1 }
 0x2af   :  { %v1701_v54 = vpop.f32.mrb[27].mxu1 }
 0x2b0   :  { %v1798_v55 = vcombine.low %v1697_v50, %v1699_v52 }
 0x2b2   :  { %v1812_v57 = vrot.slane %v1798_v55, %v2516_v41 }
 0x2b4   :  { %v1813_v58 = vcombine.low %v1805_v56, %v1812_v57 }
 0x2b6   :  { %1827 = vst [vmem:[%s2898_s8 + $0x10] sm:$0xff] %v1813_v58 }
 0x2b7   :  { %2351 = dma.done.wait [#allocation3], 32  }
 0x2b8   :  { %2352 = vsyncadd [#allocation3], 4294967264 }
 0x2b9   :  { %2353 = dma.done.wait [#allocation5], 32  }
 0x2ba   :  { %2354 = vsyncadd [#allocation5], 4294967264 }
 0x2bb   :  { %1860 = vsyncpa [#allocation3], 1 }
 0x2bc   :  { %1861 = vsyncpa [#allocation5], 1 }

// kernel: vae_forward.5
= control target key start
LH: loop header
LB: loop body
LE: loop exit
PB: predicated region body
PF: predicated region fallthrough
CT: control target
= control target key end

     0   :  { %s2052_s24 = smov 0   ;;  %s2385_s0 = inlined_call_operand.vmem [shape: f32[2,64,25], index: 0, kind: input, shape index: {}]   ;;  %s2386_s1 = inlined_call_operand.vmem [shape: bf16[3,32,64], index: 1, kind: input, shape index: {}]   ;;  %s2387_s2 = inlined_call_operand.vmem [shape: f32[32,1], index: 2, kind: input, shape index: {}]   ;;  %s2388_s3 = inlined_call_operand.vmem [shape: bf16[3,16,32], index: 3, kind: input, shape index: {}]   ;;  %s2389_s4 = inlined_call_operand.vmem [shape: f32[16,1], index: 4, kind: input, shape index: {}]   ;;  %s2390_s5 = inlined_call_operand.vmem [shape: bf16[3,2,16], index: 5, kind: input, shape index: {}]   ;;  %s2391_s6 = inlined_call_operand.vmem [shape: f32[2,1], index: 6, kind: input, shape index: {}]   ;;  %s2392_s7 = inlined_call_operand.vmem [shape: f32[2,8,2,25], index: 7, kind: output, shape index: {}]  }
   0x1 LB: > { %s1634_s25 = sadd.s32 4294967295, %s2005_s24   ;;  %p1638_p0 = scmp.ge.s32.totalorder %s2005_s24, 1  ;;  %s2005_s24 = sphi %s2052_s24, %s17_s24  }
   0x2   : > { %p237_p1 = scmp.lt.s32.totalorder %s2005_s24, 3 }
   0x4   : > { %p238_p2 = pnand %p1638_p0, %p237_p1 }
   0x5   : > { %v416_v0 = vlaneseq (!%p238_p2)  ;;  %p269_p3 = scmp.lt.s32.totalorder (!%p238_p2), %s1634_s25, 1  ;;  %vm447_vm0 = vcmask (!%p238_p2), 1043456   ;;  %v1990_v1 = vld [vmem:[%s2386_s1 + $0x10] sm:$0xff] (!%p238_p2)   ;;  %vm356_vm1 = vcmask (!%p238_p2), 523264   ;;  %vm448_vm2 = vcmask (!%p238_p2), 1044480   ;;  %v315_v10 = vld [vmem:[%s2387_s2] sm:$0xff] (!%p238_p2) }
   0x6   : > { %241 = sbr.rel (%p238_p2) target bundleno = 1199 (0x4af), region = 48  ;;  %1795 = vmatprep.mubr.msk.bf16.mxu0 (!%p238_p2), %vm356_vm1, %v1990_v1  ;;  %v2007_v4 = vmov (!%p238_p2), 65535   ;;  %vm434_vm3 = vcmask (!%p238_p2), 203776   ;;  %v317_v11 = vld [vmem:[%s2387_s2 + $0x10] sm:$0xff] (!%p238_p2)  ;;  %v2008_v15 = vmov (!%p238_p2), 0   ;;  %v2009_v18 = vmov (!%p238_p2), 0.0  }
   0x7   : > { %v417_v2 = vshrl.u32 (!%p238_p2), %v416_v0, 7  ;;  %v422_v3 = vand.u32 (!%p238_p2), 127, %v416_v0  ;;  %v449_v5 = vsel (!%p238_p2), %vm447_vm0, 4294967295, %v2007_v4  ;;  %1988 = vset.pattern.permute.xlu0 (!%p238_p2), %v2008_v15  ;;  %1989 = vset.pattern.permute.xlu1 (!%p238_p2), %v2008_v15  ;;  %v2010_v23 = vmov (!%p238_p2), 1.0|1.0   ;;  %v316_v28 = vld [vmem:[%s2387_s2 + $0x8] sm:$0xff] (!%p238_p2) }
   0x8   : > { %v450_v21 = vsel (!%p238_p2), %vm448_vm2, %v449_v5, 0  ;;  %328 = vperm.xlu0 (!%p238_p2), %1988, %v315_v10   ;;  %338 = vperm.xlu1 (!%p238_p2), %1989, %v317_v11   ;;  %v318_v29 = vld [vmem:[%s2387_s2 + $0x18] sm:$0xff] (!%p238_p2)  ;;  %v319_v33 = vld [vmem:[%s2389_s4] sm:$0xff] (!%p238_p2)  ;;  %v320_v35 = vld [vmem:[%s2389_s4 + $0x8] sm:$0xff] (!%p238_p2)  ;;  %vm2011_vm9 = vmmov (!%p238_p2), 0   ;;  %vm678_vm10 = vcmask (!%p238_p2), 261120  }
   0x9   : > { %v418_v6 = vadd.s32 (!%p238_p2), 8, %v417_v2  ;;  %v423_v7 = vadd.s32 (!%p238_p2), 1, %v422_v3  ;;  %v419_v8 = vadd.s32 (!%p238_p2), 16, %v417_v2  ;;  %v420_v9 = vadd.s32 (!%p238_p2), 24, %v417_v2  ;;  %v321_v37 = vld [vmem:[%s2391_s6] sm:$0x3] (!%p238_p2) }
   0xa   : > { %v1991_v38 = vld [vmem:[%s2386_s1 + $0x18] sm:$0xff] (!%p238_p2)   ;;  %v1992_v39 = vld [vmem:[%s2386_s1] sm:$0xff] (!%p238_p2)   ;;  %vm1021_vm11 = vcmask (!%p238_p2), 130048   ;;  %vm1065_vm12 = vcmask (!%p238_p2), 197632  }
   0xb   : > { %vm424_vm4 = vcmp.eq.s32.totalorder (!%p238_p2), %v423_v7, %v417_v2  ;;  %vm425_vm5 = vcmp.eq.s32.totalorder (!%p238_p2), %v423_v7, %v418_v6  ;;  %vm426_vm6 = vcmp.eq.s32.totalorder (!%p238_p2), %v423_v7, %v419_v8  ;;  %vm427_vm7 = vcmp.eq.s32.totalorder (!%p238_p2), %v423_v7, %v420_v9  ;;  %v1993_v6 = vld [vmem:[%s2386_s1 + $0x8] sm:$0xff] (!%p238_p2)   ;;  %v1995_v7 = vld [vmem:[%s2386_s1 + $0x20] sm:$0xff] (!%p238_p2)  }
   0xc   : > { %vm2081_vm8 = vmpackc.low (!%p238_p2), %vm425_vm5, %vm424_vm4  ;;  %v430_v19 = vsel (!%p238_p2), %vm426_vm6, 1.0, %v2009_v18  ;;  %v431_v20 = vsel (!%p238_p2), %vm427_vm7, 1.0, %v2009_v18  ;;  %333 = vperm.xlu0 (!%p238_p2), %1988, %v316_v28   ;;  %343 = vperm.xlu1 (!%p238_p2), %1989, %v318_v29   ;;  %v2182_v8 = vld [vmem:[%s2388_s3 + $0x8] sm:$0xff] (!%p238_p2)  }
   0xd   : > { %s2396_s25 = smov (!%p269_p3, %s1634_s25), 1  ;;  %1799 = vmatprep.subr.msk.bf16.mxu1 %vm2081_vm8, %v2010_v23  ;;  %v433_v24 = vpack.c.bf16 %v431_v20, %v430_v19  ;;  %v1996_v9 = vld [vmem:[%s2386_s1 + $0x28] sm:$0xff]  }
   0xe   : > { %s1712_s28 = sshll.u32 %s2396_s25, 6  ;;  %1800 = vmatpush3.bf16.msk.msra.mxu1 %vm2081_vm8, %v2010_v23  ;;  %s1713_s26 = sshll.u32 %s2396_s25, 4 }
   0xf   : > { %s2073_s10 = scalar_lea.vmem %s2385_s0, %s1712_s28  ;;  %v2109_v30 = vand.u32 %v450_v21, %v433_v24  ;;  %s2318_s25 = scalar_lea.vmem %s2392_s7, %s1713_s26 }
  0x10   : > { %v280_v12 = vld [vmem:[%s2073_s10] sm:$0xff]  ;;  %v281_v13 = vld [vmem:[%s2073_s10 + $0x8] sm:$0xff]  ;;  %v282_v14 = vld [vmem:[%s2073_s10 + $0x10] sm:$0xff]  ;;  %665 = vperm.xlu0 %1988, %v319_v33   ;;  %670 = vperm.xlu1 %1989, %v320_v35  }
  0x11   : > { %v2085_v17 = vpack.c.bf16 %v281_v13, %v280_v12  ;;  %v283_v22 = vld [vmem:[%s2073_s10 + $0x18] sm:$0xff]  ;;  %v284_v26 = vld [vmem:[%s2073_s10 + $0x20] sm:$0xff]  ;;  %v285_v27 = vld [vmem:[%s2073_s10 + $0x28] sm:$0xff]  ;;  %1801 = vmatprep.subr.bf16.mxu1 %v2109_v30 }
  0x12   : > { %v2094_v25 = vpack.c.bf16 %v283_v22, %v282_v14  ;;  %v286_v31 = vld [vmem:[%s2073_s10 + $0x30] sm:$0xff]  ;;  %v287_v32 = vld [vmem:[%s2073_s10 + $0x38] sm:$0xff]  ;;  %v2119_v34 = vpack.c.bf16 %v285_v27, %v284_v26  ;;  %1802 = vmatpush3.bf16.msra.mxu1 %v2109_v30 }
  0x13   : > { %1787 = vmatprep.subr.bf16.mxu0 %v2085_v17  ;;  %1803 = vmatprep.mubr.msk.bf16.mxu1 %vm434_vm3, %v2085_v17  ;;  %v2128_v36 = vpack.c.bf16 %v287_v32, %v286_v31 }
  0x14   : > { %1788 = vmatpush3.bf16.msra.mxu0 %v2085_v17  ;;  %1018 = vperm.xlu0 %1988, %v321_v37  }
  0x15   : > { %1789 = vmatprep.subr.bf16.mxu0 %v2094_v25  ;;  %1804 = vmatmul.mubr.msk.bf16.vlgmr.msra.gmra.mrb[0].mxu1 %vm434_vm3, %v2094_v25 }
  0x16   : > { %1807 = vmatprep.mubr.msk.bf16.mxu1 %vm434_vm3, %v2119_v34 }
  0x18   : > { %1790 = vmatpush3.bf16.msra.mxu0 %v2094_v25 }
  0x19   : > { %1791 = vmatprep.subr.bf16.mxu0 %v2119_v34 }
  0x1c   : > { %1792 = vmatpush3.bf16.msra.mxu0 %v2119_v34 }
  0x1d   : > { %1793 = vmatprep.subr.bf16.mxu0 %v2128_v36  ;;  %1808 = vmatmul.mubr.msk.bf16.gmra.mrb[4].mxu1 %vm434_vm3, %v2128_v36 }
  0x1e   : > { %1819 = vmatprep.mubr.msk.bf16.mxu1 %vm356_vm1, %v1992_v39 }
  0x20   : > { %1794 = vmatpush3.bf16.msra.mxu0 %v2128_v36 }
  0x21   : > { %1835 = vmatprep.subr.bf16.mxu0 %v2009_v18 }
  0x23   : > { %1796 = vmatmul.mubr.msk.bf16.vlgmr.msra.gmra.mrb[0].mxu0 %vm356_vm1, %v1991_v38 }
  0x24   : > { %1839 = vmatprep.mubr.msk.bf16.mxu0 %vm2011_vm9, %v2009_v18 }
  0x87   : > { %v2153_v42 = vpop.permute.xlu0 %328  ;;  %v2155_v44 = vpop.permute.xlu1 %338 }
  0x8b   : > { %v2157_v48 = vpop.permute.xlu0 %333  ;;  %v2159_v50 = vpop.permute.xlu1 %343 }
  0x8f   : > { %v2217_v10 = vpop.permute.xlu0 %665  ;;  %v2220_v14 = vpop.permute.xlu1 %670 }
  0xe8   : > { %v1805_v40 = vpop.f32.mrb[0].mxu1 }
  0xe9   : > { %v488_v41 = vpop.f32.mrb[1].mxu1 }
  0xea   : > { %v1806_v43 = vpop.f32.mrb[2].mxu1 }
  0xeb   : > { %v520_v45 = vpack.c.bf16 %v1806_v43, %v1805_v40  ;;  %v491_v46 = vpop.f32.mrb[3].mxu1 }
  0xec   : > { %v519_v47 = vpack.c.bf16 %v491_v46, %v488_v41  ;;  %v1998_v46 = vld [vmem:[%s2388_s3 + $0x10] sm:$0xff]  }
  0xee   : > { %1811 = vmatprep.subr.bf16.mxu1 %v519_v47 }
  0xef   : > { %1812 = vmatpush3.bf16.msra.mxu1 %v519_v47  ;;  %v2268_v47 = vld [vmem:[%s2390_s5 + $0x1] sm:$0x1] }
  0xf0   : > { %v1809_v49 = vpop.f32.mrb[4].mxu1  ;;  %1813 = vmatprep.subr.bf16.mxu1 %v520_v45 }
  0xf1   : > { %v504_v52 = vpop.f32.mrb[5].mxu1 }
  0xf2   : > { %v1810_v54 = vpop.f32.mrb[6].mxu1 }
  0xf3   : > { %v522_v57 = vpack.c.bf16 %v1810_v54, %v1809_v49  ;;  %v507_v59 = vpop.f32.mrb[7].mxu1  ;;  %1814 = vmatpush3.bf16.msra.mxu1 %v520_v45  ;;  %v1997_v45 = vld [vmem:[%s2388_s3] sm:$0xff]  }
  0xf4   : > { %v521_v60 = vpack.c.bf16 %v507_v59, %v504_v52 }
  0xf6   : > { %v1797_v51 = vpop.f32.mrb[0].mxu0  ;;  %1815 = vmatprep.subr.bf16.mxu1 %v521_v60 }
  0xf7   : > { %v397_v53 = vpop.f32.mrb[1].mxu0  ;;  %v406_v55 = vadd.f32 %v1797_v51, %v2155_v44  ;;  %1816 = vmatpush3.bf16.msra.mxu1 %v521_v60 }
  0xf8   : > { %v398_v56 = vadd.f32 %v397_v53, %v2153_v42  ;;  %v1798_v58 = vpop.f32.mrb[2].mxu0  ;;  %1817 = vmatprep.subr.bf16.mxu1 %v522_v57 }
  0xf9   : > { %v414_v61 = vmax.f32 %v406_v55, 0.0  ;;  %v400_v62 = vpop.f32.mrb[3].mxu0  ;;  %v409_v63 = vadd.f32 %v1798_v58, %v2159_v50 }
  0xfa   : > { %v412_v0 = vmax.f32 %v398_v56, 0.0  ;;  %v401_v1 = vadd.f32 %v400_v62, %v2157_v48 }
  0xfb   : > { %v415_v2 = vmax.f32 %v409_v63, 0.0  ;;  %1818 = vmatpush3.bf16.msra.mxu1 %v522_v57 }
  0xfc   : > { %v413_v3 = vmax.f32 %v401_v1, 0.0  ;;  %1823 = vmatprep.subr.bf16.mxu1 %v2085_v17 }
  0xfd   : > { %v2165_v4 = vpack.c.bf16 %v415_v2, %v414_v61 }
  0xfe   : > { %v2167_v5 = vpack.c.bf16 %v413_v3, %v412_v0  ;;  %1820 = vmatmul.mubr.msk.bf16.vlgmr.msra.gmra.mrb[8].mxu1 %vm356_vm1, %v1993_v6 }
  0xff   : > { %1824 = vmatpush3.bf16.msra.mxu1 %v2085_v17  ;;  %1831 = vmatprep.mubr.msk.bf16.mxu1 %vm356_vm1, %v1995_v7 }
 0x100   : > { %1836 = vmatpush3.bf16.msra.mxu0 %v2167_v5  ;;  %1825 = vmatprep.subr.bf16.mxu1 %v2094_v25 }
 0x101   : > { %1837 = vmatprep.subr.bf16.mxu0 %v2009_v18 }
 0x103   : > { %1826 = vmatpush3.bf16.msra.mxu1 %v2094_v25 }
 0x104   : > { %1838 = vmatpush3.bf16.msra.mxu0 %v2165_v4  ;;  %1827 = vmatprep.subr.bf16.mxu1 %v2119_v34 }
 0x105   : > { %1843 = vmatprep.subr.bf16.mxu0 %v2009_v18 }
 0x107   : > { %1840 = vmatmul.mubr.msk.bf16.vlgmr.msra.gmra.mrb[4].mxu0 %vm678_vm10, %v2182_v8  ;;  %1828 = vmatpush3.bf16.msra.mxu1 %v2119_v34 }
 0x108   : > { %1847 = vmatprep.mubr.msk.bf16.mxu0 %vm2011_vm9, %v2009_v18  ;;  %1829 = vmatprep.subr.bf16.mxu1 %v2128_v36 }
 0x10b   : > { %1830 = vmatpush3.bf16.msra.mxu1 %v2128_v36 }
 0x10c   : > { %1867 = vmatprep.subr.msk.bf16.mxu1 %vm2081_vm8, %v2010_v23 }
 0x10e   : > { %1832 = vmatmul.mubr.msk.bf16.vlgmr.msra.gmra.mrb[8].mxu1 %vm356_vm1, %v1996_v9  ;;  %v2292_v9 = vld [vmem:[%s2390_s5] sm:$0x1] }
 0x10f   : > { %1868 = vmatpush3.bf16.msk.msra.mxu1 %vm2081_vm8, %v2010_v23  ;;  %1871 = vmatprep.mubr.msk.bf16.mxu1 %vm434_vm3, %v2167_v5 }
 0x110   : > { %1869 = vmatprep.subr.bf16.mxu1 %v2109_v30 }
 0x113   : > { %1870 = vmatpush3.bf16.msra.mxu1 %v2109_v30 }
 0x114   : > { %1883 = vmatprep.subr.bf16.mxu1 %v2009_v18 }
 0x116   : > { %1872 = vmatmul.mubr.msk.bf16.vlgmr.msra.gmra.mrb[12].mxu1 %vm434_vm3, %v2165_v4 }
 0x117   : > { %1887 = vmatprep.mubr.msk.bf16.mxu1 %vm2011_vm9, %v2009_v18 }
 0x1da   : > { %v716_v11 = vpop.f32.mrb[4].mxu0 }
 0x1db   : > { %v717_v12 = vadd.f32 %v716_v11, %v2217_v10  ;;  %v1841_v13 = vpop.f32.mrb[5].mxu0 }
 0x1dc   : > { %v719_v15 = vpop.f32.mrb[6].mxu0 }
 0x1dd   : > { %v720_v17 = vadd.f32 %v719_v15, %v2220_v14  ;;  %v1842_v19 = vpop.f32.mrb[7].mxu0  ;;  %v723_v20 = vmax.f32 %v717_v12, 0.0 }
 0x1df   : > { %v724_v21 = vmax.f32 %v720_v17, 0.0 }
 0x1e1   : > { %v2223_v22 = vpack.c.bf16 %v724_v21, %v723_v20  ;;  %v1833_v24 = vpop.f32.mrb[8].mxu1 }
 0x1e2   : > { %v655_v25 = vadd.f32 %v1833_v24, %v2155_v44  ;;  %v638_v26 = vpop.f32.mrb[9].mxu1 }
 0x1e3   : > { %v653_v27 = vadd.f32 %v638_v26, %v2153_v42  ;;  %v1834_v28 = vpop.f32.mrb[10].mxu1 }
 0x1e4   : > { %v656_v29 = vadd.f32 %v1834_v28, %v2159_v50  ;;  %v641_v31 = vpop.f32.mrb[11].mxu1  ;;  %v659_v33 = vmax.f32 %v655_v25, 0.0 }
 0x1e5   : > { %v654_v32 = vadd.f32 %v641_v31, %v2157_v48  ;;  %v657_v35 = vmax.f32 %v653_v27, 0.0  ;;  %v2279_v48 = vld [vmem:[%s2390_s5 + $0x2] sm:$0x1] }
 0x1e6   : > { %v660_v34 = vmax.f32 %v656_v29, 0.0 }
 0x1e7   : > { %v658_v36 = vmax.f32 %v654_v32, 0.0 }
 0x1e8   : > { %v726_v37 = vpack.c.bf16 %v660_v34, %v659_v33 }
 0x1e9   : > { %v725_v38 = vpack.c.bf16 %v658_v36, %v657_v35  ;;  %v1873_v39 = vpop.f32.mrb[12].mxu1 }
 0x1ea   : > { %v912_v40 = vpop.f32.mrb[13].mxu1 }
 0x1eb   : > { %1844 = vmatpush3.bf16.msra.mxu0 %v725_v38  ;;  %1884 = vmatpush3.bf16.msra.mxu1 %v725_v38  ;;  %v1874_v41 = vpop.f32.mrb[14].mxu1 }
 0x1ec   : > { %1845 = vmatprep.subr.bf16.mxu0 %v2009_v18  ;;  %1885 = vmatprep.subr.bf16.mxu1 %v2009_v18  ;;  %v928_v42 = vpack.c.bf16 %v1874_v41, %v1873_v39  ;;  %v915_v43 = vpop.f32.mrb[15].mxu1 }
 0x1ed   : > { %v927_v44 = vpack.c.bf16 %v915_v43, %v912_v40 }
 0x1ef   : > { %1846 = vmatpush3.bf16.msra.mxu0 %v726_v37  ;;  %1886 = vmatpush3.bf16.msra.mxu1 %v726_v37 }
 0x1f0   : > { %1851 = vmatprep.subr.bf16.mxu0 %v2009_v18  ;;  %1897 = vmatprep.subr.bf16.mxu1 %v2009_v18 }
 0x1f2   : > { %1848 = vmatmul.mubr.msk.bf16.vlgmr.msra.gmra.mrb[8].mxu0 %vm678_vm10, %v1997_v45  ;;  %1888 = vmatmul.mubr.msk.bf16.vlgmr.msra.gmra.mrb[16].mxu1 %vm678_vm10, %v1998_v46 }
 0x1f3   : > { %1852 = vmatpush3.bf16.msra.mxu0 %v2167_v5  ;;  %1855 = vmatprep.mubr.msk.bf16.mxu0 %vm2011_vm9, %v2009_v18 }
 0x1f4   : > { %1853 = vmatprep.subr.bf16.mxu0 %v2009_v18  ;;  %1899 = vmatprep.mubr.msk.bf16.mxu1 %vm2011_vm9, %v2009_v18 }
 0x1f7   : > { %1854 = vmatpush3.bf16.msra.mxu0 %v2165_v4 }
 0x1f8   : > { %1859 = vmatprep.subr.bf16.mxu0 %v2009_v18 }
 0x1fa   : > { %1856 = vmatmul.mubr.msk.bf16.vlgmr.msra.gmra.mrb[12].mxu0 %vm678_vm10, %v1998_v46 }
 0x1fb   : > { %1860 = vmatpush3.bf16.msra.mxu0 %v725_v38  ;;  %1863 = vmatprep.mubr.msk.bf16.mxu0 %vm2011_vm9, %v2009_v18 }
 0x1fc   : > { %1861 = vmatprep.subr.bf16.mxu0 %v2009_v18 }
 0x1ff   : > { %1862 = vmatpush3.bf16.msra.mxu0 %v726_v37 }
 0x200   : > { %1875 = vmatprep.subr.bf16.mxu0 %v2009_v18 }
 0x202   : > { %1864 = vmatmul.mubr.msk.bf16.vlgmr.msra.gmra.mrb[16].mxu0 %vm678_vm10, %v2182_v8 }
 0x203   : > { %1876 = vmatpush3.bf16.msra.mxu0 %v927_v44  ;;  %1879 = vmatprep.mubr.msk.bf16.mxu0 %vm2011_vm9, %v2009_v18 }
 0x204   : > { %1877 = vmatprep.subr.bf16.mxu0 %v2009_v18 }
 0x207   : > { %1878 = vmatpush3.bf16.msra.mxu0 %v928_v42 }
 0x208   : > { %1891 = vmatprep.subr.bf16.mxu0 %v2009_v18 }
 0x20a   : > { %1880 = vmatmul.mubr.msk.bf16.vlgmr.msra.gmra.mrb[20].mxu0 %vm678_vm10, %v1997_v45 }
 0x20b   : > { %1892 = vmatpush3.bf16.msra.mxu0 %v2223_v22  ;;  %1893 = vmatprep.mubr.msk.bf16.mxu0 %vm2011_vm9, %v2009_v18 }
 0x20c   : > { %1903 = vmatprep.subr.bf16.mxu0 %v2009_v18 }
 0x212   : > { %1894 = vmatmul.mubr.msk.bf16.vlgmr.msra.gmra.mrb[24].mxu0 %vm1021_vm11, %v2268_v47 }
 0x213   : > { %1904 = vmatpush3.bf16.msra.mxu0 %v2223_v22  ;;  %1905 = vmatprep.mubr.msk.bf16.mxu0 %vm2011_vm9, %v2009_v18 }
 0x214   : > { %1915 = vmatprep.subr.bf16.mxu0 %v2009_v18 }
 0x21a   : > { %1906 = vmatmul.mubr.msk.bf16.vlgmr.msra.gmra.mrb[28].mxu0 %vm1021_vm11, %v2279_v48 }
 0x21b   : > { %1917 = vmatprep.mubr.msk.bf16.mxu0 %vm2011_vm9, %v2009_v18 }
 0x2c5   : > { %v769_v49 = vpop.f32.mrb[8].mxu0  ;;  %v1004_v50 = vpop.f32.mrb[16].mxu1 }
 0x2c6   : > { %v1849_v51 = vpop.f32.mrb[9].mxu0  ;;  %v1889_v52 = vpop.f32.mrb[17].mxu1 }
 0x2c7   : > { %v772_v53 = vpop.f32.mrb[10].mxu0  ;;  %v1007_v54 = vpop.f32.mrb[18].mxu1 }
 0x2c8   : > { %v1850_v55 = vpop.f32.mrb[11].mxu0  ;;  %v1890_v56 = vpop.f32.mrb[19].mxu1 }
 0x2cd   : > { %v818_v57 = vpop.f32.mrb[12].mxu0 }
 0x2ce   : > { %v819_v58 = vadd.f32 %v818_v57, %v769_v49  ;;  %v1857_v59 = vpop.f32.mrb[13].mxu0 }
 0x2cf   : > { %v821_v60 = vpop.f32.mrb[14].mxu0 }
 0x2d0   : > { %v825_v61 = vadd.f32 %v819_v58, %v2217_v10  ;;  %v822_v62 = vadd.f32 %v821_v60, %v772_v53  ;;  %v1858_v63 = vpop.f32.mrb[15].mxu0 }
 0x2d2   : > { %v826_v0 = vadd.f32 %v822_v62, %v2220_v14  ;;  %v827_v1 = vmax.f32 %v825_v61, 0.0 }
 0x2d4   : > { %v828_v2 = vmax.f32 %v826_v0, 0.0 }
 0x2d5   : > { %v863_v3 = vpop.f32.mrb[16].mxu0 }
 0x2d6   : > { %v1067_v4 = vpack.c.bf16 %v828_v2, %v827_v1  ;;  %v864_v5 = vadd.f32 %v863_v3, %v2217_v10  ;;  %v1865_v6 = vpop.f32.mrb[17].mxu0 }
 0x2d7   : > { %v866_v7 = vpop.f32.mrb[18].mxu0 }
 0x2d8   : > { %v867_v8 = vadd.f32 %v866_v7, %v2220_v14  ;;  %1898 = vmatpush3.bf16.msra.mxu1 %v1067_v4  ;;  %v1866_v11 = vpop.f32.mrb[19].mxu0  ;;  %v870_v12 = vmax.f32 %v864_v5, 0.0 }
 0x2d9   : > { %1909 = vmatprep.subr.bf16.mxu1 %v2009_v18 }
 0x2da   : > { %v871_v13 = vmax.f32 %v867_v8, 0.0 }
 0x2db   : > { %1900 = vmatmul.mubr.msk.bf16.vlgmr.msra.gmra.mrb[20].mxu1 %vm1021_vm11, %v2292_v9 }
 0x2dc   : > { %v1199_v15 = vpack.c.bf16 %v871_v13, %v870_v12  ;;  %1910 = vmatpush3.bf16.msra.mxu1 %v1067_v4  ;;  %1911 = vmatprep.mubr.msk.bf16.mxu1 %vm2011_vm9, %v2009_v18 }
 0x2dd   : > { %v963_v17 = vpop.f32.mrb[20].mxu0  ;;  %1921 = vmatprep.subr.bf16.mxu1 %v2009_v18 }
 0x2de   : > { %v1005_v19 = vadd.f32 %v1004_v50, %v963_v17  ;;  %v1881_v20 = vpop.f32.mrb[21].mxu0  ;;  %1916 = vmatpush3.bf16.msra.mxu0 %v1199_v15 }
 0x2df   : > { %v966_v21 = vpop.f32.mrb[22].mxu0  ;;  %1927 = vmatprep.subr.bf16.mxu0 %v2009_v18 }
 0x2e0   : > { %v1011_v24 = vadd.f32 %v1005_v19, %v2217_v10  ;;  %v1008_v25 = vadd.f32 %v1007_v54, %v966_v21  ;;  %v1882_v26 = vpop.f32.mrb[23].mxu0  ;;  %v2313_v10 = vpop.permute.xlu0 %1018 }
 0x2e1   : > { %1918 = vmatmul.mubr.msk.bf16.vlgmr.msra.gmra.mrb[32].mxu0 %vm1021_vm11, %v2292_v9 }
 0x2e2   : > { %v1012_v27 = vadd.f32 %v1008_v25, %v2220_v14  ;;  %1928 = vmatpush3.bf16.msra.mxu0 %v1199_v15  ;;  %1929 = vmatprep.mubr.msk.bf16.mxu0 %vm2011_vm9, %v2009_v18  ;;  %v1013_v28 = vmax.f32 %v1011_v24, 0.0 }
 0x2e3   : > { %1912 = vmatmul.mubr.msk.bf16.vlgmr.msra.gmra.mrb[24].mxu1 %vm1021_vm11, %v2268_v47  ;;  %1939 = vmatprep.subr.bf16.mxu0 %v2009_v18 }
 0x2e4   : > { %v1014_v29 = vmax.f32 %v1012_v27, 0.0  ;;  %1922 = vmatpush3.bf16.msra.mxu1 %v1067_v4  ;;  %1923 = vmatprep.mubr.msk.bf16.mxu1 %vm2011_vm9, %v2009_v18 }
 0x2e5   : > { %v1059_v14 = vpop.f32.mrb[24].mxu0  ;;  %1933 = vmatprep.subr.bf16.mxu1 %v2009_v18 }
 0x2e6   : > { %v1325_v31 = vpack.c.bf16 %v1014_v29, %v1013_v28  ;;  %v1060_v32 = vadd.f32 %v1059_v14, %v2313_v10  ;;  %v1895_v33 = vpop.f32.mrb[25].mxu0 }
 0x2e7   : > { %v1062_v34 = vpop.f32.mrb[26].mxu0 }
 0x2e8   : > { %1066 = vst.msk [vmem:[%s2318_s25] sm:$0x3] %vm1065_vm12, %v1060_v32  ;;  %v1896_v35 = vpop.f32.mrb[27].mxu0 }
 0x2e9   : > { %1930 = vmatmul.mubr.msk.bf16.vlgmr.msra.gmra.mrb[36].mxu0 %vm1021_vm11, %v2268_v47 }
 0x2ea   : > { %1940 = vmatpush3.bf16.msra.mxu0 %v1199_v15  ;;  %1941 = vmatprep.mubr.msk.bf16.mxu0 %vm2011_vm9, %v2009_v18 }
 0x2eb   : > { %1924 = vmatmul.mubr.msk.bf16.vlgmr.msra.gmra.mrb[28].mxu1 %vm1021_vm11, %v2279_v48  ;;  %1953 = vmatprep.subr.bf16.mxu0 %v2009_v18 }
 0x2ec   : > { %1934 = vmatpush3.bf16.msra.mxu1 %v1325_v31  ;;  %1935 = vmatprep.mubr.msk.bf16.mxu1 %vm2011_vm9, %v2009_v18 }
 0x2ed   : > { %1945 = vmatprep.subr.bf16.mxu1 %v2009_v18  ;;  %v1148_v16 = vpop.f32.mrb[28].mxu0 }
 0x2f1   : > { %1942 = vmatmul.mubr.msk.bf16.vlgmr.msra.gmra.mrb[40].mxu0 %vm1021_vm11, %v2279_v48 }
 0x2f2   : > { %1954 = vmatpush3.bf16.msra.mxu0 %v1325_v31  ;;  %1955 = vmatprep.mubr.msk.bf16.mxu0 %vm2011_vm9, %v2009_v18 }
 0x2f3   : > { %1936 = vmatmul.mubr.msk.bf16.vlgmr.msra.gmra.mrb[32].mxu1 %vm1021_vm11, %v2292_v9  ;;  %1965 = vmatprep.subr.bf16.mxu0 %v2009_v18 }
 0x2f4   : > { %1946 = vmatpush3.bf16.msk.msra.mxu1 %vm2081_vm8, %v2010_v23  ;;  %1949 = vmatprep.mubr.msk.bf16.mxu1 %vm2011_vm9, %v2009_v18  ;;  %v1907_v23 = vpop.f32.mrb[29].mxu0 }
 0x2f5   : > { %1947 = vmatprep.subr.bf16.mxu1 %v2009_v18 }
 0x2f8   : > { %1948 = vmatpush3.bf16.msra.mxu1 %v2109_v30  ;;  %v1151_v30 = vpop.f32.mrb[30].mxu0 }
 0x2f9   : > { %1956 = vmatmul.mubr.msk.bf16.vlgmr.msra.gmra.mrb[44].mxu0 %vm1021_vm11, %v2268_v47  ;;  %1959 = vmatprep.subr.bf16.mxu1 %v2009_v18  ;;  %v1908_v36 = vpop.f32.mrb[31].mxu0 }
 0x2fa   : > { %1966 = vmatpush3.bf16.msra.mxu0 %v1325_v31  ;;  %1967 = vmatprep.mubr.msk.bf16.mxu0 %vm2011_vm9, %v2009_v18 }
 0x2fb   : > { %1950 = vmatmul.mubr.msk.bf16.vlgmr.msra.gmra.mrb[36].mxu1 %vm434_vm3, %v2223_v22 }
 0x2fc   : > { %1961 = vmatprep.mubr.msk.bf16.mxu1 %vm2011_vm9, %v2009_v18 }
 0x301   : > { %1968 = vmatmul.mubr.msk.bf16.vlgmr.msra.gmra.mrb[48].mxu0 %vm1021_vm11, %v2279_v48 }
 0x3ae   : > { %v1105_v37 = vpop.f32.mrb[20].mxu1 }
 0x3af   : > { %v1149_v38 = vadd.f32 %v1148_v16, %v1105_v37  ;;  %v1901_v39 = vpop.f32.mrb[21].mxu1 }
 0x3b0   : > { %v1108_v40 = vpop.f32.mrb[22].mxu1 }
 0x3b1   : > { %v1154_v41 = vadd.f32 %v1149_v38, %v2313_v10  ;;  %v1902_v42 = vpop.f32.mrb[23].mxu1 }
 0x3b3   : > { %1691 = vst.msk [vmem:[%s2318_s25 + $0x2] sm:$0x3] %vm1065_vm12, %v1154_v41 }
 0x3b4   : > { %v1234_v22 = vpop.f32.mrb[32].mxu0 }
 0x3b5   : > { %v1919_v18 = vpop.f32.mrb[33].mxu0 }
 0x3b6   : > { %v1191_v43 = vpop.f32.mrb[24].mxu1  ;;  %v1237_v44 = vpop.f32.mrb[34].mxu0 }
 0x3b7   : > { %v1192_v45 = vadd.f32 %v1191_v43, %v2313_v10  ;;  %v1913_v46 = vpop.f32.mrb[25].mxu1  ;;  %v1920_v47 = vpop.f32.mrb[35].mxu0 }
 0x3b8   : > { %v1194_v48 = vpop.f32.mrb[26].mxu1 }
 0x3b9   : > { %1693 = vst.msk [vmem:[%s2318_s25 + $0x4] sm:$0x3] %vm1065_vm12, %v1192_v45  ;;  %v1914_v49 = vpop.f32.mrb[27].mxu1 }
 0x3bc   : > { %v1317_v50 = vpop.f32.mrb[36].mxu0 }
 0x3bd   : > { %v1318_v51 = vadd.f32 %v1317_v50, %v2313_v10  ;;  %v1931_v52 = vpop.f32.mrb[37].mxu0 }
 0x3be   : > { %v1274_v53 = vpop.f32.mrb[28].mxu1  ;;  %v1320_v54 = vpop.f32.mrb[38].mxu0 }
 0x3bf   : > { %1698 = vst.msk [vmem:[%s2318_s25 + $0x8] sm:$0x3] %vm1065_vm12, %v1318_v51  ;;  %v1275_v55 = vadd.f32 %v1274_v53, %v1234_v22  ;;  %v1925_v56 = vpop.f32.mrb[29].mxu1  ;;  %v1932_v57 = vpop.f32.mrb[39].mxu0 }
 0x3c0   : > { %v1277_v58 = vpop.f32.mrb[30].mxu1 }
 0x3c1   : > { %v1280_v59 = vadd.f32 %v1275_v55, %v2313_v10  ;;  %v1926_v60 = vpop.f32.mrb[31].mxu1 }
 0x3c3   : > { %1696 = vst.msk [vmem:[%s2318_s25 + $0x6] sm:$0x3] %vm1065_vm12, %v1280_v59 }
 0x3c4   : > { %v1400_v61 = vpop.f32.mrb[40].mxu0 }
 0x3c5   : > { %v1943_v62 = vpop.f32.mrb[41].mxu0 }
 0x3c6   : > { %v1360_v63 = vpop.f32.mrb[32].mxu1  ;;  %v1403_v0 = vpop.f32.mrb[42].mxu0 }
 0x3c7   : > { %v1401_v1 = vadd.f32 %v1400_v61, %v1360_v63  ;;  %v1937_v2 = vpop.f32.mrb[33].mxu1  ;;  %v1944_v3 = vpop.f32.mrb[43].mxu0 }
 0x3c8   : > { %v1363_v4 = vpop.f32.mrb[34].mxu1 }
 0x3c9   : > { %v1406_v5 = vadd.f32 %v1401_v1, %v2313_v10  ;;  %v1938_v6 = vpop.f32.mrb[35].mxu1 }
 0x3cb   : > { %1701 = vst.msk [vmem:[%s2318_s25 + $0xa] sm:$0x3] %vm1065_vm12, %v1406_v5 }
 0x3cc   : > { %v1487_v7 = vpop.f32.mrb[44].mxu0 }
 0x3cd   : > { %v1488_v8 = vadd.f32 %v1487_v7, %v2313_v10  ;;  %v1957_v11 = vpop.f32.mrb[45].mxu0 }
 0x3ce   : > { %v1446_v12 = vpop.f32.mrb[36].mxu1  ;;  %v1490_v13 = vpop.f32.mrb[46].mxu0 }
 0x3cf   : > { %1706 = vst.msk [vmem:[%s2318_s25 + $0xc] sm:$0x3] %vm1065_vm12, %v1488_v8  ;;  %v1951_v15 = vpop.f32.mrb[37].mxu1  ;;  %v1958_v17 = vpop.f32.mrb[47].mxu0 }
 0x3d0   : > { %v1449_v19 = vpop.f32.mrb[38].mxu1 }
 0x3d1   : > { %v1495_v20 = vpack.c.bf16 %v1449_v19, %v1446_v12  ;;  %v1952_v21 = vpop.f32.mrb[39].mxu1 }
 0x3d3   : > { %1960 = vmatpush3.bf16.msra.mxu1 %v1495_v20 }
 0x3d4   : > { %v1570_v24 = vpop.f32.mrb[48].mxu0 }
 0x3d5   : > { %v1969_v25 = vpop.f32.mrb[49].mxu0 }
 0x3d6   : > { %1962 = vmatmul.mubr.msk.bf16.vlgmr.msra.gmra.mrb[40].mxu1 %vm1021_vm11, %v2292_v9  ;;  %v1573_v26 = vpop.f32.mrb[50].mxu0 }
 0x3d7   : > { %v1970_v27 = vpop.f32.mrb[51].mxu0 }
 0x4a9   : > { %v1530_v28 = vpop.f32.mrb[40].mxu1 }
 0x4aa   : > { %v1571_v29 = vadd.f32 %v1570_v24, %v1530_v28  ;;  %v1963_v14 = vpop.f32.mrb[41].mxu1 }
 0x4ab   : > { %v1533_v31 = vpop.f32.mrb[42].mxu1 }
 0x4ac   : > { %v1576_v32 = vadd.f32 %v1571_v29, %v2313_v10  ;;  %v1964_v33 = vpop.f32.mrb[43].mxu1 }
 0x4ae   : > { %1709 = vst.msk [vmem:[%s2318_s25 + $0xe] sm:$0x3] %vm1065_vm12, %v1576_v32 }
 0x4af PF: > { %s17_s24 = sadd.s32 1, %s2005_s24  }
 0x4b0   : > { %p14_p4 = scmp.ge.s32.totalorder %s17_s24, 4  }
 0x4b2   :  { %16 = sbr.rel (!%p14_p4) target bundleno = 1 (0x1), region = 91 }

</bundles_post_ra>
